<compile_context>
chip_gen: v5e
topology: v5e:2x2
jax: 0.10.0
libtpu: 0.0.40
codegen_flags: <defaults>
</compile_context>

<pallas_src>
import functools

import jax
import jax.numpy as jnp
from jax.experimental import pallas as pl
from jax.experimental.pallas import tpu as pltpu

LN_EPS = 1e-5   # torch.nn.LayerNorm default
LANE = 128
SUBLANE = 8

# Row layout of the packed parameter tile (one parameter vector per row,
# left-aligned at lane 0, zero-padded to the lane width):
_R_FN_G_OBS, _R_FN_B_OBS, _R_FN_G_ACT, _R_FN_B_ACT = 0, 1, 2, 3
_R_B1, _R_LN1_G, _R_LN1_B, _R_B2, _R_LN2_G, _R_LN2_B = 4, 5, 6, 7, 8, 9
_R_WQ0 = 10            # rows 10 .. 10+num_q-1 : q-head weight rows (wq^T)
                       # row  10+num_q         : q-head biases at lanes 0..num_q-1


def _round_up(x, m):
    return (x + m - 1) // m * m


def _cdiv(a, b):
    return -(-a // b)


def _layer_norm_1pass(v, gamma, beta, valid_dim):
    """LayerNorm over the last axis where only the first `valid_dim` lanes hold
    real data and all padded lanes of `v` are exactly zero (so full-tile sums
    equal the valid-lane sums).  gamma/beta are zero-padded -> padded lanes
    stay exactly 0 on output."""
    s = jnp.sum(v, axis=-1, keepdims=True)
    ss = jnp.sum(v * v, axis=-1, keepdims=True)
    mu = s / float(valid_dim)
    var = jnp.maximum(ss / float(valid_dim) - mu * mu, 0.0)
    inv = jax.lax.rsqrt(var + LN_EPS)
    return (v - mu) * inv * gamma + beta


def critic_kernel(obs_ref, act_ref, vec_ref, w1o_ref, w1a_ref, w2_ref, q_ref,
                  *, obs_dim, act_dim, hidden_dim, num_q, matmul_dtype):
    h_pad = w2_ref.shape[0]
    vec = vec_ref[...]                       # (R, VW) f32, all small params

    obs = obs_ref[...].astype(jnp.float32)   # (tb, obs_dim)
    act = act_ref[...].astype(jnp.float32)   # (tb, act_dim)

    # ---- feature LayerNorm over the (virtual) concat [obs, act] -------------
    d_in = float(obs_dim + act_dim)
    s = jnp.sum(obs, axis=-1, keepdims=True) + jnp.sum(act, axis=-1, keepdims=True)
    ss = (jnp.sum(obs * obs, axis=-1, keepdims=True)
          + jnp.sum(act * act, axis=-1, keepdims=True))
    mu = s / d_in
    var = jnp.maximum(ss / d_in - mu * mu, 0.0)
    inv = jax.lax.rsqrt(var + LN_EPS)
    obs_n = ((obs - mu) * inv * vec[_R_FN_G_OBS:_R_FN_G_OBS + 1, :obs_dim]
             + vec[_R_FN_B_OBS:_R_FN_B_OBS + 1, :obs_dim])
    act_n = ((act - mu) * inv * vec[_R_FN_G_ACT:_R_FN_G_ACT + 1, :act_dim]
             + vec[_R_FN_B_ACT:_R_FN_B_ACT + 1, :act_dim])

    # ---- fc1: Linear (split over obs/act halves of W1) -> ReLU -> LayerNorm --
    h = (jnp.dot(obs_n.astype(matmul_dtype), w1o_ref[...],
                 preferred_element_type=jnp.float32)
         + jnp.dot(act_n.astype(matmul_dtype), w1a_ref[...],
                   preferred_element_type=jnp.float32)
         + vec[_R_B1:_R_B1 + 1, :h_pad])
    h = jnp.maximum(h, 0.0)
    h = _layer_norm_1pass(h, vec[_R_LN1_G:_R_LN1_G + 1, :h_pad],
                          vec[_R_LN1_B:_R_LN1_B + 1, :h_pad], hidden_dim)

    # ---- fc2 (layer_N = 1): Linear -> ReLU -> LayerNorm ----------------------
    h = (jnp.dot(h.astype(matmul_dtype), w2_ref[...],
                 preferred_element_type=jnp.float32)
         + vec[_R_B2:_R_B2 + 1, :h_pad])
    h = jnp.maximum(h, 0.0)
    h = _layer_norm_1pass(h, vec[_R_LN2_G:_R_LN2_G + 1, :h_pad],
                          vec[_R_LN2_B:_R_LN2_B + 1, :h_pad], hidden_dim)

    # ---- q heads on the VPU: q_j = sum(h * wq_j) + bq_j ----------------------
    # (num_q is 1-2, so an MXU matmul would push a nearly empty RHS; the VPU
    #  broadcast-mul + XLU lane-reduce has slack here.)
    lane = jax.lax.broadcasted_iota(jnp.int32, (1, num_q), 1)   # [[0,1,...]]
    q = None
    for j in range(num_q):                       # static, tiny loop
        wq_j = vec[_R_WQ0 + j:_R_WQ0 + j + 1, :h_pad]           # (1, h_pad)
        q_j = jnp.sum(h * wq_j, axis=-1, keepdims=True)         # (tb, 1)
        contrib = q_j * (lane == j).astype(jnp.float32)         # (tb, num_q)
        q = contrib if q is None else q + contrib
    bq = vec[_R_WQ0 + num_q:_R_WQ0 + num_q + 1, :num_q]         # (1, num_q)
    q_ref[...] = q + bq


# ----------------------------------------------------------------------------
# Parameter setup
# ----------------------------------------------------------------------------
def init_params(key, central_obs_dim, central_act_dim, hidden_size, num_q_outs=1):
    """Logical (torch-layout, unpadded, f32) parameters.
    Weights are [in_features, out_features] so forward computes x @ W."""
    # TODO(synk): orthogonal / xavier init of the torch module is host-side
    # setup; a synthetic deterministic init is used here (kernel semantics only).
    input_dim = central_obs_dim + central_act_dim
    ks = jax.random.split(key, 9)

    def dense(k, fan_in, fan_out):
        return jax.random.normal(k, (fan_in, fan_out), jnp.float32) / jnp.sqrt(
            jnp.float32(fan_in))

    def vec(k, n, scale=0.1, base=0.0):
        return base + scale * jax.random.normal(k, (n,), jnp.float32)

    return {
        "fn_g": vec(ks[3], input_dim, base=1.0),
        "fn_b": vec(ks[4], input_dim),
        "w1": dense(ks[0], input_dim, hidden_size),
        "b1": vec(ks[5], hidden_size),
        "ln1_g": vec(ks[6], hidden_size, base=1.0),
        "ln1_b": vec(ks[7], hidden_size),
        "w2": dense(ks[1], hidden_size, hidden_size),
        "b2": vec(ks[8], hidden_size),
        "ln2_g": jnp.ones((hidden_size,), jnp.float32),
        "ln2_b": jnp.zeros((hidden_size,), jnp.float32),
        "wq": dense(ks[2], hidden_size, num_q_outs),
        "bq": jnp.zeros((num_q_outs,), jnp.float32),
    }


def pack_params(p, central_obs_dim, central_act_dim, hidden_size, num_q_outs,
                matmul_dtype=jnp.bfloat16):
    """Pad hidden dims to 128 lanes, consolidate all small vectors into one
    (R, VW) f32 tile, split W1 into obs/act halves and cast matmul weights to
    the MXU input dtype.  All padding is zeros so padded lanes are inert."""
    H = hidden_size
    H_pad = _round_up(H, LANE)
    VW = max(H_pad, _round_up(central_obs_dim, LANE),
             _round_up(central_act_dim, LANE))
    R = _round_up(_R_WQ0 + num_q_outs + 1, SUBLANE)

    vec = jnp.zeros((R, VW), jnp.float32)

    def setv(v, r, x):
        return v.at[r, :x.shape[0]].set(x.astype(jnp.float32))

    vec = setv(vec, _R_FN_G_OBS, p["fn_g"][:central_obs_dim])
    vec = setv(vec, _R_FN_B_OBS, p["fn_b"][:central_obs_dim])
    vec = setv(vec, _R_FN_G_ACT, p["fn_g"][central_obs_dim:])
    vec = setv(vec, _R_FN_B_ACT, p["fn_b"][central_obs_dim:])
    vec = setv(vec, _R_B1, p["b1"])
    vec = setv(vec, _R_LN1_G, p["ln1_g"])
    vec = setv(vec, _R_LN1_B, p["ln1_b"])
    vec = setv(vec, _R_B2, p["b2"])
    vec = setv(vec, _R_LN2_G, p["ln2_g"])
    vec = setv(vec, _R_LN2_B, p["ln2_b"])
    for j in range(num_q_outs):
        vec = setv(vec, _R_WQ0 + j, p["wq"][:, j])
    vec = setv(vec, _R_WQ0 + num_q_outs, p["bq"])

    w1 = jnp.pad(p["w1"], ((0, 0), (0, H_pad - H)))
    w2 = jnp.pad(p["w2"], ((0, H_pad - H), (0, H_pad - H)))

    return {
        "vec": vec,
        "w1_obs": w1[:central_obs_dim].astype(matmul_dtype),
        "w1_act": w1[central_obs_dim:].astype(matmul_dtype),
        "w2": w2.astype(matmul_dtype),
    }


# ----------------------------------------------------------------------------
# Forward wrapper
# ----------------------------------------------------------------------------
def maddpg_critic_forward(central_obs, central_act, packed, *,
                          central_obs_dim, central_act_dim, hidden_size,
                          num_q_outs, block_b=2048, matmul_dtype=jnp.bfloat16):
    """Returns q-values as a single [B, num_q_outs] f32 array
    (per-head values are q[:, i:i+1], matching the torch module's list)."""
    B = central_obs.shape[0]
    H_pad = _round_up(hidden_size, LANE)
    R, VW = packed["vec"].shape

    # ---- batch tiling: large tiles, no host-side padding of the inputs. ------
    # Prefer an even number of grid steps >= 2 when the batch is large so the
    # "parallel" batch axis splits across both TensorCores on v7x.
    grid_b = max(1, _cdiv(B, block_b))
    if grid_b == 1 and B >= 1024:
        grid_b = 2
    if grid_b > 1 and grid_b % 2 == 1:
        grid_b += 1
    tb = max(SUBLANE, _round_up(_cdiv(B, grid_b), SUBLANE))
    grid_b = _cdiv(B, tb)        # final partial tile handled by Pallas masking

    kernel = functools.partial(
        critic_kernel,
        obs_dim=central_obs_dim, act_dim=central_act_dim,
        hidden_dim=hidden_size, num_q=num_q_outs, matmul_dtype=matmul_dtype)

    def stream(d):               # batch-tiled, double-buffered inputs/outputs
        return pl.BlockSpec((tb, d), lambda i: (i, 0))

    def const(r, c):             # constant index_map -> resident, not re-DMA'd
        return pl.BlockSpec((r, c), lambda i: (0, 0))

    in_specs = [
        stream(central_obs_dim), stream(central_act_dim),
        const(R, VW),
        const(central_obs_dim, H_pad), const(central_act_dim, H_pad),
        const(H_pad, H_pad),
    ]
    out_specs = pl.BlockSpec((tb, num_q_outs), lambda i: (i, 0))

    d_in = central_obs_dim + central_act_dim
    w_elems = d_in * H_pad + H_pad * H_pad + H_pad * num_q_outs
    in_itemsize = jnp.dtype(central_obs.dtype).itemsize
    cost = pl.CostEstimate(
        flops=2 * B * w_elems,
        transcendentals=3 * B,
        bytes_accessed=int(in_itemsize * B * d_in + 4 * B * num_q_outs
                           + 2 * w_elems + 4 * R * VW),
    )

    q = pl.pallas_call(
        kernel,
        out_shape=jax.ShapeDtypeStruct((B, num_q_outs), jnp.float32),
        grid_spec=pltpu.PrefetchScalarGridSpec(
            num_scalar_prefetch=0,
            grid=(grid_b,),
            in_specs=in_specs,
            out_specs=out_specs,
        ),
        compiler_params=pltpu.CompilerParams(
            dimension_semantics=("parallel",),       # megacore split on v7x
            vmem_limit_bytes=32 * 1024 * 1024,       # safe on v5e/v6e/v7x
        ),
        cost_estimate=cost,
    )(central_obs, central_act, packed["vec"],
      packed["w1_obs"], packed["w1_act"], packed["w2"])

    return q


# ----------------------------------------------------------------------------
# Pure-JAX reference (torch-style two-pass LayerNorm, concat in HBM)
# ----------------------------------------------------------------------------
def _layer_norm_ref(v, gamma, beta):
    mu = jnp.mean(v, axis=-1, keepdims=True)
    var = jnp.mean(jnp.square(v - mu), axis=-1, keepdims=True)
    return (v - mu) * jax.lax.rsqrt(var + LN_EPS) * gamma + beta


def reference_forward(central_obs, central_act, p, matmul_dtype=jnp.float32):
    def mm(a, w):
        return jnp.dot(a.astype(matmul_dtype), w.astype(matmul_dtype),
                       preferred_element_type=jnp.float32)

    x = jnp.concatenate([central_obs, central_act], axis=1).astype(jnp.float32)
    x = _layer_norm_ref(x, p["fn_g"], p["fn_b"])
    h = jnp.maximum(mm(x, p["w1"]) + p["b1"], 0.0)
    h = _layer_norm_ref(h, p["ln1_g"], p["ln1_b"])
    h = jnp.maximum(mm(h, p["w2"]) + p["b2"], 0.0)
    h = _layer_norm_ref(h, p["ln2_g"], p["ln2_b"])
    return mm(h, p["wq"]) + p["bq"]


if __name__ == "__main__":
    key = jax.random.PRNGKey(0)
    k_obs, k_act, k_param = jax.random.split(key, 3)

    batch = 300                 # deliberately NOT a multiple of the batch tile
    central_obs_dim = 24
    central_act_dim = 8
    hidden_size = 64
    num_q_outs = 2              # 1 for MADDPG, 2 for MATD3

    central_obs = jax.random.normal(k_obs, (batch, central_obs_dim), jnp.float32)
    central_act = jax.random.normal(k_act, (batch, central_act_dim), jnp.float32)

    params = init_params(k_param, central_obs_dim, central_act_dim,
                         hidden_size, num_q_outs)
    packed = pack_params(params, central_obs_dim, central_act_dim,
                         hidden_size, num_q_outs, matmul_dtype=jnp.bfloat16)

    # block_b is set small here ONLY so the tiny demo batch still exercises a
    # multi-step grid and a partial final tile; the production default is 2048.
    q = maddpg_critic_forward(
        central_obs, central_act, packed,
        central_obs_dim=central_obs_dim, central_act_dim=central_act_dim,
        hidden_size=hidden_size, num_q_outs=num_q_outs,
        block_b=256, matmul_dtype=jnp.bfloat16)
    q = jax.block_until_ready(q)

    q_ref = reference_forward(central_obs, central_act, params,
                              matmul_dtype=jnp.bfloat16)

    assert q.shape == (batch, num_q_outs)
    assert bool(jnp.all(jnp.isfinite(q)))
    max_err = float(jnp.max(jnp.abs(q - q_ref)))
    assert jnp.allclose(q, q_ref, atol=2e-2, rtol=2e-2), max_err

    print("KERNEL_OK")
</pallas_src>

<mosaic_0001>
module attributes {stable_mosaic.version = 11 : i64} {
  func.func @critic_kernel(%arg0: i32, %arg1: memref<152x24xf32, #tpu.memory_space<vmem>>, %arg2: memref<152x8xf32, #tpu.memory_space<vmem>>, %arg3: memref<16x128xf32, #tpu.memory_space<vmem>>, %arg4: memref<24x128xbf16, #tpu.memory_space<vmem>>, %arg5: memref<8x128xbf16, #tpu.memory_space<vmem>>, %arg6: memref<128x128xbf16, #tpu.memory_space<vmem>>, %arg7: memref<152x2xf32, #tpu.memory_space<vmem>>) attributes {dimension_semantics = [#tpu.dimension_semantics<parallel>], iteration_bounds = array<i64: 2>, scalar_prefetch = 0 : i64, scratch_operands = 0 : i64, tpu.core_type = #tpu.core_type<tc>, window_params = [{transform_indices = @transform_0, window_bounds = array<i64: 152, 24>}, {transform_indices = @transform_1, window_bounds = array<i64: 152, 8>}, {pipeline_mode = #tpu.pipeline_mode<synchronous>, transform_indices = @transform_2, window_bounds = array<i64: 16, 128>}, {pipeline_mode = #tpu.pipeline_mode<synchronous>, transform_indices = @transform_3, window_bounds = array<i64: 24, 128>}, {pipeline_mode = #tpu.pipeline_mode<synchronous>, transform_indices = @transform_4, window_bounds = array<i64: 8, 128>}, {pipeline_mode = #tpu.pipeline_mode<synchronous>, transform_indices = @transform_5, window_bounds = array<i64: 128, 128>}, {transform_indices = @transform_6, window_bounds = array<i64: 152, 2>}]} {
    %c0 = arith.constant 0 : index
    %c0_0 = arith.constant 0 : index
    %0 = vector.load %arg3[%c0, %c0_0] : memref<16x128xf32, #tpu.memory_space<vmem>>, vector<16x128xf32>
    %c0_1 = arith.constant 0 : index
    %c0_2 = arith.constant 0 : index
    %1 = vector.load %arg1[%c0_1, %c0_2] : memref<152x24xf32, #tpu.memory_space<vmem>>, vector<152x24xf32>
    %c0_3 = arith.constant 0 : index
    %c0_4 = arith.constant 0 : index
    %2 = vector.load %arg2[%c0_3, %c0_4] : memref<152x8xf32, #tpu.memory_space<vmem>>, vector<152x8xf32>
    %cst = arith.constant dense<0.000000e+00> : vector<152xf32>
    %3 = vector.multi_reduction <add>, %1, %cst [1] : vector<152x24xf32> to vector<152xf32>
    %4 = vector.shape_cast %3 : vector<152xf32> to vector<152x1xf32>
    %cst_5 = arith.constant dense<0.000000e+00> : vector<152xf32>
    %5 = vector.multi_reduction <add>, %2, %cst_5 [1] : vector<152x8xf32> to vector<152xf32>
    %6 = vector.shape_cast %5 : vector<152xf32> to vector<152x1xf32>
    %7 = arith.addf %4, %6 : vector<152x1xf32>
    %8 = arith.mulf %1, %1 : vector<152x24xf32>
    %cst_6 = arith.constant dense<0.000000e+00> : vector<152xf32>
    %9 = vector.multi_reduction <add>, %8, %cst_6 [1] : vector<152x24xf32> to vector<152xf32>
    %10 = vector.shape_cast %9 : vector<152xf32> to vector<152x1xf32>
    %11 = arith.mulf %2, %2 : vector<152x8xf32>
    %cst_7 = arith.constant dense<0.000000e+00> : vector<152xf32>
    %12 = vector.multi_reduction <add>, %11, %cst_7 [1] : vector<152x8xf32> to vector<152xf32>
    %13 = vector.shape_cast %12 : vector<152xf32> to vector<152x1xf32>
    %14 = arith.addf %10, %13 : vector<152x1xf32>
    %cst_8 = arith.constant 3.200000e+01 : f32
    %15 = vector.broadcast %cst_8 : f32 to vector<152x1xf32>
    %16 = arith.divf %7, %15 : vector<152x1xf32>
    %cst_9 = arith.constant 3.200000e+01 : f32
    %17 = vector.broadcast %cst_9 : f32 to vector<152x1xf32>
    %18 = arith.divf %14, %17 : vector<152x1xf32>
    %19 = arith.mulf %16, %16 : vector<152x1xf32>
    %20 = arith.subf %18, %19 : vector<152x1xf32>
    %cst_10 = arith.constant 0.000000e+00 : f32
    %21 = vector.broadcast %cst_10 : f32 to vector<152x1xf32>
    %22 = arith.maximumf %20, %21 : vector<152x1xf32>
    %cst_11 = arith.constant 9.99999974E-6 : f32
    %23 = vector.broadcast %cst_11 : f32 to vector<152x1xf32>
    %24 = arith.addf %22, %23 : vector<152x1xf32>
    %25 = math.rsqrt %24 : vector<152x1xf32>
    %26 = vector.broadcast %16 : vector<152x1xf32> to vector<152x24xf32>
    %27 = arith.subf %1, %26 : vector<152x24xf32>
    %28 = vector.broadcast %25 : vector<152x1xf32> to vector<152x24xf32>
    %29 = arith.mulf %27, %28 : vector<152x24xf32>
    %30 = vector.extract_strided_slice %0 {offsets = [0, 0], sizes = [1, 24], strides = [1, 1]} : vector<16x128xf32> to vector<1x24xf32>
    %31 = vector.broadcast %30 : vector<1x24xf32> to vector<152x24xf32>
    %32 = arith.mulf %29, %31 : vector<152x24xf32>
    %33 = vector.extract_strided_slice %0 {offsets = [1, 0], sizes = [1, 24], strides = [1, 1]} : vector<16x128xf32> to vector<1x24xf32>
    %34 = vector.broadcast %33 : vector<1x24xf32> to vector<152x24xf32>
    %35 = arith.addf %32, %34 : vector<152x24xf32>
    %36 = vector.broadcast %16 : vector<152x1xf32> to vector<152x8xf32>
    %37 = arith.subf %2, %36 : vector<152x8xf32>
    %38 = vector.broadcast %25 : vector<152x1xf32> to vector<152x8xf32>
    %39 = arith.mulf %37, %38 : vector<152x8xf32>
    %40 = vector.extract_strided_slice %0 {offsets = [2, 0], sizes = [1, 8], strides = [1, 1]} : vector<16x128xf32> to vector<1x8xf32>
    %41 = vector.broadcast %40 : vector<1x8xf32> to vector<152x8xf32>
    %42 = arith.mulf %39, %41 : vector<152x8xf32>
    %43 = vector.extract_strided_slice %0 {offsets = [3, 0], sizes = [1, 8], strides = [1, 1]} : vector<16x128xf32> to vector<1x8xf32>
    %44 = vector.broadcast %43 : vector<1x8xf32> to vector<152x8xf32>
    %45 = arith.addf %42, %44 : vector<152x8xf32>
    %46 = arith.truncf %35 : vector<152x24xf32> to vector<152x24xbf16>
    %c0_12 = arith.constant 0 : index
    %c0_13 = arith.constant 0 : index
    %47 = vector.load %arg4[%c0_12, %c0_13] : memref<24x128xbf16, #tpu.memory_space<vmem>>, vector<24x128xbf16>
    %cst_14 = arith.constant dense<0.000000e+00> : vector<152x128xf32>
    %48 = tpu.matmul %46, %47, %cst_14 {dimension_numbers = #tpu.dot_dimension_numbers<[1], [0], [0], [1], [0, 0, 1, 1], [], []>} : vector<152x24xbf16>, vector<24x128xbf16>, vector<152x128xf32> -> vector<152x128xf32>
    %49 = arith.truncf %45 : vector<152x8xf32> to vector<152x8xbf16>
    %c0_15 = arith.constant 0 : index
    %c0_16 = arith.constant 0 : index
    %50 = vector.load %arg5[%c0_15, %c0_16] : memref<8x128xbf16, #tpu.memory_space<vmem>>, vector<8x128xbf16>
    %cst_17 = arith.constant dense<0.000000e+00> : vector<152x128xf32>
    %51 = tpu.matmul %49, %50, %cst_17 {dimension_numbers = #tpu.dot_dimension_numbers<[1], [0], [0], [1], [0, 0, 1, 1], [], []>} : vector<152x8xbf16>, vector<8x128xbf16>, vector<152x128xf32> -> vector<152x128xf32>
    %52 = arith.addf %48, %51 : vector<152x128xf32>
    %53 = vector.extract_strided_slice %0 {offsets = [4, 0], sizes = [1, 128], strides = [1, 1]} : vector<16x128xf32> to vector<1x128xf32>
    %54 = vector.broadcast %53 : vector<1x128xf32> to vector<152x128xf32>
    %55 = arith.addf %52, %54 : vector<152x128xf32>
    %cst_18 = arith.constant 0.000000e+00 : f32
    %56 = vector.broadcast %cst_18 : f32 to vector<152x128xf32>
    %57 = arith.maximumf %55, %56 : vector<152x128xf32>
    %58 = vector.extract_strided_slice %0 {offsets = [5, 0], sizes = [1, 128], strides = [1, 1]} : vector<16x128xf32> to vector<1x128xf32>
    %59 = vector.extract_strided_slice %0 {offsets = [6, 0], sizes = [1, 128], strides = [1, 1]} : vector<16x128xf32> to vector<1x128xf32>
    %cst_19 = arith.constant dense<0.000000e+00> : vector<152xf32>
    %60 = vector.multi_reduction <add>, %57, %cst_19 [1] : vector<152x128xf32> to vector<152xf32>
    %61 = vector.shape_cast %60 : vector<152xf32> to vector<152x1xf32>
    %62 = arith.mulf %57, %57 : vector<152x128xf32>
    %cst_20 = arith.constant dense<0.000000e+00> : vector<152xf32>
    %63 = vector.multi_reduction <add>, %62, %cst_20 [1] : vector<152x128xf32> to vector<152xf32>
    %64 = vector.shape_cast %63 : vector<152xf32> to vector<152x1xf32>
    %cst_21 = arith.constant 6.400000e+01 : f32
    %65 = vector.broadcast %cst_21 : f32 to vector<152x1xf32>
    %66 = arith.divf %61, %65 : vector<152x1xf32>
    %cst_22 = arith.constant 6.400000e+01 : f32
    %67 = vector.broadcast %cst_22 : f32 to vector<152x1xf32>
    %68 = arith.divf %64, %67 : vector<152x1xf32>
    %69 = arith.mulf %66, %66 : vector<152x1xf32>
    %70 = arith.subf %68, %69 : vector<152x1xf32>
    %cst_23 = arith.constant 0.000000e+00 : f32
    %71 = vector.broadcast %cst_23 : f32 to vector<152x1xf32>
    %72 = arith.maximumf %70, %71 : vector<152x1xf32>
    %cst_24 = arith.constant 9.99999974E-6 : f32
    %73 = vector.broadcast %cst_24 : f32 to vector<152x1xf32>
    %74 = arith.addf %72, %73 : vector<152x1xf32>
    %75 = math.rsqrt %74 : vector<152x1xf32>
    %76 = vector.broadcast %66 : vector<152x1xf32> to vector<152x128xf32>
    %77 = arith.subf %57, %76 : vector<152x128xf32>
    %78 = vector.broadcast %75 : vector<152x1xf32> to vector<152x128xf32>
    %79 = arith.mulf %77, %78 : vector<152x128xf32>
    %80 = vector.broadcast %58 : vector<1x128xf32> to vector<152x128xf32>
    %81 = arith.mulf %79, %80 : vector<152x128xf32>
    %82 = vector.broadcast %59 : vector<1x128xf32> to vector<152x128xf32>
    %83 = arith.addf %81, %82 : vector<152x128xf32>
    %84 = arith.truncf %83 : vector<152x128xf32> to vector<152x128xbf16>
    %c0_25 = arith.constant 0 : index
    %c0_26 = arith.constant 0 : index
    %85 = vector.load %arg6[%c0_25, %c0_26] : memref<128x128xbf16, #tpu.memory_space<vmem>>, vector<128x128xbf16>
    %cst_27 = arith.constant dense<0.000000e+00> : vector<152x128xf32>
    %86 = tpu.matmul %84, %85, %cst_27 {dimension_numbers = #tpu.dot_dimension_numbers<[1], [0], [0], [1], [0, 0, 1, 1], [], []>} : vector<152x128xbf16>, vector<128x128xbf16>, vector<152x128xf32> -> vector<152x128xf32>
    %87 = vector.extract_strided_slice %0 {offsets = [7, 0], sizes = [1, 128], strides = [1, 1]} : vector<16x128xf32> to vector<1x128xf32>
    %88 = vector.broadcast %87 : vector<1x128xf32> to vector<152x128xf32>
    %89 = arith.addf %86, %88 : vector<152x128xf32>
    %cst_28 = arith.constant 0.000000e+00 : f32
    %90 = vector.broadcast %cst_28 : f32 to vector<152x128xf32>
    %91 = arith.maximumf %89, %90 : vector<152x128xf32>
    %92 = vector.extract_strided_slice %0 {offsets = [8, 0], sizes = [1, 128], strides = [1, 1]} : vector<16x128xf32> to vector<1x128xf32>
    %93 = vector.extract_strided_slice %0 {offsets = [9, 0], sizes = [1, 128], strides = [1, 1]} : vector<16x128xf32> to vector<1x128xf32>
    %cst_29 = arith.constant dense<0.000000e+00> : vector<152xf32>
    %94 = vector.multi_reduction <add>, %91, %cst_29 [1] : vector<152x128xf32> to vector<152xf32>
    %95 = vector.shape_cast %94 : vector<152xf32> to vector<152x1xf32>
    %96 = arith.mulf %91, %91 : vector<152x128xf32>
    %cst_30 = arith.constant dense<0.000000e+00> : vector<152xf32>
    %97 = vector.multi_reduction <add>, %96, %cst_30 [1] : vector<152x128xf32> to vector<152xf32>
    %98 = vector.shape_cast %97 : vector<152xf32> to vector<152x1xf32>
    %cst_31 = arith.constant 6.400000e+01 : f32
    %99 = vector.broadcast %cst_31 : f32 to vector<152x1xf32>
    %100 = arith.divf %95, %99 : vector<152x1xf32>
    %cst_32 = arith.constant 6.400000e+01 : f32
    %101 = vector.broadcast %cst_32 : f32 to vector<152x1xf32>
    %102 = arith.divf %98, %101 : vector<152x1xf32>
    %103 = arith.mulf %100, %100 : vector<152x1xf32>
    %104 = arith.subf %102, %103 : vector<152x1xf32>
    %cst_33 = arith.constant 0.000000e+00 : f32
    %105 = vector.broadcast %cst_33 : f32 to vector<152x1xf32>
    %106 = arith.maximumf %104, %105 : vector<152x1xf32>
    %cst_34 = arith.constant 9.99999974E-6 : f32
    %107 = vector.broadcast %cst_34 : f32 to vector<152x1xf32>
    %108 = arith.addf %106, %107 : vector<152x1xf32>
    %109 = math.rsqrt %108 : vector<152x1xf32>
    %110 = vector.broadcast %100 : vector<152x1xf32> to vector<152x128xf32>
    %111 = arith.subf %91, %110 : vector<152x128xf32>
    %112 = vector.broadcast %109 : vector<152x1xf32> to vector<152x128xf32>
    %113 = arith.mulf %111, %112 : vector<152x128xf32>
    %114 = vector.broadcast %92 : vector<1x128xf32> to vector<152x128xf32>
    %115 = arith.mulf %113, %114 : vector<152x128xf32>
    %116 = vector.broadcast %93 : vector<1x128xf32> to vector<152x128xf32>
    %117 = arith.addf %115, %116 : vector<152x128xf32>
    %118 = tpu.iota {dimensions = array<i32: 1>} : vector<1x2xi32>
    %119 = vector.extract_strided_slice %0 {offsets = [10, 0], sizes = [1, 128], strides = [1, 1]} : vector<16x128xf32> to vector<1x128xf32>
    %120 = vector.broadcast %119 : vector<1x128xf32> to vector<152x128xf32>
    %121 = arith.mulf %117, %120 : vector<152x128xf32>
    %cst_35 = arith.constant dense<0.000000e+00> : vector<152xf32>
    %122 = vector.multi_reduction <add>, %121, %cst_35 [1] : vector<152x128xf32> to vector<152xf32>
    %123 = vector.shape_cast %122 : vector<152xf32> to vector<152x1xf32>
    %c0_i32 = arith.constant 0 : i32
    %124 = vector.broadcast %c0_i32 : i32 to vector<1x2xi32>
    %125 = arith.cmpi eq, %118, %124 : vector<1x2xi32>
    %126 = arith.extui %125 : vector<1x2xi1> to vector<1x2xi32>
    %127 = arith.sitofp %126 : vector<1x2xi32> to vector<1x2xf32>
    %128 = vector.broadcast %123 : vector<152x1xf32> to vector<152x2xf32>
    %129 = vector.broadcast %127 : vector<1x2xf32> to vector<152x2xf32>
    %130 = arith.mulf %128, %129 : vector<152x2xf32>
    %131 = vector.extract_strided_slice %0 {offsets = [11, 0], sizes = [1, 128], strides = [1, 1]} : vector<16x128xf32> to vector<1x128xf32>
    %132 = vector.broadcast %131 : vector<1x128xf32> to vector<152x128xf32>
    %133 = arith.mulf %117, %132 : vector<152x128xf32>
    %cst_36 = arith.constant dense<0.000000e+00> : vector<152xf32>
    %134 = vector.multi_reduction <add>, %133, %cst_36 [1] : vector<152x128xf32> to vector<152xf32>
    %135 = vector.shape_cast %134 : vector<152xf32> to vector<152x1xf32>
    %c1_i32 = arith.constant 1 : i32
    %136 = vector.broadcast %c1_i32 : i32 to vector<1x2xi32>
    %137 = arith.cmpi eq, %118, %136 : vector<1x2xi32>
    %138 = arith.extui %137 : vector<1x2xi1> to vector<1x2xi32>
    %139 = arith.sitofp %138 : vector<1x2xi32> to vector<1x2xf32>
    %140 = vector.broadcast %135 : vector<152x1xf32> to vector<152x2xf32>
    %141 = vector.broadcast %139 : vector<1x2xf32> to vector<152x2xf32>
    %142 = arith.mulf %140, %141 : vector<152x2xf32>
    %143 = arith.addf %130, %142 : vector<152x2xf32>
    %144 = vector.extract_strided_slice %0 {offsets = [12, 0], sizes = [1, 2], strides = [1, 1]} : vector<16x128xf32> to vector<1x2xf32>
    %145 = vector.broadcast %144 : vector<1x2xf32> to vector<152x2xf32>
    %146 = arith.addf %143, %145 : vector<152x2xf32>
    %c0_37 = arith.constant 0 : index
    %c0_38 = arith.constant 0 : index
    %147 = vector.load %arg7[%c0_37, %c0_38] : memref<152x2xf32, #tpu.memory_space<vmem>>, vector<152x2xf32>
    tpu.vector_store %arg7[%c0_37, %c0_38], %146 {strides = array<i32>} : memref<152x2xf32, #tpu.memory_space<vmem>>, vector<152x2xf32>,
    return
  }
  func.func @transform_0(%arg0: i32) -> (i32, i32) {
    %c0_i32 = arith.constant 0 : i32
    %c0_i32_0 = arith.constant 0 : i32
    return %arg0, %c0_i32 : i32, i32
  }
  func.func @transform_1(%arg0: i32) -> (i32, i32) {
    %c0_i32 = arith.constant 0 : i32
    %c0_i32_0 = arith.constant 0 : i32
    return %arg0, %c0_i32 : i32, i32
  }
  func.func @transform_2(%arg0: i32) -> (i32, i32) {
    %c0_i32 = arith.constant 0 : i32
    %c0_i32_0 = arith.constant 0 : i32
    %c0_i32_1 = arith.constant 0 : i32
    return %c0_i32, %c0_i32_0 : i32, i32
  }
  func.func @transform_3(%arg0: i32) -> (i32, i32) {
    %c0_i32 = arith.constant 0 : i32
    %c0_i32_0 = arith.constant 0 : i32
    %c0_i32_1 = arith.constant 0 : i32
    return %c0_i32, %c0_i32_0 : i32, i32
  }
  func.func @transform_4(%arg0: i32) -> (i32, i32) {
    %c0_i32 = arith.constant 0 : i32
    %c0_i32_0 = arith.constant 0 : i32
    %c0_i32_1 = arith.constant 0 : i32
    return %c0_i32, %c0_i32_0 : i32, i32
  }
  func.func @transform_5(%arg0: i32) -> (i32, i32) {
    %c0_i32 = arith.constant 0 : i32
    %c0_i32_0 = arith.constant 0 : i32
    %c0_i32_1 = arith.constant 0 : i32
    return %c0_i32, %c0_i32_0 : i32, i32
  }
  func.func @transform_6(%arg0: i32) -> (i32, i32) {
    %c0_i32 = arith.constant 0 : i32
    %c0_i32_0 = arith.constant 0 : i32
    return %arg0, %c0_i32 : i32, i32
  }
}

</mosaic_0001>

<bundles_post_ra>
// kernel: tpu_custom_call.1
= control target key start
LH: loop header
LB: loop body
LE: loop exit
PB: predicated region body
PF: predicated region fallthrough
CT: control target
= control target key end

     0   :  { %s3029_s21 = smov 0   ;;  %s4822_s0 = inlined_call_operand.vmem [shape: f32[300,24], index: 0, kind: input, shape index: {}]   ;;  %s4823_s1 = inlined_call_operand.vmem [shape: f32[300,8], index: 1, kind: input, shape index: {}]   ;;  %s4824_s2 = inlined_call_operand.vmem [shape: f32[16,128], index: 2, kind: input, shape index: {}]   ;;  %s4825_s3 = inlined_call_operand.vmem [shape: bf16[24,128], index: 3, kind: input, shape index: {}]   ;;  %s4826_s4 = inlined_call_operand.vmem [shape: bf16[8,128], index: 4, kind: input, shape index: {}]   ;;  %s4827_s5 = inlined_call_operand.vmem [shape: bf16[128,128], index: 5, kind: input, shape index: {}]   ;;  %s4828_s6 = inlined_call_operand.vmem [shape: f32[300,2], index: 6, kind: output, shape index: {}]  }
   0x1 LB: > { %s2748_s22 = sadd.s32 4294967295, %s2989_s21   ;;  %p2752_p0 = scmp.ge.s32.totalorder %s2989_s21, 1  ;;  %s2989_s21 = sphi %s3029_s21, %s16_s21  }
   0x2   : > { %p224_p1 = scmp.lt.s32.totalorder %s2989_s21, 3 }
   0x4   : > { %p225_p2 = pnand %p2752_p0, %p224_p1 }
   0x5   : > { %s259_s23 = smul.u32 (!%p225_p2), 19, %s2748_s22 }
   0x6   : > { %228 = sbr.rel (%p225_p2) target bundleno = 1139 (0x473), region = 44 }
   0x7   : > { %p260_p3 = scmp.lt.s32.totalorder (!%p225_p2), %s259_s23, 37 }
   0xb   : > { %s4856_s23 = smov (!%p260_p3, %s259_s23), 37  ;;  %vm376_vm0 = vcmask 64512   ;;  %vm318_vm1 = vcmask 195584   ;;  %vm1145_vm3 = vcmask 1043456  }
   0xc   : > { %s3037_s24 = sshll.u32 %s4856_s23, 3 }
   0xd   : > { %s3043_s27 = scalar_lea.vmem %s4823_s1, %s3037_s24  ;;  %s3052_s30 = scalar_lea.vmem %s4822_s0, %s3037_s24 }
   0xe   : > { %v3046_v0 = vld [vmem:[%s3043_s27] sm:$0xff]  ;;  %v3064_v5 = vld [vmem:[%s3052_s30 + $0x8] sm:$0xff]  ;;  %v3083_v15 = vld [vmem:[%s3052_s30 + $0x10] sm:$0xff]  ;;  %s4686_s15 = scalar_lea.vmem %s4828_s6, %s3037_s24 }
   0xf   : > { %v377_v1 = vsel %vm376_vm0, %v3046_v0, 0.0  ;;  %v3057_v2 = vld [vmem:[%s3052_s30] sm:$0xff]  ;;  %v3068_v7 = vld [vmem:[%s3043_s27 + $0x8] sm:$0xff]  ;;  %v454_v8 = vmul.f32 %v3064_v5, %v3064_v5  ;;  %v322_v10 = vsel %vm318_vm1, %v3064_v5, 0.0  ;;  %v529_v13 = vmul.f32 %v3046_v0, %v3046_v0  ;;  %v3089_v18 = vld [vmem:[%s3043_s27 + $0x10] sm:$0xff] }
  0x10   : > { %378 = vadd.xlane.f32.xlu1 %v377_v1  ;;  %v319_v3 = vsel %vm318_vm1, %v3057_v2, 0.0  ;;  %v453_v4 = vmul.f32 %v3057_v2, %v3057_v2  ;;  %v380_v9 = vsel %vm376_vm0, %v3068_v7, 0.0  ;;  %v530_v12 = vmul.f32 %v3068_v7, %v3068_v7  ;;  %v3092_v19 = vld [vmem:[%s3052_s30 + $0x18] sm:$0xff]  ;;  %v3113_v30 = vld [vmem:[%s3052_s30 + $0x20] sm:$0xff]  ;;  %v3120_v33 = vld [vmem:[%s3052_s30 + $0x28] sm:$0xff] }
  0x11   : > { %320 = vadd.xlane.f32.xlu0 %v319_v3  ;;  %v475_v11 = vsel %vm318_vm1, %v454_v8, 0.0  ;;  %v548_v16 = vsel %vm376_vm0, %v529_v13, 0.0  ;;  %v325_v17 = vsel %vm318_vm1, %v3083_v15, 0.0  ;;  %v383_v20 = vsel %vm376_vm0, %v3089_v18, 0.0  ;;  %v3097_v21 = vld [vmem:[%s3043_s27 + $0x18] sm:$0xff]  ;;  %v3126_v36 = vld [vmem:[%s3043_s27 + $0x28] sm:$0xff] }
  0x12   : > { %v472_v6 = vsel %vm318_vm1, %v453_v4, 0.0  ;;  %v551_v14 = vsel %vm376_vm0, %v530_v12, 0.0  ;;  %v328_v22 = vsel %vm318_vm1, %v3092_v19, 0.0  ;;  %v386_v23 = vsel %vm376_vm0, %v3097_v21, 0.0  ;;  %v3129_v37 = vld [vmem:[%s3043_s27 + $0x20] sm:$0xff]  ;;  %v3148_v48 = vld [vmem:[%s3052_s30 + $0x38] sm:$0xff] }
  0x13   : > { %473 = vadd.xlane.f32.xlu2 %v472_v6  ;;  %v456_v24 = vmul.f32 %v3092_v19, %v3092_v19  ;;  %v455_v25 = vmul.f32 %v3083_v15, %v3083_v15  ;;  %v531_v26 = vmul.f32 %v3089_v18, %v3089_v18  ;;  %v532_v31 = vmul.f32 %v3097_v21, %v3097_v21  ;;  %v3151_v49 = vld [vmem:[%s3052_s30 + $0x30] sm:$0xff]  ;;  %v3165_v55 = vld [vmem:[%s3043_s27 + $0x38] sm:$0xff]  ;;  %v3179_v63 = vld [vmem:[%s3052_s30 + $0x40] sm:$0xff] }
  0x14   : > { %v331_v32 = vsel %vm318_vm1, %v3113_v30, 0.0  ;;  %v334_v35 = vsel %vm318_vm1, %v3120_v33, 0.0  ;;  %v457_v38 = vmul.f32 %v3113_v30, %v3113_v30  ;;  %v392_v39 = vsel %vm376_vm0, %v3126_v36, 0.0  ;;  %v3156_v51 = vld [vmem:[%s3043_s27 + $0x30] sm:$0xff]  ;;  %v3185_v4 = vld [vmem:[%s3043_s27 + $0x40] sm:$0xff]  ;;  %v3188_v6 = vld [vmem:[%s3052_s30 + $0x48] sm:$0xff] }
  0x15   : > { %v481_v27 = vsel %vm318_vm1, %v456_v24, 0.0  ;;  %v478_v28 = vsel %vm318_vm1, %v455_v25, 0.0  ;;  %v554_v29 = vsel %vm376_vm0, %v531_v26, 0.0  ;;  %v557_v34 = vsel %vm376_vm0, %v532_v31, 0.0  ;;  %v291_v25 = vld [vmem:[%s3052_s30 + $0x58] sm:$0xff]  ;;  %v3217_v31 = vld [vmem:[%s3043_s27 + $0x50] sm:$0xff] }
  0x16   : > { %v389_v40 = vsel %vm376_vm0, %v3129_v37, 0.0  ;;  %v484_v41 = vsel %vm318_vm1, %v457_v38, 0.0  ;;  %v533_v42 = vmul.f32 %v3129_v37, %v3129_v37  ;;  %v458_v43 = vmul.f32 %v3120_v33, %v3120_v33 }
  0x17   : > { %v534_v44 = vmul.f32 %v3126_v36, %v3126_v36  ;;  %v340_v50 = vsel %vm318_vm1, %v3148_v48, 0.0  ;;  %v337_v52 = vsel %vm318_vm1, %v3151_v49, 0.0  ;;  %v395_v53 = vsel %vm376_vm0, %v3156_v51, 0.0 }
  0x18   : > { %381 = vadd.xlane.f32.xlu1 %v380_v9  ;;  %v560_v45 = vsel %vm376_vm0, %v533_v42, 0.0  ;;  %v487_v46 = vsel %vm318_vm1, %v458_v43, 0.0  ;;  %v459_v54 = vmul.f32 %v3151_v49, %v3151_v49  ;;  %v460_v56 = vmul.f32 %v3148_v48, %v3148_v48  ;;  %v3193_v9 = vld [vmem:[%s3043_s27 + $0x48] sm:$0xff] }
  0x19   : > { %323 = vadd.xlane.f32.xlu0 %v322_v10  ;;  %v563_v47 = vsel %vm376_vm0, %v534_v44, 0.0  ;;  %v398_v58 = vsel %vm376_vm0, %v3165_v55, 0.0  ;;  %v536_v60 = vmul.f32 %v3165_v55, %v3165_v55  ;;  %v535_v61 = vmul.f32 %v3156_v51, %v3156_v51 }
  0x1a   : > { %v490_v57 = vsel %vm318_vm1, %v459_v54, 0.0  ;;  %v493_v59 = vsel %vm318_vm1, %v460_v56, 0.0  ;;  %v343_v3 = vsel %vm318_vm1, %v3179_v63, 0.0  ;;  %v401_v8 = vsel %vm376_vm0, %v3185_v4, 0.0  ;;  %v297_v56 = vld [vmem:[%s3052_s30 + $0x88] sm:$0xff] }
  0x1b   : > { %476 = vadd.xlane.f32.xlu2 %v475_v11  ;;  %v569_v62 = vsel %vm376_vm0, %v536_v60, 0.0  ;;  %v566_v1 = vsel %vm376_vm0, %v535_v61, 0.0  ;;  %v346_v10 = vsel %vm318_vm1, %v3188_v6, 0.0  ;;  %v404_v11 = vsel %vm376_vm0, %v3193_v9, 0.0  ;;  %v1103_v61 = vld [vmem:[%s4825_s3 + $0x8] sm:$0xf] }
  0x1c   : > { %v462_v12 = vmul.f32 %v3188_v6, %v3188_v6  ;;  %v461_v13 = vmul.f32 %v3179_v63, %v3179_v63  ;;  %v407_v38 = vsel %vm376_vm0, %v3217_v31, 0.0  ;;  %v464_v42 = vmul.f32 %v291_v25, %v291_v25 }
  0x20   : > { %552 = vadd.xlane.f32.xlu1 %v551_v14  ;;  %v537_v14 = vmul.f32 %v3185_v4, %v3185_v4 }
  0x21   : > { %549 = vadd.xlane.f32.xlu0 %v548_v16  ;;  %v499_v16 = vsel %vm318_vm1, %v462_v12, 0.0 }
  0x23   : > { %326 = vadd.xlane.f32.xlu2 %v325_v17  ;;  %v496_v17 = vsel %vm318_vm1, %v461_v13, 0.0 }
  0x28   : > { %384 = vadd.xlane.f32.xlu1 %v383_v20  ;;  %v572_v20 = vsel %vm376_vm0, %v537_v14, 0.0 }
  0x29   : > { %329 = vadd.xlane.f32.xlu0 %v328_v22  ;;  %v290_v22 = vld [vmem:[%s3052_s30 + $0x50] sm:$0xff] }
  0x2a   : > { %v349_v24 = vsel %vm318_vm1, %v290_v22, 0.0 }
  0x2b   : > { %387 = vadd.xlane.f32.xlu2 %v386_v23  ;;  %v538_v23 = vmul.f32 %v3193_v9, %v3193_v9 }
  0x2d   : > { %v575_v26 = vsel %vm376_vm0, %v538_v23, 0.0 }
  0x30   : > { %482 = vadd.xlane.f32.xlu1 %v481_v27  ;;  %v2991_v27 = vmov 32.0  }
  0x31   : > { %479 = vadd.xlane.f32.xlu0 %v478_v28  ;;  %2847 = vrcp.f32 %v2991_v27  ;;  %v352_v28 = vsel %vm318_vm1, %v291_v25, 0.0  ;;  %v316_v25 = vld [vmem:[%s3043_s27 + $0x88] sm:$0xff] }
  0x33   : > { %555 = vadd.xlane.f32.xlu2 %v554_v29  ;;  %v310_v29 = vld [vmem:[%s3043_s27 + $0x58] sm:$0xff] }
  0x38   : > { %332 = vadd.xlane.f32.xlu1 %v331_v32  ;;  %v463_v32 = vmul.f32 %v290_v22, %v290_v22 }
  0x39   : > { %558 = vadd.xlane.f32.xlu0 %v557_v34  ;;  %v2848_v34 = vpop.eup %2847 }
  0x3a   : > { %vm629_vm2 = vweird.f32 %v2848_v34 }
  0x3b   : > { %335 = vadd.xlane.f32.xlu2 %v334_v35  ;;  %v410_v35 = vsel %vm376_vm0, %v310_v29, 0.0 }
  0x40   : > { %393 = vadd.xlane.f32.xlu1 %v392_v39  ;;  %v502_v39 = vsel %vm318_vm1, %v463_v32, 0.0  ;;  %v2816_v32 = vld [vmem:[%s4825_s3] sm:$0xff] }
  0x41   : > { %390 = vadd.xlane.f32.xlu0 %v389_v40  ;;  %v625_v40 = vmul.f32 32.0, %v2848_v34 }
  0x43   : > { %485 = vadd.xlane.f32.xlu2 %v484_v41  ;;  %v539_v41 = vmul.f32 %v3217_v31, %v3217_v31  ;;  %v626_v44 = vsub.f32 1.0, %v625_v40 }
  0x48   : > { %561 = vadd.xlane.f32.xlu1 %v560_v45 }
  0x49   : > { %488 = vadd.xlane.f32.xlu0 %v487_v46  ;;  %v540_v46 = vmul.f32 %v310_v29, %v310_v29  ;;  %v1114_v29 = vld [vmem:[%s4826_s4] sm:$0xf] }
  0x4b   : > { %564 = vadd.xlane.f32.xlu2 %v563_v47  ;;  %v578_v47 = vsel %vm376_vm0, %v539_v41, 0.0  ;;  %v581_v54 = vsel %vm376_vm0, %v540_v46, 0.0 }
  0x50   : > { %341 = vadd.xlane.f32.xlu1 %v340_v50 }
  0x51   : > { %338 = vadd.xlane.f32.xlu0 %v337_v52  ;;  %v505_v52 = vsel %vm318_vm1, %v464_v42, 0.0  ;;  %v428_v42 = vsel %vm376_vm0, %v316_v25, 0.0 }
  0x53   : > { %396 = vadd.xlane.f32.xlu2 %v395_v53  ;;  %v627_v53 = vmul.f32 %v2848_v34, %v626_v44 }
  0x58   : > { %491 = vadd.xlane.f32.xlu1 %v490_v57 }
  0x59   : > { %399 = vadd.xlane.f32.xlu0 %v398_v58  ;;  %v296_v58 = vld [vmem:[%s3052_s30 + $0x80] sm:$0xff] }
  0x5b   : > { %494 = vadd.xlane.f32.xlu2 %v493_v59  ;;  %v628_v59 = vadd.f32 %v2848_v34, %v627_v53 }
  0x5d   : > { %v3236_v14 = vsel %vm629_vm2, %v2848_v34, %v628_v59 }
  0x60   : > { %570 = vadd.xlane.f32.xlu1 %v569_v62  ;;  %v370_v62 = vsel %vm318_vm1, %v297_v56, 0.0 }
  0x61   : > { %567 = vadd.xlane.f32.xlu0 %v566_v1  ;;  %v315_v1 = vld [vmem:[%s3043_s27 + $0x80] sm:$0xff] }
  0x62   : > { %v545_v53 = vmul.f32 %v315_v1, %v315_v1 }
  0x63   : > { %344 = vadd.xlane.f32.xlu2 %v343_v3  ;;  %v1212_v3 = vunpack.c.l.b16 %v1103_v61  ;;  %v292_v61 = vld [vmem:[%s3052_s30 + $0x60] sm:$0xff] }
  0x65   : > { %v1214_v13 = vpack.c.b16 %v1212_v3, %v1212_v3  ;;  %v596_v3 = vsel %vm376_vm0, %v545_v53, 0.0 }
  0x68   : > { %402 = vadd.xlane.f32.xlu1 %v401_v8 }
  0x69   : > { %347 = vadd.xlane.f32.xlu0 %v346_v10 }
  0x6b   : > { %405 = vadd.xlane.f32.xlu2 %v404_v11  ;;  %v367_v11 = vsel %vm318_vm1, %v296_v58, 0.0 }
  0x70   : > { %500 = vadd.xlane.f32.xlu1 %v499_v16  ;;  %v425_v16 = vsel %vm376_vm0, %v315_v1, 0.0  ;;  %v355_v1 = vsel %vm318_vm1, %v292_v61, 0.0 }
  0x71   : > { %497 = vadd.xlane.f32.xlu0 %v496_v17  ;;  %v469_v17 = vmul.f32 %v296_v58, %v296_v58 }
  0x73   : > { %573 = vadd.xlane.f32.xlu2 %v572_v20  ;;  %v1247_v20 = vsel %vm1145_vm3, %v1214_v13, 0 }
  0x74   : > { %1255 = vmatpush.bf16.msra.mxu1 %v1247_v20 }
  0x78   : > { %350 = vadd.xlane.f32.xlu1 %v349_v24  ;;  %1256 = vmatpush.bf16.msra.mxu1 %v2816_v32 }
  0x79   : > { %576 = vadd.xlane.f32.xlu0 %v575_v26 }
  0x7b   : > { %353 = vadd.xlane.f32.xlu2 %v352_v28  ;;  %v470_v28 = vmul.f32 %v297_v56, %v297_v56 }
  0x7d   : > { %v523_v46 = vsel %vm318_vm1, %v470_v28, 0.0 }
  0x80   : > { %411 = vadd.xlane.f32.xlu1 %v410_v35  ;;  %v520_v35 = vsel %vm318_vm1, %v469_v17, 0.0 }
  0x81   : > { %408 = vadd.xlane.f32.xlu0 %v407_v38  ;;  %v1147_v38 = vsel %vm1145_vm3, %v1114_v29, 0 }
  0x82   : > { %1156 = vmatpush.bf16.msra.mxu0 %v1147_v38  ;;  %2825 = vmatpush.bf16.msra.mxu3 %v1147_v38 }
  0x83   : > { %503 = vadd.xlane.f32.xlu2 %v502_v39  ;;  %v379_v43 = vpop.xlane.xlu1 %378 }
  0x84   : > { %v321_v45 = vpop.xlane.xlu0 %320 }
  0x85   : > { %v434_v12 = vadd.f32 %v379_v43, %v321_v45 }
  0x86   : > { %v474_v50 = vpop.xlane.xlu2 %473  ;;  %2826 = vmatpush.bf16.msrb.mxu3 %v1247_v20 }
  0x87   : > { %v3244_v23 = vmul.f32 %v3236_v14, %v434_v12  ;;  %v293_v12 = vld [vmem:[%s3052_s30 + $0x68] sm:$0xff] }
  0x88   : > { %579 = vadd.xlane.f32.xlu1 %v578_v47  ;;  %v358_v29 = vsel %vm318_vm1, %v293_v12, 0.0 }
  0x89   : > { %506 = vadd.xlane.f32.xlu0 %v505_v52  ;;  %v669_v43 = vmul.f32 %v3244_v23, %v3244_v23 }
  0x8a   : > { %2827 = vmatpush.bf16.msrb.mxu3 %v2816_v32  ;;  %v466_v32 = vmul.f32 %v293_v12, %v293_v12 }
  0x8b   : > { %582 = vadd.xlane.f32.xlu2 %v581_v54  ;;  %v382_v57 = vpop.xlane.xlu1 %381 }
  0x8c   : > { %v324_v60 = vpop.xlane.xlu0 %323 }
  0x8d   : > { %v435_v8 = vadd.f32 %v382_v57, %v324_v60 }
  0x8e   : > { %v477_v10 = vpop.xlane.xlu2 %476 }
  0x8f   : > { %v3241_v22 = vmul.f32 %v3236_v14, %v435_v8 }
  0x90   : > { %371 = vadd.xlane.f32.xlu1 %v370_v62 }
  0x91   : > { %368 = vadd.xlane.f32.xlu0 %v367_v11  ;;  %v670_v40 = vmul.f32 %v3241_v22, %v3241_v22 }
  0x93   : > { %426 = vadd.xlane.f32.xlu2 %v425_v16  ;;  %v553_v24 = vpop.xlane.xlu1 %552 }
  0x94   : > { %v606_v26 = vadd.f32 %v553_v24, %v477_v10  ;;  %v550_v27 = vpop.xlane.xlu0 %549  ;;  %v311_v10 = vld [vmem:[%s3043_s27 + $0x60] sm:$0xff] }
  0x95   : > { %v605_v34 = vadd.f32 %v550_v27, %v474_v50  ;;  %v546_v50 = vmul.f32 %v316_v25, %v316_v25  ;;  %v413_v25 = vsel %vm376_vm0, %v311_v10, 0.0 }
  0x96   : > { %v651_v39 = vmul.f32 %v3236_v14, %v606_v26  ;;  %v327_v41 = vpop.xlane.xlu2 %326  ;;  %v312_v26 = vld [vmem:[%s3043_s27 + $0x68] sm:$0xff] }
  0x97   : > { %v650_v44 = vmul.f32 %v3236_v14, %v605_v34  ;;  %v599_v60 = vsel %vm376_vm0, %v546_v50, 0.0  ;;  %v465_v34 = vmul.f32 %v292_v61, %v292_v61  ;;  %v936_v50 = vsub.f32 %v3064_v5, %v3241_v22 }
  0x98   : > { %v689_v45 = vsub.f32 %v651_v39, %v670_v40  ;;  %521 = vadd.xlane.f32.xlu1 %v520_v35  ;;  %v935_v40 = vsub.f32 %v3057_v2, %v3244_v23  ;;  %v511_v2 = vsel %vm318_vm1, %v466_v32, 0.0  ;;  %v1014_v5 = vsub.f32 %v3068_v7, %v3241_v22 }
  0x99   : > { %v688_v47 = vsub.f32 %v650_v44, %v669_v43  ;;  %429 = vadd.xlane.f32.xlu0 %v428_v42  ;;  %v416_v42 = vsel %vm376_vm0, %v312_v26, 0.0  ;;  %v541_v43 = vmul.f32 %v311_v10, %v311_v10  ;;  %v1013_v44 = vsub.f32 %v3046_v0, %v3244_v23 }
  0x9a   : > { %v708_v52 = vmax.f32 %v689_v45, 0.0  ;;  %v508_v53 = vsel %vm318_vm1, %v465_v34, 0.0 }
  0x9b   : > { %v707_v54 = vmax.f32 %v688_v47, 0.0  ;;  %524 = vadd.xlane.f32.xlu2 %v523_v46  ;;  %v385_v56 = vpop.xlane.xlu1 %384 }
  0x9c   : > { %v3263_v57 = vadd.f32 1e-05, %v708_v52  ;;  %v330_v58 = vpop.xlane.xlu0 %329  ;;  %v436_v8 = vadd.f32 %v385_v56, %v327_v41 }
  0x9d   : > { %v3265_v59 = vadd.f32 1e-05, %v707_v54 }
  0x9e   : > { %2849 = vrsqrt.f32 %v3263_v57  ;;  %v388_v62 = vpop.xlane.xlu2 %387  ;;  %v3277_v24 = vmul.f32 %v3236_v14, %v436_v8  ;;  %vm761_vm6 = vweird.f32 %v3263_v57 }
  0x9f   : > { %2851 = vrsqrt.f32 %v3265_v59  ;;  %v437_v38 = vadd.f32 %v388_v62, %v330_v58  ;;  %v3301_v58 = vld [vmem:[%s4824_s2] sm:$0xff]  ;;  %v584_v62 = vsel %vm376_vm0, %v541_v43, 0.0  ;;  %vm751_vm8 = vweird.f32 %v3265_v59 }
  0xa0   : > { %600 = vadd.xlane.f32.xlu1 %v599_v60  ;;  %v671_v46 = vmul.f32 %v3277_v24, %v3277_v24  ;;  %v3313_v7 = vperm.slane %v3301_v58, 0  ;;  %v3325_v34 = vperm.slane %v3301_v58, 1 }
  0xa1   : > { %597 = vadd.xlane.f32.xlu0 %v596_v3  ;;  %v3296_v56 = vmul.f32 %v3236_v14, %v437_v38  ;;  %v542_v38 = vmul.f32 %v312_v26, %v312_v26 }
  0xa3   : > { %356 = vadd.xlane.f32.xlu2 %v355_v1  ;;  %v483_v11 = vpop.xlane.xlu1 %482 }
  0xa4   : > { %v2850_v13 = vpop.eup %2849  ;;  %v480_v16 = vpop.xlane.xlu0 %479 }
  0xa5   : > { %v2852_v17 = vpop.eup %2851  ;;  %v756_v20 = vmul.f32 %v2850_v13, %v3263_v57  ;;  %vm762_vm4 = vweird.f32 %v2850_v13  ;;  %v672_v57 = vmul.f32 %v3296_v56, %v3296_v56 }
  0xa6   : > { %v746_v27 = vmul.f32 %v2852_v17, %v3265_v59  ;;  %v556_v28 = vpop.xlane.xlu2 %555  ;;  %vm752_vm5 = vweird.f32 %v2852_v17  ;;  %vm763_vm7 = vmor %vm761_vm6, %vm762_vm4 }
  0xa7   : > { %v757_v35 = vmul.f32 %v2850_v13, %v756_v20  ;;  %v607_v39 = vadd.f32 %v556_v28, %v480_v16  ;;  %v3310_v16 = vperm.slane %v3301_v58, 2  ;;  %vm753_vm9 = vmor %vm751_vm8, %vm752_vm5 }
  0xa8   : > { %v747_v41 = vmul.f32 %v2852_v17, %v746_v27  ;;  %414 = vadd.xlane.f32.xlu1 %v413_v25  ;;  %v3321_v27 = vperm.slane %v3301_v58, 3 }
  0xa9   : > { %v758_v45 = vmul.f32 0.5, %v757_v35  ;;  %v652_v47 = vmul.f32 %v3236_v14, %v607_v39  ;;  %359 = vadd.xlane.f32.xlu0 %v358_v29  ;;  %v298_v35 = vld [vmem:[%s3052_s30 + $0x90] sm:$0xff] }
  0xaa   : > { %v748_v52 = vmul.f32 0.5, %v747_v41 }
  0xab   : > { %v759_v54 = vsub.f32 1.5, %v758_v45  ;;  %v690_v0 = vsub.f32 %v652_v47, %v671_v46  ;;  %417 = vadd.xlane.f32.xlu2 %v416_v42  ;;  %v333_v23 = vpop.xlane.xlu1 %332 }
  0xac   : > { %v749_v60 = vsub.f32 1.5, %v748_v52  ;;  %v559_v61 = vpop.xlane.xlu0 %558  ;;  %v317_v52 = vld [vmem:[%s3043_s27 + $0x90] sm:$0xff] }
  0xad   : > { %v709_v3 = vmax.f32 %v690_v0, 0.0  ;;  %v608_v1 = vadd.f32 %v559_v61, %v483_v11  ;;  %v760_v8 = vmul.f32 %v2850_v13, %v759_v54  ;;  %v587_v54 = vsel %vm376_vm0, %v542_v38, 0.0 }
  0xae   : > { %v336_v10 = vpop.xlane.xlu2 %335  ;;  %v750_v12 = vmul.f32 %v2852_v17, %v749_v60 }
  0xaf   : > { %v3315_v22 = vadd.f32 1e-05, %v709_v3  ;;  %v653_v11 = vmul.f32 %v3236_v14, %v608_v1  ;;  %v764_v20 = vsel %vm763_vm7, %v2850_v13, %v760_v8  ;;  %v547_v3 = vmul.f32 %v317_v52, %v317_v52 }
  0xb0   : > { %512 = vadd.xlane.f32.xlu1 %v511_v2  ;;  %v754_v59 = vsel %vm753_vm9, %v2852_v17, %v750_v12  ;;  %v1033_v25 = vmul.f32 %v1014_v5, %v764_v20  ;;  %v955_v28 = vmul.f32 %v936_v50, %v764_v20  ;;  %v373_v50 = vsel %vm318_vm1, %v298_v35, 0.0 }
  0xb1   : > { %2853 = vrsqrt.f32 %v3315_v22  ;;  %v691_v29 = vsub.f32 %v653_v11, %v672_v57  ;;  %509 = vadd.xlane.f32.xlu0 %v508_v53  ;;  %v1032_v32 = vmul.f32 %v1013_v44, %v754_v59  ;;  %v954_v39 = vmul.f32 %v935_v40, %v754_v59 }
  0xb2   : > { %v1053_v13 = vmul.f32 %v3310_v16, %v1033_v25  ;;  %v975_v17 = vmul.f32 %v3313_v7, %v955_v28  ;;  %v471_v8 = vmul.f32 %v298_v35, %v298_v35  ;;  %v294_v28 = vld [vmem:[%s3052_s30 + $0x70] sm:$0xff]  ;;  %vm771_vm11 = vweird.f32 %v3315_v22 }
  0xb3   : > { %v710_v41 = vmax.f32 %v691_v29, 0.0  ;;  %585 = vadd.xlane.f32.xlu2 %v584_v62  ;;  %v394_v42 = vpop.xlane.xlu1 %393  ;;  %v1052_v43 = vmul.f32 %v3310_v16, %v1032_v32  ;;  %v974_v44 = vmul.f32 %v3313_v7, %v954_v39  ;;  %v431_v62 = vsel %vm376_vm0, %v317_v52, 0.0 }
  0xb4   : > { %v391_v45 = vpop.xlane.xlu0 %390  ;;  %v1073_v46 = vadd.f32 %v3321_v27, %v1053_v13  ;;  %v995_v40 = vadd.f32 %v3325_v34, %v975_v17  ;;  %v439_v1 = vadd.f32 %v394_v42, %v336_v10  ;;  %v602_v32 = vsel %vm376_vm0, %v547_v3, 0.0 }
  0xb5   : > { %v3333_v47 = vadd.f32 1e-05, %v710_v41  ;;  %v1072_v26 = vadd.f32 %v3321_v27, %v1052_v43  ;;  %v438_v2 = vadd.f32 %v391_v45, %v333_v23  ;;  %v994_v0 = vadd.f32 %v3325_v34, %v974_v44 }
  0xb6   : > { %v486_v53 = vpop.xlane.xlu2 %485  ;;  %v3351_v10 = vmul.f32 %v3236_v14, %v439_v1  ;;  %v526_v35 = vsel %vm318_vm1, %v471_v8, 0.0  ;;  %v361_v43 = vsel %vm318_vm1, %v294_v28, 0.0 }
  0xb7   : > { %v2854_v5 = vpop.eup %2853  ;;  %2855 = vrsqrt.f32 %v3333_v47  ;;  %v1104_v60 = vpack.c.bf16 %v1073_v46, %v1072_v26  ;;  %v1091_v23 = vpack.c.bf16 %v995_v40, %v994_v0  ;;  %v3346_v57 = vmul.f32 %v3236_v14, %v438_v2  ;;  %v313_v2 = vld [vmem:[%s3043_s27 + $0x70] sm:$0xff] }
  0xb8   : > { %v766_v61 = vmul.f32 %v2854_v5, %v3315_v22  ;;  %374 = vadd.xlane.f32.xlu1 %v373_v50  ;;  %vm772_vm10 = vweird.f32 %v2854_v5  ;;  %v674_v50 = vmul.f32 %v3351_v10, %v3351_v10  ;;  %v1015_v22 = vsub.f32 %v3089_v18, %v3277_v24 }
  0xb9   : > { %588 = vadd.xlane.f32.xlu0 %v587_v54  ;;  %2756 = vmatmul.msk.bf16.vlgmr.msra.gmra.mxu0 %vm376_vm0, %v1104_v60  ;;  %v673_v17 = vmul.f32 %v3346_v57, %v3346_v57  ;;  %vm773_vm12 = vmor %vm771_vm11, %vm772_vm10  ;;  %v419_v8 = vsel %vm376_vm0, %v313_v2, 0.0  ;;  %vm781_vm14 = vweird.f32 %v3333_v47 }
  0xba   : > { %v767_v12 = vmul.f32 %v2854_v5, %v766_v61  ;;  %2770 = vmatmul.msk.bf16.vlgmr.msra.gmra.mxu1 %vm318_vm1, %v1091_v23  ;;  %v937_v61 = vsub.f32 %v3083_v15, %v3277_v24  ;;  %v1016_v15 = vsub.f32 %v3097_v21, %v3296_v56 }
  0xbb   : > { %432 = vadd.xlane.f32.xlu2 %v431_v62  ;;  %v562_v11 = vpop.xlane.xlu1 %561 }
  0xbc   : > { %v768_v20 = vmul.f32 0.5, %v767_v12  ;;  %v609_v59 = vadd.f32 %v562_v11, %v486_v53  ;;  %v489_v25 = vpop.xlane.xlu0 %488  ;;  %v295_v53 = vld [vmem:[%s3052_s30 + $0x78] sm:$0xff] }
  0xbd   : > { %v2856_v29 = vpop.eup %2855  ;;  %v364_v12 = vsel %vm318_vm1, %v295_v53, 0.0 }
  0xbe   : > { %v769_v38 = vsub.f32 1.5, %v768_v20  ;;  %v776_v13 = vmul.f32 %v2856_v29, %v3333_v47  ;;  %v654_v39 = vmul.f32 %v3236_v14, %v609_v59  ;;  %v565_v41 = vpop.xlane.xlu2 %564  ;;  %vm782_vm13 = vweird.f32 %v2856_v29 }
  0xbf   : > { %v610_v42 = vadd.f32 %v565_v41, %v489_v25  ;;  %vm783_vm15 = vmor %vm781_vm14, %vm782_vm13  ;;  %v938_v25 = vsub.f32 %v3092_v19, %v3296_v56 }
  0xc0   : > { %v777_v45 = vmul.f32 %v2856_v29, %v776_v13  ;;  %v692_v46 = vsub.f32 %v654_v39, %v673_v17  ;;  %603 = vadd.xlane.f32.xlu1 %v602_v32  ;;  %v770_v44 = vmul.f32 %v2854_v5, %v769_v38  ;;  %v468_v13 = vmul.f32 %v295_v53, %v295_v53 }
  0xc1   : > { %v655_v26 = vmul.f32 %v3236_v14, %v610_v42  ;;  %527 = vadd.xlane.f32.xlu0 %v526_v35  ;;  %v467_v39 = vmul.f32 %v294_v28, %v294_v28 }
  0xc2   : > { %v778_v40 = vmul.f32 0.5, %v777_v45  ;;  %v711_v52 = vmax.f32 %v692_v46, 0.0  ;;  %v774_v54 = vsel %vm773_vm12, %v2854_v5, %v770_v44  ;;  %v314_v5 = vld [vmem:[%s3043_s27 + $0x78] sm:$0xff]  ;;  %v517_v28 = vsel %vm318_vm1, %v468_v13, 0.0 }
  0xc3   : > { %v693_v0 = vsub.f32 %v655_v26, %v674_v50  ;;  %362 = vadd.xlane.f32.xlu2 %v361_v43  ;;  %v342_v60 = vpop.xlane.xlu1 %341  ;;  %v1034_v11 = vmul.f32 %v1015_v22, %v774_v54  ;;  %v956_v59 = vmul.f32 %v937_v61, %v774_v54  ;;  %v422_v32 = vsel %vm376_vm0, %v314_v5, 0.0 }
  0xc4   : > { %v779_v62 = vsub.f32 1.5, %v778_v40  ;;  %v3371_v3 = vadd.f32 1e-05, %v711_v52  ;;  %v339_v1 = vpop.xlane.xlu0 %338  ;;  %v514_v40 = vsel %vm318_vm1, %v467_v39, 0.0 }
  0xc5   : > { %v712_v23 = vmax.f32 %v693_v0, 0.0  ;;  %v1054_v38 = vmul.f32 %v3310_v16, %v1034_v11  ;;  %v976_v21 = vmul.f32 %v3313_v7, %v956_v59  ;;  %v939_v59 = vsub.f32 %v3113_v30, %v3346_v57 }
  0xc6   : > { %2857 = vrsqrt.f32 %v3371_v3  ;;  %v397_v18 = vpop.xlane.xlu2 %396  ;;  %v780_v20 = vmul.f32 %v2856_v29, %v779_v62  ;;  %vm791_vm3 = vweird.f32 %v3371_v3 }
  0xc7   : > { %v3380_v24 = vadd.f32 1e-05, %v712_v23  ;;  %v1074_v46 = vadd.f32 %v3321_v27, %v1054_v38  ;;  %v996_v52 = vadd.f32 %v3325_v34, %v976_v21  ;;  %v440_v0 = vadd.f32 %v397_v18, %v339_v1 }
  0xc8   : > { %420 = vadd.xlane.f32.xlu1 %v419_v8  ;;  %v784_v35 = vsel %vm783_vm15, %v2856_v29, %v780_v20  ;;  %v543_v29 = vmul.f32 %v313_v2, %v313_v2 }
  0xc9   : > { %2859 = vrsqrt.f32 %v3380_v24  ;;  %365 = vadd.xlane.f32.xlu0 %v364_v12  ;;  %v1035_v47 = vmul.f32 %v1016_v15, %v784_v35  ;;  %v957_v17 = vmul.f32 %v938_v25, %v784_v35  ;;  %v3405_v1 = vmul.f32 %v3236_v14, %v440_v0 }
  0xca   : > { %v590_v23 = vsel %vm376_vm0, %v543_v29, 0.0  ;;  %v1017_v15 = vsub.f32 %v3129_v37, %v3346_v57  ;;  %vm801_vm6 = vweird.f32 %v3380_v24  ;;  %v1018_v29 = vsub.f32 %v3126_v36, %v3351_v10 }
  0xcb   : > { %423 = vadd.xlane.f32.xlu2 %v422_v32  ;;  %v492_v41 = vpop.xlane.xlu1 %491  ;;  %v1055_v42 = vmul.f32 %v3310_v16, %v1035_v47  ;;  %v977_v43 = vmul.f32 %v3313_v7, %v957_v17  ;;  %v675_v37 = vmul.f32 %v3405_v1, %v3405_v1 }
  0xcc   : > { %v2858_v19 = vpop.eup %2857  ;;  %v400_v56 = vpop.xlane.xlu0 %399 }
  0xcd   : > { %v786_v45 = vmul.f32 %v2858_v19, %v3371_v3  ;;  %v1075_v44 = vadd.f32 %v3321_v27, %v1055_v42  ;;  %v441_v50 = vadd.f32 %v400_v56, %v342_v60  ;;  %v997_v53 = vadd.f32 %v3325_v34, %v977_v43 }
  0xce   : > { %v495_v26 = vpop.xlane.xlu2 %494  ;;  %v544_v60 = vmul.f32 %v314_v5, %v314_v5  ;;  %vm792_vm2 = vweird.f32 %v2858_v19  ;;  %v940_v43 = vsub.f32 %v3120_v33, %v3351_v10 }
  0xcf   : > { %v2860_v54 = vpop.eup %2859  ;;  %v787_v22 = vmul.f32 %v2858_v19, %v786_v45  ;;  %v1105_v2 = vpack.c.bf16 %v1075_v44, %v1074_v46  ;;  %v1092_v62 = vpack.c.bf16 %v997_v53, %v996_v52  ;;  %v3401_v11 = vmul.f32 %v3236_v14, %v441_v50  ;;  %vm793_vm4 = vmor %vm791_vm3, %vm792_vm2 }
  0xd0   : > { %v796_v61 = vmul.f32 %v2860_v54, %v3380_v24  ;;  %518 = vadd.xlane.f32.xlu1 %v517_v28  ;;  %v593_v47 = vsel %vm376_vm0, %v544_v60, 0.0  ;;  %vm802_vm5 = vweird.f32 %v2860_v54 }
  0xd1   : > { %v788_v8 = vmul.f32 0.5, %v787_v22  ;;  %515 = vadd.xlane.f32.xlu0 %v514_v40  ;;  %2757 = vmatmul.msk.bf16.gmra.mxu0 %vm376_vm0, %v1105_v2  ;;  %v676_v30 = vmul.f32 %v3401_v11, %v3401_v11  ;;  %vm803_vm7 = vmor %vm801_vm6, %vm802_vm5 }
  0xd2   : > { %v797_v12 = vmul.f32 %v2860_v54, %v796_v61  ;;  %2771 = vmatmul.msk.bf16.gmra.mxu1 %vm318_vm1, %v1092_v62 }
  0xd3   : > { %v789_v20 = vsub.f32 1.5, %v788_v8  ;;  %591 = vadd.xlane.f32.xlu2 %v590_v23  ;;  %v571_v18 = vpop.xlane.xlu1 %570 }
  0xd4   : > { %v798_v5 = vmul.f32 0.5, %v797_v12  ;;  %v612_v25 = vadd.f32 %v571_v18, %v495_v26  ;;  %v568_v32 = vpop.xlane.xlu0 %567 }
  0xd5   : > { %v611_v35 = vadd.f32 %v568_v32, %v492_v41  ;;  %v790_v38 = vmul.f32 %v2858_v19, %v789_v20 }
  0xd6   : > { %v799_v13 = vsub.f32 1.5, %v798_v5  ;;  %v657_v39 = vmul.f32 %v3236_v14, %v612_v25  ;;  %v345_v17 = vpop.xlane.xlu2 %344 }
  0xd7   : > { %v656_v57 = vmul.f32 %v3236_v14, %v611_v35  ;;  %v794_v3 = vsel %vm793_vm4, %v2858_v19, %v790_v38 }
  0xd8   : > { %v695_v21 = vsub.f32 %v657_v39, %v676_v30  ;;  %v800_v41 = vmul.f32 %v2860_v54, %v799_v13  ;;  %v1036_v42 = vmul.f32 %v1017_v15, %v794_v3  ;;  %v958_v56 = vmul.f32 %v939_v59, %v794_v3 }
  0xd9   : > { %v694_v45 = vsub.f32 %v656_v57, %v675_v37  ;;  %594 = vadd.xlane.f32.xlu0 %v593_v47 }
  0xda   : > { %v714_v24 = vmax.f32 %v695_v21, 0.0  ;;  %v804_v46 = vsel %vm803_vm7, %v2860_v54, %v800_v41  ;;  %v1056_v19 = vmul.f32 %v3310_v16, %v1036_v42  ;;  %v978_v53 = vmul.f32 %v3313_v7, %v958_v56 }
  0xdb   : > { %v713_v44 = vmax.f32 %v694_v45, 0.0  ;;  %v403_v28 = vpop.xlane.xlu1 %402  ;;  %v1037_v50 = vmul.f32 %v1018_v29, %v804_v46  ;;  %v959_v26 = vmul.f32 %v940_v43, %v804_v46  ;;  %v1019_v41 = vsub.f32 %v3156_v51, %v3405_v1 }
  0xdc   : > { %v733_v40 = vadd.f32 1e-05, %v714_v24  ;;  %v348_v52 = vpop.xlane.xlu0 %347  ;;  %v1076_v54 = vadd.f32 %v3321_v27, %v1056_v19  ;;  %v998_v2 = vadd.f32 %v3325_v34, %v978_v53  ;;  %v442_v62 = vadd.f32 %v403_v28, %v345_v17 }
  0xdd   : > { %v732_v22 = vadd.f32 1e-05, %v713_v44  ;;  %v1057_v33 = vmul.f32 %v3310_v16, %v1037_v50  ;;  %v979_v36 = vmul.f32 %v3313_v7, %v959_v26  ;;  %v942_v24 = vsub.f32 %v3148_v48, %v3401_v11 }
  0xde   : > { %2861 = vrsqrt.f32 %v733_v40  ;;  %v406_v10 = vpop.xlane.xlu2 %405  ;;  %v3435_v15 = vmul.f32 %v3236_v14, %v442_v62  ;;  %vm821_vm10 = vweird.f32 %v733_v40  ;;  %v1020_v46 = vsub.f32 %v3165_v55, %v3401_v11 }
  0xdf   : > { %2863 = vrsqrt.f32 %v732_v22  ;;  %v1077_v0 = vadd.f32 %v3321_v27, %v1057_v33  ;;  %v999_v61 = vadd.f32 %v3325_v34, %v979_v36  ;;  %v443_v35 = vadd.f32 %v406_v10, %v348_v52 }
  0xe0   : > { %v677_v39 = vmul.f32 %v3435_v15, %v3435_v15  ;;  %vm811_vm12 = vweird.f32 %v732_v22 }
  0xe1   : > { %v1106_v23 = vpack.c.bf16 %v1077_v0, %v1076_v54  ;;  %v1093_v8 = vpack.c.bf16 %v999_v61, %v998_v2  ;;  %v3441_v57 = vmul.f32 %v3236_v14, %v443_v35 }
  0xe3   : > { %2758 = vmatmul.msk.bf16.gmra.mxu0 %vm376_vm0, %v1106_v23  ;;  %v501_v60 = vpop.xlane.xlu1 %500  ;;  %2772 = vmatmul.msk.bf16.gmra.mxu1 %vm318_vm1, %v1093_v8  ;;  %v678_v51 = vmul.f32 %v3441_v57, %v3441_v57 }
  0xe4   : > { %v2862_v12 = vpop.eup %2861  ;;  %v498_v20 = vpop.xlane.xlu0 %497 }
  0xe5   : > { %v2864_v18 = vpop.eup %2863  ;;  %v816_v59 = vmul.f32 %v2862_v12, %v733_v40  ;;  %vm822_vm8 = vweird.f32 %v2862_v12  ;;  %v941_v40 = vsub.f32 %v3151_v49, %v3405_v1 }
  0xe6   : > { %v806_v5 = vmul.f32 %v2864_v18, %v732_v22  ;;  %v574_v25 = vpop.xlane.xlu2 %573  ;;  %vm812_vm9 = vweird.f32 %v2864_v18  ;;  %vm823_vm11 = vmor %vm821_vm10, %vm822_vm8 }
  0xe7   : > { %v817_v32 = vmul.f32 %v2862_v12, %v816_v59  ;;  %v613_v47 = vadd.f32 %v574_v25, %v498_v20  ;;  %vm813_vm13 = vmor %vm811_vm12, %vm812_vm9 }
  0xe8   : > { %v807_v38 = vmul.f32 %v2864_v18, %v806_v5 }
  0xe9   : > { %v818_v13 = vmul.f32 0.5, %v817_v32  ;;  %v658_v30 = vmul.f32 %v3236_v14, %v613_v47 }
  0xea   : > { %v808_v17 = vmul.f32 0.5, %v807_v38 }
  0xeb   : > { %v819_v37 = vsub.f32 1.5, %v818_v13  ;;  %v696_v3 = vsub.f32 %v658_v30, %v677_v39  ;;  %v351_v21 = vpop.xlane.xlu1 %350 }
  0xec   : > { %v809_v42 = vsub.f32 1.5, %v808_v17  ;;  %v577_v56 = vpop.xlane.xlu0 %576 }
  0xed   : > { %v715_v43 = vmax.f32 %v696_v3, 0.0  ;;  %v614_v29 = vadd.f32 %v577_v56, %v501_v60  ;;  %v820_v45 = vmul.f32 %v2862_v12, %v819_v37 }
  0xee   : > { %v354_v44 = vpop.xlane.xlu2 %353  ;;  %v810_v28 = vmul.f32 %v2864_v18, %v809_v42 }
  0xef   : > { %v734_v50 = vadd.f32 1e-05, %v715_v43  ;;  %v659_v19 = vmul.f32 %v3236_v14, %v614_v29  ;;  %v824_v26 = vsel %vm823_vm11, %v2862_v12, %v820_v45 }
  0xf0   : > { %v814_v52 = vsel %vm813_vm13, %v2864_v18, %v810_v28  ;;  %v1039_v48 = vmul.f32 %v1020_v46, %v824_v26  ;;  %v961_v53 = vmul.f32 %v942_v24, %v824_v26 }
  0xf1   : > { %2865 = vrsqrt.f32 %v734_v50  ;;  %v697_v55 = vsub.f32 %v659_v19, %v678_v51  ;;  %v1038_v11 = vmul.f32 %v1019_v41, %v814_v52  ;;  %v960_v33 = vmul.f32 %v941_v40, %v814_v52 }
  0xf2   : > { %v1059_v22 = vmul.f32 %v3310_v16, %v1039_v48  ;;  %v981_v36 = vmul.f32 %v3313_v7, %v961_v53  ;;  %vm831_vm15 = vweird.f32 %v734_v50  ;;  %v1021_v19 = vsub.f32 %v3185_v4, %v3435_v15 }
  0xf3   : > { %v716_v10 = vmax.f32 %v697_v55, 0.0  ;;  %v412_v54 = vpop.xlane.xlu1 %411  ;;  %v1058_v0 = vmul.f32 %v3310_v16, %v1038_v11  ;;  %v980_v49 = vmul.f32 %v3313_v7, %v960_v33 }
  0xf4   : > { %v409_v2 = vpop.xlane.xlu0 %408  ;;  %v1079_v61 = vadd.f32 %v3321_v27, %v1059_v22  ;;  %v1001_v23 = vadd.f32 %v3325_v34, %v981_v36  ;;  %v445_v5 = vadd.f32 %v412_v54, %v354_v44  ;;  %v944_v54 = vsub.f32 %v3188_v6, %v3441_v57 }
  0xf5   : > { %v735_v1 = vadd.f32 1e-05, %v716_v10  ;;  %v1078_v62 = vadd.f32 %v3321_v27, %v1058_v0  ;;  %v444_v8 = vadd.f32 %v409_v2, %v351_v21  ;;  %v1000_v12 = vadd.f32 %v3325_v34, %v980_v49 }
  0xf6   : > { %v504_v60 = vpop.xlane.xlu2 %503  ;;  %v3468_v17 = vmul.f32 %v3236_v14, %v445_v5  ;;  %v1022_v10 = vsub.f32 %v3193_v9, %v3441_v57 }
  0xf7   : > { %v2866_v20 = vpop.eup %2865  ;;  %2867 = vrsqrt.f32 %v735_v1  ;;  %v1107_v18 = vpack.c.bf16 %v1079_v61, %v1078_v62  ;;  %v1094_v25 = vpack.c.bf16 %v1001_v23, %v1000_v12  ;;  %v3464_v35 = vmul.f32 %v3236_v14, %v444_v8 }
  0xf8   : > { %v826_v59 = vmul.f32 %v2866_v20, %v734_v50  ;;  %vm832_vm14 = vweird.f32 %v2866_v20  ;;  %v680_v24 = vmul.f32 %v3468_v17, %v3468_v17  ;;  %v943_v50 = vsub.f32 %v3179_v63, %v3435_v15 }
  0xf9   : > { %2759 = vmatmul.msk.bf16.gmra.mxu0 %vm376_vm0, %v1107_v18  ;;  %2773 = vmatmul.msk.bf16.gmra.mxu1 %vm318_vm1, %v1094_v25  ;;  %v679_v41 = vmul.f32 %v3464_v35, %v3464_v35  ;;  %vm833_vm2 = vmor %vm831_vm15, %vm832_vm14  ;;  %vm841_vm4 = vweird.f32 %v735_v1 }
  0xfa   : > { %v827_v32 = vmul.f32 %v2866_v20, %v826_v59 }
  0xfb   : > { %v580_v47 = vpop.xlane.xlu1 %579 }
  0xfc   : > { %v828_v38 = vmul.f32 0.5, %v827_v32  ;;  %v615_v13 = vadd.f32 %v580_v47, %v504_v60  ;;  %v507_v39 = vpop.xlane.xlu0 %506 }
  0xfd   : > { %v2868_v30 = vpop.eup %2867 }
  0xfe   : > { %v829_v37 = vsub.f32 1.5, %v828_v38  ;;  %v836_v3 = vmul.f32 %v2868_v30, %v735_v1  ;;  %v660_v21 = vmul.f32 %v3236_v14, %v615_v13  ;;  %v583_v42 = vpop.xlane.xlu2 %582  ;;  %vm842_vm3 = vweird.f32 %v2868_v30 }
  0xff   : > { %v616_v56 = vadd.f32 %v583_v42, %v507_v39  ;;  %vm843_vm5 = vmor %vm841_vm4, %vm842_vm3 }
 0x100   : > { %v837_v43 = vmul.f32 %v2868_v30, %v836_v3  ;;  %v698_v29 = vsub.f32 %v660_v21, %v679_v41  ;;  %v830_v45 = vmul.f32 %v2866_v20, %v829_v37  ;;  %v2965_v41 = vld [vmem:[%s3052_s30 + $0x50] sm:$0xff] }
 0x101   : > { %v661_v46 = vmul.f32 %v3236_v14, %v616_v56  ;;  %v945_v42 = vsub.f32 %v2965_v41, %v3464_v35 }
 0x102   : > { %v838_v44 = vmul.f32 0.5, %v837_v43  ;;  %v717_v28 = vmax.f32 %v698_v29, 0.0  ;;  %v834_v51 = vsel %vm833_vm2, %v2866_v20, %v830_v45  ;;  %v1023_v45 = vsub.f32 %v3217_v31, %v3464_v35 }
 0x103   : > { %v699_v26 = vsub.f32 %v661_v46, %v680_v24  ;;  %v372_v40 = vpop.xlane.xlu1 %371  ;;  %v1040_v11 = vmul.f32 %v1021_v19, %v834_v51  ;;  %v962_v36 = vmul.f32 %v943_v50, %v834_v51 }
 0x104   : > { %v839_v52 = vsub.f32 1.5, %v838_v44  ;;  %v736_v48 = vadd.f32 1e-05, %v717_v28  ;;  %v369_v53 = vpop.xlane.xlu0 %368 }
 0x105   : > { %v718_v55 = vmax.f32 %v699_v26, 0.0  ;;  %v1060_v0 = vmul.f32 %v3310_v16, %v1040_v11  ;;  %v982_v61 = vmul.f32 %v3313_v7, %v962_v36  ;;  %v2967_v11 = vld [vmem:[%s3043_s27 + $0x58] sm:$0xff] }
 0x106   : > { %2869 = vrsqrt.f32 %v736_v48  ;;  %v427_v22 = vpop.xlane.xlu2 %426  ;;  %v840_v33 = vmul.f32 %v2868_v30, %v839_v52  ;;  %vm851_vm7 = vweird.f32 %v736_v48 }
 0x107   : > { %v737_v4 = vadd.f32 1e-05, %v718_v55  ;;  %v1080_v60 = vadd.f32 %v3321_v27, %v1060_v0  ;;  %v1002_v20 = vadd.f32 %v3325_v34, %v982_v61  ;;  %v450_v25 = vadd.f32 %v427_v22, %v369_v53  ;;  %v2966_v53 = vld [vmem:[%s3052_s30 + $0x58] sm:$0xff] }
 0x108   : > { %v844_v63 = vsel %vm843_vm5, %v2868_v30, %v840_v33  ;;  %v946_v55 = vsub.f32 %v2966_v53, %v3468_v17  ;;  %v1024_v22 = vsub.f32 %v2967_v11, %v3468_v17 }
 0x109   : > { %2871 = vrsqrt.f32 %v737_v4  ;;  %v1041_v15 = vmul.f32 %v1022_v10, %v844_v63  ;;  %v963_v2 = vmul.f32 %v944_v54, %v844_v63  ;;  %v3498_v3 = vmul.f32 %v3236_v14, %v450_v25 }
 0x10a   : > { %vm861_vm10 = vweird.f32 %v737_v4 }
 0x10b   : > { %v522_v49 = vpop.xlane.xlu1 %521  ;;  %v1061_v1 = vmul.f32 %v3310_v16, %v1041_v15  ;;  %v983_v9 = vmul.f32 %v3313_v7, %v963_v2  ;;  %v685_v26 = vmul.f32 %v3498_v3, %v3498_v3 }
 0x10c   : > { %v2870_v62 = vpop.eup %2869  ;;  %v430_v23 = vpop.xlane.xlu0 %429 }
 0x10d   : > { %v846_v8 = vmul.f32 %v2870_v62, %v736_v48  ;;  %v1081_v6 = vadd.f32 %v3321_v27, %v1061_v1  ;;  %v451_v57 = vadd.f32 %v430_v23, %v372_v40  ;;  %v1003_v18 = vadd.f32 %v3325_v34, %v983_v9 }
 0x10e   : > { %v525_v12 = vpop.xlane.xlu2 %524  ;;  %vm852_vm6 = vweird.f32 %v2870_v62 }
 0x10f   : > { %v2872_v59 = vpop.eup %2871  ;;  %v847_v5 = vmul.f32 %v2870_v62, %v846_v8  ;;  %v1108_v32 = vpack.c.bf16 %v1081_v6, %v1080_v60  ;;  %v1095_v38 = vpack.c.bf16 %v1003_v18, %v1002_v20  ;;  %v3494_v30 = vmul.f32 %v3236_v14, %v451_v57  ;;  %vm853_vm8 = vmor %vm851_vm7, %vm852_vm6 }
 0x110   : > { %v856_v47 = vmul.f32 %v2872_v59, %v737_v4  ;;  %vm862_vm9 = vweird.f32 %v2872_v59 }
 0x111   : > { %v848_v13 = vmul.f32 0.5, %v847_v5  ;;  %2760 = vmatmul.msk.bf16.gmra.mxu0 %vm376_vm0, %v1108_v32  ;;  %2774 = vmatmul.msk.bf16.gmra.mxu1 %vm318_vm1, %v1095_v38  ;;  %v686_v51 = vmul.f32 %v3494_v30, %v3494_v30  ;;  %vm863_vm11 = vmor %vm861_vm10, %vm862_vm9 }
 0x112   : > { %v857_v39 = vmul.f32 %v2872_v59, %v856_v47 }
 0x113   : > { %v849_v37 = vsub.f32 1.5, %v848_v13  ;;  %v601_v21 = vpop.xlane.xlu1 %600 }
 0x114   : > { %v858_v56 = vmul.f32 0.5, %v857_v39  ;;  %v622_v43 = vadd.f32 %v601_v21, %v525_v12  ;;  %v598_v29 = vpop.xlane.xlu0 %597 }
 0x115   : > { %v850_v24 = vmul.f32 %v2870_v62, %v849_v37  ;;  %v621_v46 = vadd.f32 %v598_v29, %v522_v49 }
 0x116   : > { %v859_v44 = vsub.f32 1.5, %v858_v56  ;;  %v667_v28 = vmul.f32 %v3236_v14, %v622_v43  ;;  %v357_v19 = vpop.xlane.xlu2 %356 }
 0x117   : > { %v666_v31 = vmul.f32 %v3236_v14, %v621_v46  ;;  %v854_v35 = vsel %vm853_vm8, %v2870_v62, %v850_v24 }
 0x118   : > { %v860_v40 = vmul.f32 %v2872_v59, %v859_v44  ;;  %v705_v50 = vsub.f32 %v667_v28, %v686_v51  ;;  %v1042_v52 = vmul.f32 %v1023_v45, %v854_v35  ;;  %v964_v48 = vmul.f32 %v945_v42, %v854_v35  ;;  %v2968_v28 = vld [vmem:[%s3052_s30 + $0x80] sm:$0xff] }
 0x119   : > { %v704_v33 = vsub.f32 %v666_v31, %v685_v26  ;;  %v951_v51 = vsub.f32 %v2968_v28, %v3498_v3 }
 0x11a   : > { %v724_v36 = vmax.f32 %v705_v50, 0.0  ;;  %v864_v10 = vsel %vm863_vm11, %v2872_v59, %v860_v40  ;;  %v1062_v15 = vmul.f32 %v3310_v16, %v1042_v52  ;;  %v984_v49 = vmul.f32 %v3313_v7, %v964_v48  ;;  %v2970_v48 = vld [vmem:[%s3043_s27 + $0x88] sm:$0xff] }
 0x11b   : > { %v723_v4 = vmax.f32 %v704_v33, 0.0  ;;  %v415_v54 = vpop.xlane.xlu1 %414  ;;  %v1043_v63 = vmul.f32 %v1024_v22, %v864_v10  ;;  %v965_v0 = vmul.f32 %v946_v55, %v864_v10  ;;  %v1030_v53 = vsub.f32 %v2970_v48, %v3494_v30 }
 0x11c   : > { %v743_v2 = vadd.f32 1e-05, %v724_v36  ;;  %v360_v61 = vpop.xlane.xlu0 %359  ;;  %v1082_v9 = vadd.f32 %v3321_v27, %v1062_v15  ;;  %v1004_v60 = vadd.f32 %v3325_v34, %v984_v49  ;;  %v446_v57 = vadd.f32 %v415_v54, %v357_v19  ;;  %v2969_v19 = vld [vmem:[%s3052_s30 + $0x88] sm:$0xff]  ;;  %v2971_v54 = vld [vmem:[%s3043_s27 + $0x80] sm:$0xff] }
 0x11d   : > { %v742_v1 = vadd.f32 1e-05, %v723_v4  ;;  %v1063_v62 = vmul.f32 %v3310_v16, %v1043_v63  ;;  %v985_v17 = vmul.f32 %v3313_v7, %v965_v0  ;;  %v952_v26 = vsub.f32 %v2969_v19, %v3494_v30 }
 0x11e   : > { %2873 = vrsqrt.f32 %v743_v2  ;;  %v418_v23 = vpop.xlane.xlu2 %417  ;;  %v3526_v47 = vmul.f32 %v3236_v14, %v446_v57  ;;  %vm921_vm14 = vweird.f32 %v743_v2  ;;  %v1029_v63 = vsub.f32 %v2971_v54, %v3498_v3 }
 0x11f   : > { %2875 = vrsqrt.f32 %v742_v1  ;;  %v1083_v8 = vadd.f32 %v3321_v27, %v1063_v62  ;;  %v1005_v6 = vadd.f32 %v3325_v34, %v985_v17  ;;  %v447_v13 = vadd.f32 %v418_v23, %v360_v61 }
 0x120   : > { %v681_v56 = vmul.f32 %v3526_v47, %v3526_v47  ;;  %vm911_vm2 = vweird.f32 %v742_v1 }
 0x121   : > { %v1109_v12 = vpack.c.bf16 %v1083_v8, %v1082_v9  ;;  %v1096_v20 = vpack.c.bf16 %v1005_v6, %v1004_v60  ;;  %v3532_v45 = vmul.f32 %v3236_v14, %v447_v13 }
 0x123   : > { %2761 = vmatmul.msk.bf16.gmra.mxu0 %vm376_vm0, %v1109_v12  ;;  %v513_v18 = vpop.xlane.xlu1 %512  ;;  %2775 = vmatmul.msk.bf16.gmra.mxu1 %vm318_vm1, %v1096_v20  ;;  %v682_v11 = vmul.f32 %v3532_v45, %v3532_v45 }
 0x124   : > { %v2874_v59 = vpop.eup %2873  ;;  %v510_v5 = vpop.xlane.xlu0 %509 }
 0x125   : > { %v2876_v25 = vpop.eup %2875  ;;  %v916_v32 = vmul.f32 %v2874_v59, %v743_v2  ;;  %vm922_vm12 = vweird.f32 %v2874_v59 }
 0x126   : > { %v906_v38 = vmul.f32 %v2876_v25, %v742_v1  ;;  %v586_v39 = vpop.xlane.xlu2 %585  ;;  %vm912_vm13 = vweird.f32 %v2876_v25  ;;  %vm923_vm15 = vmor %vm921_vm14, %vm922_vm12 }
 0x127   : > { %v917_v37 = vmul.f32 %v2874_v59, %v916_v32  ;;  %v617_v21 = vadd.f32 %v586_v39, %v510_v5  ;;  %vm913_vm3 = vmor %vm911_vm2, %vm912_vm13  ;;  %v3568_v39 = vperm.slane %v3301_v58, 4 }
 0x128   : > { %v907_v41 = vmul.f32 %v2876_v25, %v906_v38 }
 0x129   : > { %v918_v42 = vmul.f32 0.5, %v917_v37  ;;  %v662_v43 = vmul.f32 %v3236_v14, %v617_v21 }
 0x12a   : > { %v908_v29 = vmul.f32 0.5, %v907_v41 }
 0x12b   : > { %v919_v24 = vsub.f32 1.5, %v918_v42  ;;  %v700_v46 = vsub.f32 %v662_v43, %v681_v56  ;;  %v375_v44 = vpop.xlane.xlu1 %374 }
 0x12c   : > { %v909_v31 = vsub.f32 1.5, %v908_v29  ;;  %v589_v35 = vpop.xlane.xlu0 %588 }
 0x12d   : > { %v920_v40 = vmul.f32 %v2874_v59, %v919_v24  ;;  %v719_v50 = vmax.f32 %v700_v46, 0.0  ;;  %v618_v52 = vadd.f32 %v589_v35, %v513_v18 }
 0x12e   : > { %v910_v55 = vmul.f32 %v2876_v25, %v909_v31  ;;  %v433_v22 = vpop.xlane.xlu2 %432 }
 0x12f   : > { %v738_v33 = vadd.f32 1e-05, %v719_v50  ;;  %v663_v36 = vmul.f32 %v3236_v14, %v618_v52  ;;  %v452_v10 = vadd.f32 %v433_v22, %v375_v44  ;;  %v924_v4 = vsel %vm923_vm15, %v2874_v59, %v920_v40 }
 0x130   : > { %v914_v15 = vsel %vm913_vm3, %v2876_v25, %v910_v55  ;;  %v971_v0 = vmul.f32 %v952_v26, %v924_v4  ;;  %v1049_v30 = vmul.f32 %v1030_v53, %v924_v4  ;;  %v2973_v4 = vld [vmem:[%s3043_s27 + $0x60] sm:$0xff] }
 0x131   : > { %2877 = vrsqrt.f32 %v738_v33  ;;  %v701_v2 = vsub.f32 %v663_v36, %v682_v11  ;;  %v3547_v61 = vmul.f32 %v3236_v14, %v452_v10  ;;  %v970_v49 = vmul.f32 %v951_v51, %v914_v15  ;;  %v2972_v36 = vld [vmem:[%s3052_s30 + $0x60] sm:$0xff] }
 0x132   : > { %v1048_v1 = vmul.f32 %v1029_v63, %v914_v15  ;;  %v1069_v62 = vmul.f32 %v3310_v16, %v1049_v30  ;;  %v991_v17 = vmul.f32 %v3313_v7, %v971_v0  ;;  %vm871_vm5 = vweird.f32 %v738_v33 }
 0x133   : > { %v720_v23 = vmax.f32 %v701_v2, 0.0  ;;  %v604_v9 = vpop.xlane.xlu1 %603  ;;  %v990_v6 = vmul.f32 %v3313_v7, %v970_v49  ;;  %v687_v20 = vmul.f32 %v3547_v61, %v3547_v61  ;;  %v947_v10 = vsub.f32 %v2972_v36, %v3526_v47 }
 0x134   : > { %v528_v8 = vpop.xlane.xlu0 %527  ;;  %v1068_v60 = vmul.f32 %v3310_v16, %v1048_v1  ;;  %v1089_v3 = vadd.f32 %v3321_v27, %v1069_v62  ;;  %v3555_v57 = vadd.f32 %v3325_v34, %v991_v17  ;;  %v1025_v54 = vsub.f32 %v2973_v4, %v3526_v47 }
 0x135   : > { %v3557_v12 = vadd.f32 1e-05, %v720_v23  ;;  %v623_v18 = vadd.f32 %v604_v9, %v528_v8  ;;  %v3563_v32 = vadd.f32 %v3325_v34, %v990_v6  ;;  %v2975_v6 = vld [vmem:[%s3043_s27 + $0x68] sm:$0xff] }
 0x136   : > { %v363_v59 = vpop.xlane.xlu2 %362  ;;  %v1158_v5 = vpop.f32.mrf.mxu0  ;;  %v1088_v25 = vadd.f32 %v3321_v27, %v1068_v60  ;;  %v2974_v60 = vld [vmem:[%s3052_s30 + $0x68] sm:$0xff] }
 0x137   : > { %v2878_v38 = vpop.eup %2877  ;;  %2879 = vrsqrt.f32 %v3557_v12  ;;  %v668_v13 = vmul.f32 %v3236_v14, %v623_v18  ;;  %v1258_v21 = vpop.f32.mrf.mxu1  ;;  %v1099_v42 = vpack.c.bf16 %v3555_v57, %v3563_v32  ;;  %vm881_vm8 = vweird.f32 %v3557_v12 }
 0x138   : > { %v866_v37 = vmul.f32 %v2878_v38, %v738_v33  ;;  %v1112_v41 = vpack.c.bf16 %v1089_v3, %v1088_v25  ;;  %v1259_v43 = vadd.f32 %v1258_v21, %v1158_v5  ;;  %vm872_vm4 = vweird.f32 %v2878_v38 }
 0x139   : > { %v706_v56 = vsub.f32 %v668_v13, %v687_v20  ;;  %vm873_vm6 = vmor %vm871_vm5, %vm872_vm4  ;;  %v948_v3 = vsub.f32 %v2974_v60, %v3532_v45  ;;  %v1026_v20 = vsub.f32 %v2975_v6, %v3532_v45 }
 0x13a   : > { %v867_v29 = vmul.f32 %v2878_v38, %v866_v37  ;;  %2764 = vmatmul.msk.bf16.vlgmr.msra.gmra.mxu3 %vm376_vm0, %v1112_v41  ;;  %v1308_v46 = vadd.f32 %v3568_v39, %v1259_v43 }
 0x13b   : > { %v725_v24 = vmax.f32 %v706_v56, 0.0  ;;  %v421_v26 = vpop.xlane.xlu1 %420 }
 0x13c   : > { %v868_v44 = vmul.f32 0.5, %v867_v29  ;;  %v366_v28 = vpop.xlane.xlu0 %365  ;;  %v3576_v58 = vmax.f32 %v1308_v46, 0.0  ;;  %v448_v11 = vadd.f32 %v421_v26, %v363_v59 }
 0x13d   : > { %v2880_v51 = vpop.eup %2879  ;;  %v3574_v19 = vadd.f32 1e-05, %v725_v24 }
 0x13e   : > { %v869_v31 = vsub.f32 1.5, %v868_v44  ;;  %v876_v35 = vmul.f32 %v2880_v51, %v3557_v12  ;;  %v424_v40 = vpop.xlane.xlu2 %423  ;;  %v1160_v50 = vpop.f32.mrf.mxu0  ;;  %1346 = vadd.xlane.f32.xlu1 %v3576_v58  ;;  %v1384_v52 = vmul.f32 %v3576_v58, %v3576_v58  ;;  %vm882_vm7 = vweird.f32 %v2880_v51 }
 0x13f   : > { %2881 = vrsqrt.f32 %v3574_v19  ;;  %v1260_v55 = vpop.f32.mrf.mxu1  ;;  %v3589_v62 = vmul.f32 %v3236_v14, %v448_v11  ;;  %v449_v9 = vadd.f32 %v424_v40, %v366_v28  ;;  %vm883_vm9 = vmor %vm881_vm8, %vm882_vm7  ;;  %vm931_vm11 = vweird.f32 %v3574_v19 }
 0x140   : > { %v870_v48 = vmul.f32 %v2878_v38, %v869_v31  ;;  %v877_v53 = vmul.f32 %v2880_v51, %v876_v35  ;;  %v1261_v22 = vadd.f32 %v1260_v55, %v1160_v50  ;;  %1403 = vadd.xlane.f32.xlu0 %v1384_v52  ;;  %v2976_v52 = vld [vmem:[%s3043_s27 + $0x90] sm:$0xff] }
 0x141   : > { %v683_v13 = vmul.f32 %v3589_v62, %v3589_v62  ;;  %v3609_v56 = vmul.f32 %v3236_v14, %v449_v9 }
 0x142   : > { %v878_v63 = vmul.f32 0.5, %v877_v53  ;;  %v874_v15 = vsel %vm873_vm6, %v2878_v38, %v870_v48  ;;  %v1309_v0 = vadd.f32 %v3568_v39, %v1261_v22  ;;  %v1031_v48 = vsub.f32 %v2976_v52, %v3547_v61 }
 0x143   : > { %v1044_v2 = vmul.f32 %v1025_v54, %v874_v15  ;;  %v966_v49 = vmul.f32 %v947_v10, %v874_v15  ;;  %v519_v43 = vpop.xlane.xlu1 %518  ;;  %v684_v53 = vmul.f32 %v3609_v56, %v3609_v56 }
 0x144   : > { %v879_v30 = vsub.f32 1.5, %v878_v63  ;;  %v516_v33 = vpop.xlane.xlu0 %515  ;;  %v3591_v17 = vmax.f32 %v1309_v0, 0.0 }
 0x145   : > { %v2882_v1 = vpop.eup %2881  ;;  %v1064_v25 = vmul.f32 %v3310_v16, %v1044_v2  ;;  %v986_v38 = vmul.f32 %v3313_v7, %v966_v49 }
 0x146   : > { %v880_v23 = vmul.f32 %v2880_v51, %v879_v30  ;;  %v926_v47 = vmul.f32 %v2882_v1, %v3574_v19  ;;  %v592_v8 = vpop.xlane.xlu2 %591  ;;  %1348 = vadd.xlane.f32.xlu2 %v3591_v17  ;;  %v1385_v59 = vmul.f32 %v3591_v17, %v3591_v17  ;;  %vm932_vm10 = vweird.f32 %v2882_v1 }
 0x147   : > { %v619_v18 = vadd.f32 %v592_v8, %v516_v33  ;;  %v1006_v26 = vadd.f32 %v3325_v34, %v986_v38  ;;  %vm933_vm12 = vmor %vm931_vm11, %vm932_vm10 }
 0x148   : > { %v927_v5 = vmul.f32 %v2882_v1, %v926_v47  ;;  %v884_v12 = vsel %vm883_vm9, %v2880_v51, %v880_v23  ;;  %1405 = vadd.xlane.f32.xlu1 %v1385_v59  ;;  %v1084_v51 = vadd.f32 %v3321_v27, %v1064_v25 }
 0x149   : > { %v664_v37 = vmul.f32 %v3236_v14, %v619_v18  ;;  %v1045_v45 = vmul.f32 %v1026_v20, %v884_v12  ;;  %v967_v21 = vmul.f32 %v948_v3, %v884_v12 }
 0x14a   : > { %v928_v41 = vmul.f32 0.5, %v927_v5 }
 0x14b   : > { %v702_v29 = vsub.f32 %v664_v37, %v683_v13  ;;  %v1065_v24 = vmul.f32 %v3310_v16, %v1045_v45  ;;  %v987_v46 = vmul.f32 %v3313_v7, %v967_v21 }
 0x14c   : > { %v929_v44 = vsub.f32 1.5, %v928_v41  ;;  %v595_v28 = vpop.xlane.xlu0 %594 }
 0x14d   : > { %v721_v31 = vmax.f32 %v702_v29, 0.0  ;;  %v620_v35 = vadd.f32 %v595_v28, %v519_v43  ;;  %v1085_v40 = vadd.f32 %v3321_v27, %v1065_v24  ;;  %v1007_v50 = vadd.f32 %v3325_v34, %v987_v46  ;;  %v2977_v46 = vld [vmem:[%s3052_s30 + $0x70] sm:$0xff] }
 0x14e   : > { %v1163_v55 = vpop.f32.mrf.mxu0  ;;  %v930_v11 = vmul.f32 %v2882_v1, %v929_v44  ;;  %v949_v44 = vsub.f32 %v2977_v46, %v3589_v62  ;;  %v2978_v28 = vld [vmem:[%s3043_s27 + $0x70] sm:$0xff] }
 0x14f   : > { %v740_v22 = vadd.f32 1e-05, %v721_v31  ;;  %v665_v36 = vmul.f32 %v3236_v14, %v620_v35  ;;  %v1263_v10 = vpop.f32.mrf.mxu1  ;;  %v1110_v4 = vpack.c.bf16 %v1085_v40, %v1084_v51  ;;  %v1097_v54 = vpack.c.bf16 %v1007_v50, %v1006_v26 }
 0x150   : > { %v1264_v63 = vadd.f32 %v1263_v10, %v1163_v55  ;;  %v3623_v15 = vsel %vm933_vm12, %v2882_v1, %v930_v11  ;;  %v1027_v51 = vsub.f32 %v2978_v28, %v3589_v62  ;;  %v2980_v55 = vld [vmem:[%s3043_s27 + $0x78] sm:$0xff] }
 0x151   : > { %2883 = vrsqrt.f32 %v740_v22  ;;  %v703_v0 = vsub.f32 %v665_v36, %v684_v53  ;;  %2762 = vmatmul.msk.bf16.gmra.mxu0 %vm376_vm0, %v1110_v4  ;;  %2776 = vmatmul.msk.bf16.gmra.mxu1 %vm318_vm1, %v1097_v54  ;;  %v1050_v19 = vmul.f32 %v1031_v48, %v3623_v15  ;;  %vm891_vm14 = vweird.f32 %v740_v22  ;;  %v2979_v48 = vld [vmem:[%s3052_s30 + $0x78] sm:$0xff] }
 0x152   : > { %v1310_v30 = vadd.f32 %v3568_v39, %v1264_v63  ;;  %v950_v53 = vsub.f32 %v2979_v48, %v3609_v56  ;;  %v1028_v11 = vsub.f32 %v2980_v55, %v3609_v56 }
 0x153   : > { %v722_v33 = vmax.f32 %v703_v0, 0.0  ;;  %v1070_v2 = vmul.f32 %v3310_v16, %v1050_v19 }
 0x154   : > { %v3630_v14 = vmax.f32 %v1310_v30, 0.0 }
 0x155   : > { %v741_v49 = vadd.f32 1e-05, %v722_v33  ;;  %v1090_v23 = vadd.f32 %v3321_v27, %v1070_v2 }
 0x156   : > { %1350 = vadd.xlane.f32.xlu2 %v3630_v14  ;;  %v1165_v1 = vpop.f32.mrf.mxu0  ;;  %v1386_v47 = vmul.f32 %v3630_v14, %v3630_v14 }
 0x157   : > { %v2884_v9 = vpop.eup %2883  ;;  %2885 = vrsqrt.f32 %v741_v49  ;;  %v1265_v8 = vpop.f32.mrf.mxu1  ;;  %v1113_v60 = vpack.c.bf16 %v1090_v23, %v1090_v23  ;;  %vm901_vm3 = vweird.f32 %v741_v49 }
 0x158   : > { %v886_v3 = vmul.f32 %v2884_v9, %v740_v22  ;;  %v1266_v6 = vadd.f32 %v1265_v8, %v1165_v1  ;;  %1407 = vadd.xlane.f32.xlu1 %v1386_v47  ;;  %vm892_vm13 = vweird.f32 %v2884_v9  ;;  %v2981_v22 = vld [vmem:[%s3052_s30 + $0x90] sm:$0xff] }
 0x159   : > { %2765 = vmatmul.msk.bf16.gmra.mxu3 %vm376_vm0, %v1113_v60  ;;  %vm893_vm15 = vmor %vm891_vm14, %vm892_vm13  ;;  %v953_v62 = vsub.f32 %v2981_v22, %v3547_v61 }
 0x15a   : > { %v887_v20 = vmul.f32 %v2884_v9, %v886_v3  ;;  %v1311_v18 = vadd.f32 %v3568_v39, %v1266_v6 }
 0x15b   : > { %v972_v2 = vmul.f32 %v953_v62, %v3623_v15 }
 0x15c   : > { %v888_v59 = vmul.f32 0.5, %v887_v20  ;;  %v3638_v5 = vmax.f32 %v1311_v18, 0.0 }
 0x15d   : > { %v2886_v12 = vpop.eup %2885 }
 0x15e   : > { %v889_v25 = vsub.f32 1.5, %v888_v59  ;;  %v896_v38 = vmul.f32 %v2886_v12, %v741_v49  ;;  %1352 = vadd.xlane.f32.xlu0 %v3638_v5  ;;  %v1387_v13 = vmul.f32 %v3638_v5, %v3638_v5  ;;  %vm902_vm2 = vweird.f32 %v2886_v12 }
 0x15f   : > { %vm903_vm4 = vmor %vm901_vm3, %vm902_vm2 }
 0x160   : > { %v890_v37 = vmul.f32 %v2884_v9, %v889_v25  ;;  %v897_v45 = vmul.f32 %v2886_v12, %v896_v38  ;;  %1409 = vadd.xlane.f32.xlu2 %v1387_v13  ;;  %v1168_v21 = vpop.f32.mrf.mxu0  ;;  %v1268_v41 = vpop.f32.mrf.mxu1 }
 0x161   : > { %v1269_v29 = vadd.f32 %v1268_v41, %v1168_v21 }
 0x162   : > { %v898_v43 = vmul.f32 0.5, %v897_v45  ;;  %v894_v24 = vsel %vm893_vm15, %v2884_v9, %v890_v37 }
 0x163   : > { %v1312_v31 = vadd.f32 %v3568_v39, %v1269_v29  ;;  %v1046_v35 = vmul.f32 %v1027_v51, %v894_v24  ;;  %v968_v40 = vmul.f32 %v949_v44, %v894_v24  ;;  %v2992_v44 = vmov 64.0  }
 0x164   : > { %v899_v26 = vsub.f32 1.5, %v898_v43  ;;  %2887 = vrcp.f32 %v2992_v44 }
 0x165   : > { %v3648_v52 = vmax.f32 %v1312_v31, 0.0  ;;  %v1066_v56 = vmul.f32 %v3310_v16, %v1046_v35  ;;  %v988_v19 = vmul.f32 %v3313_v7, %v968_v40  ;;  %v2824_v40 = vld [vmem:[%s4827_s5 + $0x38] sm:$0xff] }
 0x166   : > { %v900_v50 = vmul.f32 %v2886_v12, %v899_v26  ;;  %1905 = vmatpush.bf16.msra.mxu2 %v2824_v40  ;;  %2828 = vmatpush.bf16.msra.mxu3 %v2824_v40 }
 0x167   : > { %1354 = vadd.xlane.f32.xlu0 %v3648_v52  ;;  %v1388_v10 = vmul.f32 %v3648_v52, %v3648_v52  ;;  %v1086_v57 = vadd.f32 %v3321_v27, %v1066_v56 }
 0x168   : > { %v1170_v36 = vpop.f32.mrf.mxu0  ;;  %v904_v4 = vsel %vm903_vm4, %v2886_v12, %v900_v50  ;;  %v1270_v54 = vpop.f32.mrf.mxu1 }
 0x169   : > { %2778 = vmatmul.msk.bf16.vlgmr.msrb.gmra.mxu3 %vm318_vm1, %v1099_v42  ;;  %v1047_v63 = vmul.f32 %v1028_v11, %v904_v4  ;;  %v969_v0 = vmul.f32 %v950_v53, %v904_v4  ;;  %v1271_v61 = vadd.f32 %v1270_v54, %v1170_v36  ;;  %1411 = vadd.xlane.f32.xlu2 %v1388_v10  ;;  %v2823_v11 = vld [vmem:[%s4827_s5 + $0x30] sm:$0xff]  ;;  %v2822_v10 = vld [vmem:[%s4827_s5 + $0x28] sm:$0xff] }
 0x16a   : > { %v1008_v42 = vadd.f32 %v3325_v34, %v988_v19  ;;  %v2888_v31 = vpop.eup %2887  ;;  %1906 = vmatpush.bf16.msra.mxu2 %v2823_v11  ;;  %2829 = vmatpush.bf16.msra.mxu3 %v2823_v11  ;;  %v2821_v19 = vld [vmem:[%s4827_s5 + $0x20] sm:$0xff] }
 0x16b   : > { %v1067_v30 = vmul.f32 %v3310_v16, %v1047_v63  ;;  %v989_v33 = vmul.f32 %v3313_v7, %v969_v0  ;;  %v1313_v49 = vadd.f32 %v3568_v39, %v1271_v61  ;;  %v992_v16 = vmul.f32 %v3313_v7, %v972_v2  ;;  %v2820_v2 = vld [vmem:[%s4827_s5 + $0x18] sm:$0xff] }
 0x16c   : > { %v1442_v48 = vmul.f32 64.0, %v2888_v31 }
 0x16d   : > { %v1087_v32 = vadd.f32 %v3321_v27, %v1067_v30  ;;  %v1009_v23 = vadd.f32 %v3325_v34, %v989_v33  ;;  %v3673_v1 = vmax.f32 %v1313_v49, 0.0  ;;  %v1012_v27 = vadd.f32 %v3325_v34, %v992_v16 }
 0x16e   : > { %v1443_v62 = vsub.f32 1.0, %v1442_v48  ;;  %1907 = vmatpush.bf16.msra.mxu2 %v2822_v10  ;;  %2830 = vmatpush.bf16.msra.mxu3 %v2822_v10 }
 0x16f   : > { %v1111_v47 = vpack.c.bf16 %v1087_v32, %v1086_v57  ;;  %v1098_v9 = vpack.c.bf16 %v1009_v23, %v1008_v42  ;;  %1356 = vadd.xlane.f32.xlu1 %v3673_v1  ;;  %v1389_v15 = vmul.f32 %v3673_v1, %v3673_v1  ;;  %v1100_v60 = vpack.c.bf16 %v1012_v27, %v1012_v27  ;;  %v2819_v42 = vld [vmem:[%s4827_s5 + $0x10] sm:$0xff] }
 0x170   : > { %v1444_v63 = vmul.f32 %v2888_v31, %v1443_v62 }
 0x171   : > { %2763 = vmatmul.msk.bf16.gmra.mxu0 %vm376_vm0, %v1111_v47  ;;  %2777 = vmatmul.msk.bf16.gmra.mxu1 %vm318_vm1, %v1098_v9  ;;  %vm1446_vm0 = vweird.f32 %v2888_v31 }
 0x172   : > { %1413 = vadd.xlane.f32.xlu0 %v1389_v15  ;;  %v1445_v30 = vadd.f32 %v2888_v31, %v1444_v63  ;;  %1908 = vmatpush.bf16.msra.mxu2 %v2821_v19  ;;  %v2818_v15 = vld [vmem:[%s4827_s5 + $0x8] sm:$0xff] }
 0x173   : > { %2831 = vmatpush.bf16.msra.mxu3 %v2821_v19 }
 0x174   : > { %v3732_v49 = vsel %vm1446_vm0, %v2888_v31, %v1445_v30 }
 0x176   : > { %v1173_v8 = vpop.f32.mrf.mxu0  ;;  %v1273_v3 = vpop.f32.mrf.mxu1  ;;  %1909 = vmatpush.bf16.msra.mxu2 %v2820_v2 }
 0x177   : > { %v1274_v6 = vadd.f32 %v1273_v3, %v1173_v8  ;;  %2832 = vmatpush.bf16.msra.mxu3 %v2820_v2 }
 0x179   : > { %2779 = vmatmul.msk.bf16.gmra.mxu3 %vm318_vm1, %v1100_v60  ;;  %v1314_v7 = vadd.f32 %v3568_v39, %v1274_v6  ;;  %v2817_v6 = vld [vmem:[%s4827_s5] sm:$0xff] }
 0x17a   : > { %1910 = vmatpush.bf16.msra.mxu2 %v2819_v42 }
 0x17b   : > { %v3684_v20 = vmax.f32 %v1314_v7, 0.0  ;;  %2833 = vmatpush.bf16.msra.mxu3 %v2819_v42 }
 0x17d   : > { %1358 = vadd.xlane.f32.xlu1 %v3684_v20  ;;  %v1390_v59 = vmul.f32 %v3684_v20, %v3684_v20 }
 0x17e   : > { %v1175_v18 = vpop.f32.mrf.mxu0  ;;  %v1275_v12 = vpop.f32.mrf.mxu1  ;;  %1911 = vmatpush.bf16.msra.mxu2 %v2818_v15 }
 0x17f   : > { %v1276_v25 = vadd.f32 %v1275_v12, %v1175_v18  ;;  %1415 = vadd.xlane.f32.xlu0 %v1390_v59  ;;  %2834 = vmatpush.bf16.msra.mxu3 %v2818_v15 }
 0x181   : > { %v1315_v34 = vadd.f32 %v3568_v39, %v1276_v25 }
 0x182   : > { %1912 = vmatpush.bf16.msra.mxu2 %v2817_v6 }
 0x183   : > { %v3690_v38 = vmax.f32 %v1315_v34, 0.0  ;;  %2835 = vmatpush.bf16.msra.mxu3 %v2817_v6 }
 0x185   : > { %1360 = vadd.xlane.f32.xlu2 %v3690_v38  ;;  %v1391_v13 = vmul.f32 %v3690_v38, %v3690_v38 }
 0x187   : > { %1417 = vadd.xlane.f32.xlu1 %v1391_v13 }
 0x18e   : > { %v1178_v37 = vpop.f32.mrf.mxu0  ;;  %v1278_v45 = vpop.f32.mrf.mxu1 }
 0x18f   : > { %v1279_v21 = vadd.f32 %v1278_v45, %v1178_v37 }
 0x191   : > { %v1316_v41 = vadd.f32 %v3568_v39, %v1279_v21 }
 0x193   : > { %v3696_v43 = vmax.f32 %v1316_v41, 0.0 }
 0x195   : > { %1362 = vadd.xlane.f32.xlu2 %v3696_v43  ;;  %v1392_v24 = vmul.f32 %v3696_v43, %v3696_v43 }
 0x196   : > { %v1180_v29 = vpop.f32.mrf.mxu0  ;;  %v1280_v46 = vpop.f32.mrf.mxu1 }
 0x197   : > { %v1281_v28 = vadd.f32 %v1280_v46, %v1180_v29  ;;  %1419 = vadd.xlane.f32.xlu1 %v1392_v24 }
 0x199   : > { %v1317_v51 = vadd.f32 %v3568_v39, %v1281_v28 }
 0x19b   : > { %v3702_v26 = vmax.f32 %v1317_v51, 0.0 }
 0x19d   : > { %1364 = vadd.xlane.f32.xlu0 %v3702_v26  ;;  %v1393_v35 = vmul.f32 %v3702_v26, %v3702_v26 }
 0x19f   : > { %1421 = vadd.xlane.f32.xlu2 %v1393_v35 }
 0x1a0   : > { %v1183_v50 = vpop.f32.mrf.mxu0  ;;  %v1283_v53 = vpop.f32.mrf.mxu1 }
 0x1a1   : > { %v1284_v55 = vadd.f32 %v1283_v53, %v1183_v50 }
 0x1a3   : > { %v1318_v22 = vadd.f32 %v3568_v39, %v1284_v55 }
 0x1a5   : > { %v3714_v36 = vmax.f32 %v1318_v22, 0.0 }
 0x1a7   : > { %1366 = vadd.xlane.f32.xlu1 %v3714_v36  ;;  %v1394_v54 = vmul.f32 %v3714_v36, %v3714_v36 }
 0x1a8   : > { %v1185_v4 = vpop.f32.mrf.mxu0  ;;  %v1285_v56 = vpop.f32.mrf.mxu1 }
 0x1a9   : > { %v1286_v0 = vadd.f32 %v1285_v56, %v1185_v4  ;;  %1423 = vadd.xlane.f32.xlu0 %v1394_v54 }
 0x1ab   : > { %v1319_v61 = vadd.f32 %v3568_v39, %v1286_v0 }
 0x1ad   : > { %v3726_v33 = vmax.f32 %v1319_v61, 0.0  ;;  %v3766_v61 = vld [vmem:[%s4824_s2] sm:$0xff] }
 0x1af   : > { %1368 = vadd.xlane.f32.xlu2 %v3726_v33 }
 0x1b1   : > { %v1347_v57 = vpop.xlane.xlu1 %1346 }
 0x1b2   : > { %v1448_v32 = vmul.f32 %v3732_v49, %v1347_v57 }
 0x1b3   : > { %v1404_v23 = vpop.xlane.xlu0 %1403 }
 0x1b4   : > { %v1486_v47 = vmul.f32 %v1448_v32, %v1448_v32  ;;  %v1467_v9 = vmul.f32 %v3732_v49, %v1404_v23  ;;  %v1752_v62 = vsub.f32 %v3576_v58, %v1448_v32  ;;  %v3769_v58 = vperm.slane %v3766_v61, 5 }
 0x1b6   : > { %v1505_v16 = vsub.f32 %v1467_v9, %v1486_v47  ;;  %v3775_v9 = vperm.slane %v3766_v61, 6 }
 0x1b8   : > { %v1524_v27 = vmax.f32 %v1505_v16, 0.0 }
 0x1b9   : > { %v1349_v8 = vpop.xlane.xlu2 %1348 }
 0x1ba   : > { %v1543_v60 = vadd.f32 1e-05, %v1524_v27  ;;  %v1449_v3 = vmul.f32 %v3732_v49, %v1349_v8 }
 0x1bb   : > { %v1406_v7 = vpop.xlane.xlu1 %1405 }
 0x1bc   : > { %2889 = vrsqrt.f32 %v1543_v60  ;;  %v1487_v18 = vmul.f32 %v1449_v3, %v1449_v3  ;;  %v1468_v59 = vmul.f32 %v3732_v49, %v1406_v7  ;;  %vm1568_vm5 = vweird.f32 %v1543_v60 }
 0x1bd   : > { %v3747_v24 = vpop.f32.mrf.mxu3  ;;  %v1753_v57 = vsub.f32 %v3591_v17, %v1449_v3 }
 0x1be   : > { %v1506_v12 = vsub.f32 %v1468_v59, %v1487_v18 }
 0x1c0   : > { %v1525_v25 = vmax.f32 %v1506_v12, 0.0 }
 0x1c2   : > { %v2890_v34 = vpop.eup %2889  ;;  %v1544_v37 = vadd.f32 1e-05, %v1525_v25 }
 0x1c3   : > { %v1563_v13 = vmul.f32 %v2890_v34, %v1543_v60  ;;  %vm1569_vm1 = vweird.f32 %v2890_v34 }
 0x1c4   : > { %2891 = vrsqrt.f32 %v1544_v37  ;;  %vm1570_vm6 = vmor %vm1568_vm5, %vm1569_vm1  ;;  %vm1578_vm8 = vweird.f32 %v1544_v37 }
 0x1c5   : > { %v1564_v45 = vmul.f32 %v2890_v34, %v1563_v13  ;;  %v3759_v56 = vpop.f32.mrf.mxu3 }
 0x1c7   : > { %v1565_v21 = vmul.f32 0.5, %v1564_v45 }
 0x1c9   : > { %v1351_v41 = vpop.xlane.xlu2 %1350  ;;  %v1566_v29 = vsub.f32 1.5, %v1565_v21 }
 0x1ca   : > { %v3750_v46 = vmul.f32 %v3732_v49, %v1351_v41  ;;  %v2892_v28 = vpop.eup %2891 }
 0x1cb   : > { %v1408_v44 = vpop.xlane.xlu1 %1407  ;;  %v1573_v35 = vmul.f32 %v2892_v28, %v1544_v37  ;;  %v1567_v40 = vmul.f32 %v2890_v34, %v1566_v29  ;;  %vm1579_vm7 = vweird.f32 %v2892_v28 }
 0x1cc   : > { %v1488_v51 = vmul.f32 %v3750_v46, %v3750_v46  ;;  %v1469_v31 = vmul.f32 %v3732_v49, %v1408_v44  ;;  %vm1580_vm9 = vmor %vm1578_vm8, %vm1579_vm7 }
 0x1cd   : > { %v1574_v48 = vmul.f32 %v2892_v28, %v1573_v35  ;;  %v1571_v22 = vsel %vm1570_vm6, %v2890_v34, %v1567_v40 }
 0x1ce   : > { %v1507_v50 = vsub.f32 %v1469_v31, %v1488_v51  ;;  %v1771_v19 = vmul.f32 %v1752_v62, %v1571_v22  ;;  %v3778_v60 = vpop.f32.mrf.mxu0  ;;  %v3780_v18 = vpop.f32.mrf.mxu1 }
 0x1cf   : > { %v1575_v55 = vmul.f32 0.5, %v1574_v48 }
 0x1d0   : > { %v1526_v53 = vmax.f32 %v1507_v50, 0.0  ;;  %v1791_v47 = vmul.f32 %v3769_v58, %v1771_v19 }
 0x1d1   : > { %v1353_v11 = vpop.xlane.xlu0 %1352  ;;  %v1576_v54 = vsub.f32 1.5, %v1575_v55 }
 0x1d2   : > { %v1545_v10 = vadd.f32 1e-05, %v1526_v53  ;;  %v3757_v4 = vmul.f32 %v3732_v49, %v1353_v11  ;;  %v1811_v59 = vadd.f32 %v3775_v9, %v1791_v47 }
 0x1d3   : > { %v1410_v63 = vpop.xlane.xlu2 %1409  ;;  %v1577_v2 = vmul.f32 %v2892_v28, %v1576_v54 }
 0x1d4   : > { %2893 = vrsqrt.f32 %v1545_v10  ;;  %v1489_v0 = vmul.f32 %v3757_v4, %v3757_v4  ;;  %v1470_v30 = vmul.f32 %v3732_v49, %v1410_v63  ;;  %vm1588_vm11 = vweird.f32 %v1545_v10 }
 0x1d5   : > { %v1581_v42 = vsel %vm1580_vm9, %v2892_v28, %v1577_v2 }
 0x1d6   : > { %v1508_v32 = vsub.f32 %v1470_v30, %v1489_v0  ;;  %v1772_v23 = vmul.f32 %v1753_v57, %v1581_v42  ;;  %v3797_v11 = vpop.f32.mrf.mxu0  ;;  %v3799_v22 = vpop.f32.mrf.mxu1  ;;  %v1754_v30 = vsub.f32 %v3630_v14, %v3750_v46 }
 0x1d8   : > { %v1527_v16 = vmax.f32 %v1508_v32, 0.0  ;;  %v1792_v27 = vmul.f32 %v3769_v58, %v1772_v23 }
 0x1da   : > { %v2894_v15 = vpop.eup %2893  ;;  %v1546_v6 = vadd.f32 1e-05, %v1527_v16  ;;  %v1355_v7 = vpop.xlane.xlu0 %1354  ;;  %v1812_v12 = vadd.f32 %v3775_v9, %v1792_v27 }
 0x1db   : > { %v1583_v8 = vmul.f32 %v2894_v15, %v1545_v10  ;;  %v3783_v17 = vmul.f32 %v3732_v49, %v1355_v7  ;;  %vm1589_vm10 = vweird.f32 %v2894_v15 }
 0x1dc   : > { %v3785_v3 = vpop.f32.mrf.mxu3  ;;  %2895 = vrsqrt.f32 %v1546_v6  ;;  %v1412_v34 = vpop.xlane.xlu2 %1411  ;;  %v1830_v45 = vpack.c.bf16 %v1812_v12, %v1811_v59  ;;  %vm1590_vm12 = vmor %vm1588_vm11, %vm1589_vm10  ;;  %vm1598_vm14 = vweird.f32 %v1546_v6 }
 0x1dd   : > { %v1584_v25 = vmul.f32 %v2894_v15, %v1583_v8  ;;  %v1490_v13 = vmul.f32 %v3783_v17, %v3783_v17  ;;  %v1471_v37 = vmul.f32 %v3732_v49, %v1412_v34 }
 0x1de   : > { %1913 = vmatmul.bf16.vlgmr.msra.gmra.mxu2 %v1830_v45 }
 0x1df   : > { %v1585_v21 = vmul.f32 0.5, %v1584_v25  ;;  %v1509_v41 = vsub.f32 %v1471_v37, %v1490_v13 }
 0x1e1   : > { %v1586_v29 = vsub.f32 1.5, %v1585_v21  ;;  %v1528_v44 = vmax.f32 %v1509_v41, 0.0 }
 0x1e2   : > { %v2896_v28 = vpop.eup %2895  ;;  %v1357_v51 = vpop.xlane.xlu1 %1356 }
 0x1e3   : > { %v1593_v31 = vmul.f32 %v2896_v28, %v1546_v6  ;;  %v3792_v35 = vadd.f32 1e-05, %v1528_v44  ;;  %v3795_v40 = vmul.f32 %v3732_v49, %v1357_v51  ;;  %v1587_v53 = vmul.f32 %v2894_v15, %v1586_v29 }
 0x1e4   : > { %v1205_v50 = vpop.f32.mrf.mxu3  ;;  %vm1599_vm13 = vweird.f32 %v2896_v28 }
 0x1e5   : > { %v1414_v48 = vpop.xlane.xlu0 %1413  ;;  %v1594_v55 = vmul.f32 %v2896_v28, %v1593_v31  ;;  %2897 = vrsqrt.f32 %v3792_v35  ;;  %v1491_v62 = vmul.f32 %v3795_v40, %v3795_v40  ;;  %v1591_v19 = vsel %vm1590_vm12, %v2894_v15, %v1587_v53  ;;  %vm1600_vm15 = vmor %vm1598_vm14, %vm1599_vm13 }
 0x1e6   : > { %v1472_v54 = vmul.f32 %v3732_v49, %v1414_v48  ;;  %v1773_v47 = vmul.f32 %v1754_v30, %v1591_v19  ;;  %v1755_v15 = vsub.f32 %v3638_v5, %v3757_v4  ;;  %vm1608_vm3 = vweird.f32 %v3792_v35 }
 0x1e7   : > { %v1595_v63 = vmul.f32 0.5, %v1594_v55 }
 0x1e8   : > { %v1510_v0 = vsub.f32 %v1472_v54, %v1491_v62  ;;  %v1793_v59 = vmul.f32 %v3769_v58, %v1773_v47 }
 0x1e9   : > { %v1596_v2 = vsub.f32 1.5, %v1595_v63 }
 0x1ea   : > { %v1529_v57 = vmax.f32 %v1510_v0, 0.0  ;;  %v1813_v41 = vadd.f32 %v3775_v9, %v1793_v59 }
 0x1eb   : > { %v3807_v32 = vpop.eup %2897  ;;  %v1597_v23 = vmul.f32 %v2896_v28, %v1596_v2 }
 0x1ec   : > { %v1298_v42 = vpop.f32.mrf.mxu3  ;;  %v1603_v10 = vmul.f32 %v3807_v32, %v3792_v35  ;;  %v3811_v16 = vadd.f32 1e-05, %v1529_v57  ;;  %vm1609_vm2 = vweird.f32 %v3807_v32 }
 0x1ed   : > { %v1601_v46 = vsel %vm1600_vm15, %v2896_v28, %v1597_v23  ;;  %v1299_v28 = vadd.f32 %v1298_v42, %v3747_v24  ;;  %vm3838_vm4 = vmor %vm1608_vm3, %vm1609_vm2 }
 0x1ee   : > { %v1193_v27 = vpop.f32.mrf.mxu0  ;;  %v1293_v14 = vpop.f32.mrf.mxu1  ;;  %v1604_v8 = vmul.f32 %v3807_v32, %v1603_v10  ;;  %2899 = vrsqrt.f32 %v3811_v16  ;;  %v1774_v7 = vmul.f32 %v1755_v15, %v1601_v46  ;;  %v1756_v10 = vsub.f32 %v3648_v52, %v3783_v17 }
 0x1ef   : > { %v1294_v6 = vadd.f32 %v1293_v14, %v1193_v27  ;;  %v1324_v30 = vadd.f32 %v3568_v39, %v1299_v28  ;;  %vm1618_vm0 = vweird.f32 %v3811_v16  ;;  %v1395_v28 = vmul.f32 %v3726_v33, %v3726_v33 }
 0x1f0   : > { %v1605_v12 = vmul.f32 0.5, %v1604_v8  ;;  %v1359_v34 = vpop.xlane.xlu1 %1358  ;;  %v1794_v13 = vmul.f32 %v3769_v58, %v1774_v7 }
 0x1f1   : > { %v1322_v25 = vadd.f32 %v3568_v39, %v1294_v6  ;;  %v3821_v5 = vmul.f32 %v3732_v49, %v1359_v34  ;;  %v3858_v6 = vmax.f32 %v1324_v30, 0.0 }
 0x1f2   : > { %v1606_v37 = vsub.f32 1.5, %v1605_v12  ;;  %v1416_v45 = vpop.xlane.xlu0 %1415  ;;  %v1814_v29 = vadd.f32 %v3775_v9, %v1794_v13  ;;  %v1757_v12 = vsub.f32 %v3673_v1, %v3795_v40 }
 0x1f3   : > { %v3823_v4 = vmax.f32 %v1322_v25, 0.0  ;;  %v1492_v51 = vmul.f32 %v3821_v5, %v3821_v5  ;;  %v1473_v31 = vmul.f32 %v3732_v49, %v1416_v45  ;;  %v1289_v45 = vadd.f32 %v3780_v18, %v3778_v60 }
 0x1f4   : > { %v1300_v21 = vpop.f32.mrf.mxu3  ;;  %v2900_v44 = vpop.eup %2899  ;;  %v1831_v48 = vpack.c.bf16 %v1814_v29, %v1813_v41  ;;  %v1607_v24 = vmul.f32 %v3807_v32, %v1606_v37 }
 0x1f5   : > { %v1613_v50 = vmul.f32 %v2900_v44, %v3811_v16  ;;  %1374 = vadd.xlane.f32.xlu0 %v3823_v4  ;;  %v1398_v62 = vmul.f32 %v3823_v4, %v3823_v4  ;;  %v1511_v54 = vsub.f32 %v1473_v31, %v1492_v51  ;;  %v1301_v23 = vadd.f32 %v1300_v21, %v3759_v56 }
 0x1f6   : > { %v1195_v53 = vpop.f32.mrf.mxu0  ;;  %v1295_v55 = vpop.f32.mrf.mxu1  ;;  %1918 = vmatmul.bf16.gmra.mxu2 %v1831_v48  ;;  %v1611_v35 = vsel %vm3838_vm4, %v3807_v32, %v1607_v24  ;;  %vm1619_vm1 = vweird.f32 %v2900_v44  ;;  %v1320_v60 = vadd.f32 %v3568_v39, %v1289_v45 }
 0x1f7   : > { %v1296_v63 = vadd.f32 %v1295_v55, %v1195_v53  ;;  %v1614_v0 = vmul.f32 %v2900_v44, %v1613_v50  ;;  %1431 = vadd.xlane.f32.xlu2 %v1398_v62  ;;  %v1530_v2 = vmax.f32 %v1511_v54, 0.0  ;;  %v1775_v17 = vmul.f32 %v1756_v10, %v1611_v35  ;;  %vm1620_vm5 = vmor %vm1618_vm0, %vm1619_vm1 }
 0x1f8   : > { %v1361_v47 = vpop.xlane.xlu2 %1360  ;;  %v1325_v32 = vadd.f32 %v3568_v39, %v1301_v23  ;;  %v1291_v62 = vadd.f32 %v3799_v22, %v3797_v11 }
 0x1f9   : > { %v1323_v57 = vadd.f32 %v3568_v39, %v1296_v63  ;;  %v1615_v42 = vmul.f32 0.5, %v1614_v0  ;;  %v3850_v15 = vadd.f32 1e-05, %v1530_v2  ;;  %v3855_v14 = vmul.f32 %v3732_v49, %v1361_v47 }
 0x1fa   : > { %v1418_v56 = vpop.xlane.xlu1 %1417  ;;  %v1795_v37 = vmul.f32 %v3769_v58, %v1775_v17  ;;  %v3874_v21 = vmax.f32 %v1325_v32, 0.0  ;;  %v3888_v63 = vmax.f32 %v1320_v60, 0.0  ;;  %v1400_v2 = vmul.f32 %v3858_v6, %v3858_v6 }
 0x1fb   : > { %v3852_v27 = vmax.f32 %v1323_v57, 0.0  ;;  %v1616_v46 = vsub.f32 1.5, %v1615_v42  ;;  %2901 = vrsqrt.f32 %v3850_v15  ;;  %v1493_v52 = vmul.f32 %v3855_v14, %v3855_v14 }
 0x1fc   : > { %v1303_v8 = vpop.f32.mrf.mxu3  ;;  %v1474_v7 = vmul.f32 %v3732_v49, %v1418_v56  ;;  %v1401_v48 = vmul.f32 %v3874_v21, %v3874_v21  ;;  %v1321_v22 = vadd.f32 %v3568_v39, %v1291_v62  ;;  %v1396_v10 = vmul.f32 %v3888_v63, %v3888_v63 }
 0x1fd   : > { %1376 = vadd.xlane.f32.xlu1 %v3852_v27  ;;  %v1399_v16 = vmul.f32 %v3852_v27, %v3852_v27  ;;  %v1617_v59 = vmul.f32 %v2900_v44, %v1616_v46  ;;  %v1304_v0 = vadd.f32 %v1303_v8, %v3785_v3  ;;  %vm1628_vm7 = vweird.f32 %v3850_v15 }
 0x1fe   : > { %v1512_v25 = vsub.f32 %v1474_v7, %v1493_v52  ;;  %v3909_v52 = vmax.f32 %v1321_v22, 0.0  ;;  %v1758_v7 = vsub.f32 %v3684_v20, %v3821_v5  ;;  %v1759_v20 = vsub.f32 %v3690_v38, %v3855_v14 }
 0x1ff   : > { %1433 = vadd.xlane.f32.xlu0 %v1399_v16  ;;  %1378 = vadd.xlane.f32.xlu2 %v3858_v6  ;;  %v1621_v34 = vsel %vm1620_vm5, %v2900_v44, %v1617_v59  ;;  %v1815_v44 = vadd.f32 %v3775_v9, %v1795_v37  ;;  %v1326_v3 = vadd.f32 %v3568_v39, %v1304_v0 }
 0x200   : > { %v1776_v13 = vmul.f32 %v1757_v12, %v1621_v34  ;;  %v1531_v41 = vmax.f32 %v1512_v25, 0.0  ;;  %v1397_v5 = vmul.f32 %v3909_v52, %v3909_v52 }
 0x201   : > { %v2902_v29 = vpop.eup %2901 }
 0x202   : > { %v1796_v1 = vmul.f32 %v3769_v58, %v1776_v13  ;;  %v1623_v40 = vmul.f32 %v2902_v29, %v3850_v15  ;;  %v1550_v51 = vadd.f32 1e-05, %v1531_v41  ;;  %vm1629_vm6 = vweird.f32 %v2902_v29 }
 0x203   : > { %vm3904_vm8 = vmor %vm1628_vm7, %vm1629_vm6  ;;  %v3915_v15 = vmax.f32 %v1326_v3, 0.0 }
 0x204   : > { %v1305_v31 = vpop.f32.mrf.mxu3  ;;  %v1816_v50 = vadd.f32 %v3775_v9, %v1796_v1  ;;  %v1624_v18 = vmul.f32 %v2902_v29, %v1623_v40  ;;  %2903 = vrsqrt.f32 %v1550_v51  ;;  %vm1638_vm10 = vweird.f32 %v1550_v51 }
 0x205   : > { %1425 = vadd.xlane.f32.xlu1 %v1395_v28  ;;  %v1402_v41 = vmul.f32 %v3915_v15, %v3915_v15 }
 0x206   : > { %v1832_v53 = vpack.c.bf16 %v1816_v50, %v1815_v44  ;;  %v1625_v55 = vmul.f32 0.5, %v1624_v18 }
 0x207   : > { %1380 = vadd.xlane.f32.xlu0 %v3874_v21  ;;  %1437 = vadd.xlane.f32.xlu2 %v1401_v48 }
 0x208   : > { %1923 = vmatmul.bf16.gmra.mxu2 %v1832_v53  ;;  %v1363_v54 = vpop.xlane.xlu2 %1362  ;;  %v1626_v24 = vsub.f32 1.5, %v1625_v55 }
 0x209   : > { %v3892_v19 = vmul.f32 %v3732_v49, %v1363_v54 }
 0x20a   : > { %v1420_v30 = vpop.xlane.xlu1 %1419  ;;  %v2904_v57 = vpop.eup %2903  ;;  %v1627_v47 = vmul.f32 %v2902_v29, %v1626_v24 }
 0x20b   : > { %v1494_v42 = vmul.f32 %v3892_v19, %v3892_v19  ;;  %v1475_v11 = vmul.f32 %v3732_v49, %v1420_v30  ;;  %v1633_v23 = vmul.f32 %v2904_v57, %v1550_v51  ;;  %vm1639_vm9 = vweird.f32 %v2904_v57 }
 0x20c   : > { %v1631_v39 = vsel %vm3904_vm8, %v2902_v29, %v1627_v47  ;;  %vm1640_vm11 = vmor %vm1638_vm10, %vm1639_vm9 }
 0x20d   : > { %1435 = vadd.xlane.f32.xlu1 %v1400_v2  ;;  %v1513_v35 = vsub.f32 %v1475_v11, %v1494_v42  ;;  %v1634_v46 = vmul.f32 %v2904_v57, %v1633_v23  ;;  %v1777_v13 = vmul.f32 %v1758_v7, %v1631_v39  ;;  %v3945_v7 = vperm.slane %v3766_v61, 7 }
 0x20f   : > { %v1532_v8 = vmax.f32 %v1513_v35, 0.0  ;;  %1370 = vadd.xlane.f32.xlu0 %v3888_v63  ;;  %1427 = vadd.xlane.f32.xlu2 %v1396_v10  ;;  %v1635_v17 = vmul.f32 0.5, %v1634_v46  ;;  %v1797_v40 = vmul.f32 %v3769_v58, %v1777_v13 }
 0x210   : > { %v1365_v32 = vpop.xlane.xlu0 %1364 }
 0x211   : > { %v1551_v16 = vadd.f32 1e-05, %v1532_v8  ;;  %v1457_v59 = vmul.f32 %v3732_v49, %v1365_v32  ;;  %v1636_v12 = vsub.f32 1.5, %v1635_v17  ;;  %v1817_v14 = vadd.f32 %v3775_v9, %v1797_v40 }
 0x212   : > { %v1422_v25 = vpop.xlane.xlu2 %1421 }
 0x213   : > { %2905 = vrsqrt.f32 %v1551_v16  ;;  %v1495_v34 = vmul.f32 %v1457_v59, %v1457_v59  ;;  %v1476_v37 = vmul.f32 %v3732_v49, %v1422_v25  ;;  %v1637_v45 = vmul.f32 %v2904_v57, %v1636_v12 }
 0x214   : > { %vm1648_vm13 = vweird.f32 %v1551_v16  ;;  %v1761_v23 = vsub.f32 %v3702_v26, %v1457_v59 }
 0x215   : > { %1372 = vadd.xlane.f32.xlu1 %v3909_v52  ;;  %v1514_v29 = vsub.f32 %v1476_v37, %v1495_v34  ;;  %v1641_v28 = vsel %vm1640_vm11, %v2904_v57, %v1637_v45  ;;  %v1760_v57 = vsub.f32 %v3696_v43, %v3892_v19 }
 0x216   : > { %v1778_v1 = vmul.f32 %v1759_v20, %v1641_v28 }
 0x217   : > { %1429 = vadd.xlane.f32.xlu0 %v1397_v5  ;;  %1439 = vadd.xlane.f32.xlu2 %v1402_v41  ;;  %v1533_v51 = vmax.f32 %v1514_v29, 0.0 }
 0x218   : > { %v1798_v44 = vmul.f32 %v3769_v58, %v1778_v1 }
 0x219   : > { %v2906_v31 = vpop.eup %2905  ;;  %v1552_v38 = vadd.f32 1e-05, %v1533_v51 }
 0x21a   : > { %v1643_v50 = vmul.f32 %v2906_v31, %v1551_v16  ;;  %v1818_v60 = vadd.f32 %v3775_v9, %v1798_v44  ;;  %vm1649_vm12 = vweird.f32 %v2906_v31  ;;  %v1367_v43 = vpop.xlane.xlu1 %1366 }
 0x21b   : > { %2907 = vrsqrt.f32 %v1552_v38  ;;  %vm1650_vm14 = vmor %vm1648_vm13, %vm1649_vm12  ;;  %vm1658_vm2 = vweird.f32 %v1552_v38  ;;  %v3939_v19 = vmul.f32 %v3732_v49, %v1367_v43 }
 0x21c   : > { %v1644_v18 = vmul.f32 %v2906_v31, %v1643_v50  ;;  %v1833_v48 = vpack.c.bf16 %v1818_v60, %v1817_v14  ;;  %v1424_v17 = vpop.xlane.xlu0 %1423 }
 0x21d   : > { %1382 = vadd.xlane.f32.xlu1 %v3915_v15  ;;  %v1496_v26 = vmul.f32 %v3939_v19, %v3939_v19  ;;  %v1477_v32 = vmul.f32 %v3732_v49, %v1424_v17 }
 0x21e   : > { %v1645_v53 = vmul.f32 0.5, %v1644_v18  ;;  %1928 = vmatmul.bf16.gmra.mxu2 %v1833_v48 }
 0x21f   : > { %v1515_v39 = vsub.f32 %v1477_v32, %v1496_v26 }
 0x220   : > { %v1646_v55 = vsub.f32 1.5, %v1645_v53 }
 0x221   : > { %v2908_v62 = vpop.eup %2907  ;;  %v1534_v16 = vmax.f32 %v1515_v39, 0.0 }
 0x222   : > { %v1653_v54 = vmul.f32 %v2908_v62, %v1552_v38  ;;  %v1647_v24 = vmul.f32 %v2906_v31, %v1646_v55  ;;  %vm1659_vm15 = vweird.f32 %v2908_v62  ;;  %v1369_v59 = vpop.xlane.xlu2 %1368 }
 0x223   : > { %vm1660_vm3 = vmor %vm1658_vm2, %vm1659_vm15  ;;  %v3948_v34 = vadd.f32 1e-05, %v1534_v16 }
 0x224   : > { %v1654_v0 = vmul.f32 %v2908_v62, %v1653_v54  ;;  %v1651_v2 = vsel %vm1650_vm14, %v2906_v31, %v1647_v24 }
 0x225   : > { %v1779_v11 = vmul.f32 %v1760_v57, %v1651_v2  ;;  %2909 = vrsqrt.f32 %v3948_v34  ;;  %vm1668_vm5 = vweird.f32 %v3948_v34 }
 0x226   : > { %v1655_v30 = vmul.f32 0.5, %v1654_v0 }
 0x227   : > { %v1799_v35 = vmul.f32 %v3769_v58, %v1779_v11 }
 0x228   : > { %v1656_v42 = vsub.f32 1.5, %v1655_v30 }
 0x229   : > { %v1819_v46 = vadd.f32 %v3775_v9, %v1799_v35 }
 0x22a   : > { %v1657_v22 = vmul.f32 %v2908_v62, %v1656_v42 }
 0x22b   : > { %v3965_v51 = vpop.eup %2909 }
 0x22c   : > { %v1661_v47 = vsel %vm1660_vm3, %v2908_v62, %v1657_v22  ;;  %v1663_v14 = vmul.f32 %v3965_v51, %v3948_v34  ;;  %v3979_v62 = vmul.f32 %v3732_v49, %v1369_v59  ;;  %vm1669_vm0 = vweird.f32 %v3965_v51 }
 0x22d   : > { %v1780_v3 = vmul.f32 %v1761_v23, %v1661_v47  ;;  %vm4026_vm7 = vmor %vm1668_vm5, %vm1669_vm0 }
 0x22e   : > { %v1664_v54 = vmul.f32 %v3965_v51, %v1663_v14  ;;  %v1497_v2 = vmul.f32 %v3979_v62, %v3979_v62  ;;  %v1762_v14 = vsub.f32 %v3714_v36, %v3939_v19 }
 0x22f   : > { %v1800_v10 = vmul.f32 %v3769_v58, %v1780_v3 }
 0x230   : > { %v1665_v11 = vmul.f32 0.5, %v1664_v54 }
 0x231   : > { %v1820_v56 = vadd.f32 %v3775_v9, %v1800_v10 }
 0x232   : > { %v1666_v17 = vsub.f32 1.5, %v1665_v11 }
 0x233   : > { %v1834_v8 = vpack.c.bf16 %v1820_v56, %v1819_v46 }
 0x235   : > { %1933 = vmatmul.bf16.gmra.mxu2 %v1834_v8 }
 0x261   : > { %v1914_v12 = vpop.f32.mrf.mxu2 }
 0x262   : > { %v1915_v25 = vadd.f32 %v1914_v12, %v3945_v7 }
 0x264   : > { %v3950_v13 = vmax.f32 %v1915_v25, 0.0 }
 0x266   : > { %1982 = vadd.xlane.f32.xlu0 %v3950_v13  ;;  %v2020_v37 = vmul.f32 %v3950_v13, %v3950_v13 }
 0x268   : > { %v1375_v45 = vpop.xlane.xlu0 %1374  ;;  %2039 = vadd.xlane.f32.xlu1 %v2020_v37 }
 0x269   : > { %v3957_v61 = vmul.f32 %v3732_v49, %v1375_v45  ;;  %v1916_v20 = vpop.f32.mrf.mxu2 }
 0x26a   : > { %v1432_v5 = vpop.xlane.xlu2 %1431  ;;  %v1917_v41 = vadd.f32 %v1916_v20, %v3945_v7 }
 0x26b   : > { %v1500_v29 = vmul.f32 %v3957_v61, %v3957_v61  ;;  %v1481_v28 = vmul.f32 %v3732_v49, %v1432_v5 }
 0x26c   : > { %v3963_v1 = vmax.f32 %v1917_v41, 0.0 }
 0x26d   : > { %v1519_v40 = vsub.f32 %v1481_v28, %v1500_v29  ;;  %v1667_v28 = vmul.f32 %v3965_v51, %v1666_v17 }
 0x26e   : > { %v2021_v44 = vmul.f32 %v3963_v1, %v3963_v1 }
 0x26f   : > { %v1538_v31 = vmax.f32 %v1519_v40, 0.0 }
 0x270   : > { %v1377_v50 = vpop.xlane.xlu1 %1376  ;;  %2041 = vadd.xlane.f32.xlu2 %v2021_v44  ;;  %1984 = vadd.xlane.f32.xlu1 %v3963_v1 }
 0x271   : > { %v3970_v38 = vmul.f32 %v3732_v49, %v1377_v50  ;;  %v1557_v60 = vadd.f32 1e-05, %v1538_v31 }
 0x272   : > { %v1379_v48 = vpop.xlane.xlu2 %1378  ;;  %v1434_v53 = vpop.xlane.xlu0 %1433 }
 0x273   : > { %v1501_v18 = vmul.f32 %v3970_v38, %v3970_v38  ;;  %2911 = vrsqrt.f32 %v1557_v60  ;;  %v1482_v55 = vmul.f32 %v3732_v49, %v1434_v53  ;;  %v3993_v26 = vmul.f32 %v3732_v49, %v1379_v48 }
 0x274   : > { %vm1708_vm1 = vweird.f32 %v1557_v60 }
 0x275   : > { %v1520_v24 = vsub.f32 %v1482_v55, %v1501_v18  ;;  %v1502_v41 = vmul.f32 %v3993_v26, %v3993_v26 }
 0x277   : > { %v1539_v0 = vmax.f32 %v1520_v24, 0.0 }
 0x278   : > { %v1426_v30 = vpop.xlane.xlu1 %1425 }
 0x279   : > { %v1478_v57 = vmul.f32 %v3732_v49, %v1426_v30  ;;  %v2912_v42 = vpop.eup %2911  ;;  %v3985_v22 = vadd.f32 1e-05, %v1539_v0  ;;  %v1919_v3 = vpop.f32.mrf.mxu2  ;;  %v1766_v0 = vsub.f32 %v3823_v4, %v3957_v61 }
 0x27a   : > { %v1703_v23 = vmul.f32 %v2912_v42, %v1557_v60  ;;  %v1438_v35 = vpop.xlane.xlu2 %1437  ;;  %v1920_v10 = vadd.f32 %v1919_v3, %v3945_v7  ;;  %v1381_v46 = vpop.xlane.xlu0 %1380  ;;  %vm1709_vm4 = vweird.f32 %v2912_v42 }
 0x27b   : > { %v1516_v47 = vsub.f32 %v1478_v57, %v1497_v2  ;;  %2913 = vrsqrt.f32 %v3985_v22  ;;  %v3990_v43 = vmul.f32 %v3732_v49, %v1381_v46  ;;  %v1484_v59 = vmul.f32 %v3732_v49, %v1438_v35  ;;  %vm4019_vm6 = vmor %vm1708_vm1, %vm1709_vm4 }
 0x27c   : > { %v1704_v56 = vmul.f32 %v2912_v42, %v1703_v23  ;;  %v3995_v32 = vmax.f32 %v1920_v10, 0.0  ;;  %v1671_v57 = vsel %vm4026_vm7, %v3965_v51, %v1667_v28  ;;  %vm1718_vm9 = vweird.f32 %v3985_v22 }
 0x27d   : > { %v1535_v8 = vmax.f32 %v1516_v47, 0.0  ;;  %v1503_v12 = vmul.f32 %v3990_v43, %v3990_v43  ;;  %v1781_v17 = vmul.f32 %v1762_v14, %v1671_v57 }
 0x27e   : > { %v1705_v39 = vmul.f32 0.5, %v1704_v56  ;;  %1986 = vadd.xlane.f32.xlu2 %v3995_v32  ;;  %v2022_v25 = vmul.f32 %v3995_v32, %v3995_v32 }
 0x27f   : > { %v3997_v16 = vadd.f32 1e-05, %v1535_v8  ;;  %v1522_v20 = vsub.f32 %v1484_v59, %v1503_v12 }
 0x280   : > { %v1436_v37 = vpop.xlane.xlu1 %1435  ;;  %v1706_v45 = vsub.f32 1.5, %v1705_v39  ;;  %2043 = vadd.xlane.f32.xlu0 %v2022_v25  ;;  %v1763_v25 = vsub.f32 %v3726_v33, %v3979_v62 }
 0x281   : > { %2915 = vrsqrt.f32 %v3997_v16  ;;  %v4006_v5 = vpop.eup %2913  ;;  %v1483_v29 = vmul.f32 %v3732_v49, %v1436_v37  ;;  %v1541_v44 = vmax.f32 %v1522_v20, 0.0  ;;  %v1921_v50 = vpop.f32.mrf.mxu2  ;;  %v1767_v37 = vsub.f32 %v3852_v27, %v3970_v38 }
 0x282   : > { %v1707_v40 = vmul.f32 %v2912_v42, %v1706_v45  ;;  %v1713_v31 = vmul.f32 %v4006_v5, %v3985_v22  ;;  %v1922_v53 = vadd.f32 %v1921_v50, %v3945_v7  ;;  %v1428_v55 = vpop.xlane.xlu2 %1427  ;;  %v1371_v60 = vpop.xlane.xlu0 %1370  ;;  %vm1719_vm8 = vweird.f32 %v4006_v5 }
 0x283   : > { %v1521_v48 = vsub.f32 %v1483_v29, %v1502_v41  ;;  %v4033_v34 = vadd.f32 1e-05, %v1541_v44  ;;  %v4036_v24 = vmul.f32 %v3732_v49, %v1371_v60  ;;  %v1479_v23 = vmul.f32 %v3732_v49, %v1428_v55  ;;  %vm1720_vm10 = vmor %vm1718_vm9, %vm1719_vm8 }
 0x284   : > { %v1711_v36 = vsel %vm4019_vm6, %v2912_v42, %v1707_v40  ;;  %v1714_v19 = vmul.f32 %v4006_v5, %v1713_v31  ;;  %v4040_v2 = vmax.f32 %v1922_v53, 0.0  ;;  %vm1678_vm12 = vweird.f32 %v3997_v16 }
 0x285   : > { %v1540_v30 = vmax.f32 %v1521_v48, 0.0  ;;  %2917 = vrsqrt.f32 %v4033_v34  ;;  %v1498_v47 = vmul.f32 %v4036_v24, %v4036_v24  ;;  %v1785_v3 = vmul.f32 %v1766_v0, %v1711_v36 }
 0x286   : > { %v1715_v42 = vmul.f32 0.5, %v1714_v19  ;;  %v2023_v46 = vmul.f32 %v4040_v2, %v4040_v2  ;;  %vm1738_vm15 = vweird.f32 %v4033_v34 }
 0x287   : > { %v4045_v11 = vpop.eup %2915  ;;  %v4054_v61 = vadd.f32 1e-05, %v1540_v30  ;;  %v1517_v10 = vsub.f32 %v1479_v23, %v1498_v47  ;;  %v1805_v29 = vmul.f32 %v3769_v58, %v1785_v3 }
 0x288   : > { %v1673_v4 = vmul.f32 %v4045_v11, %v3997_v16  ;;  %v1373_v35 = vpop.xlane.xlu1 %1372  ;;  %v1716_v51 = vsub.f32 1.5, %v1715_v42  ;;  %1988 = vadd.xlane.f32.xlu0 %v4040_v2  ;;  %2045 = vadd.xlane.f32.xlu1 %v2023_v46  ;;  %vm1679_vm11 = vweird.f32 %v4045_v11 }
 0x289   : > { %v4059_v56 = vmul.f32 %v3732_v49, %v1373_v35  ;;  %2919 = vrsqrt.f32 %v4054_v61  ;;  %v1536_v59 = vmax.f32 %v1517_v10, 0.0  ;;  %vm4095_vm13 = vmor %vm1678_vm12, %vm1679_vm11  ;;  %v1825_v16 = vadd.f32 %v3775_v9, %v1805_v29 }
 0x28a   : > { %v1674_v8 = vmul.f32 %v4045_v11, %v1673_v4  ;;  %v1717_v39 = vmul.f32 %v4006_v5, %v1716_v51  ;;  %v1430_v41 = vpop.xlane.xlu0 %1429  ;;  %v1440_v48 = vpop.xlane.xlu2 %1439  ;;  %vm1728_vm4 = vweird.f32 %v4054_v61 }
 0x28b   : > { %v1499_v12 = vmul.f32 %v4059_v56, %v4059_v56  ;;  %v1924_v20 = vpop.f32.mrf.mxu2  ;;  %v4075_v22 = vpop.eup %2917  ;;  %v4078_v40 = vadd.f32 1e-05, %v1536_v59  ;;  %v1480_v33 = vmul.f32 %v3732_v49, %v1430_v41  ;;  %v1485_v3 = vmul.f32 %v3732_v49, %v1440_v48 }
 0x28c   : > { %v1675_v45 = vmul.f32 0.5, %v1674_v8  ;;  %v1721_v28 = vsel %vm1720_vm10, %v4006_v5, %v1717_v39  ;;  %v1925_v31 = vadd.f32 %v1924_v20, %v3945_v7  ;;  %v1733_v38 = vmul.f32 %v4075_v22, %v4033_v34 }
 0x28d   : > { %v1786_v62 = vmul.f32 %v1767_v37, %v1721_v28  ;;  %2921 = vrsqrt.f32 %v4078_v40  ;;  %v1518_v50 = vsub.f32 %v1480_v33, %v1499_v12  ;;  %v1801_v5 = vmul.f32 %v3769_v58, %v1781_v17 }
 0x28e   : > { %v1676_v27 = vsub.f32 1.5, %v1675_v45  ;;  %v4086_v44 = vmax.f32 %v1925_v31, 0.0  ;;  %v1734_v18 = vmul.f32 %v4075_v22, %v1733_v38  ;;  %vm1739_vm14 = vweird.f32 %v4075_v22 }
 0x28f   : > { %v4089_v14 = vpop.eup %2919  ;;  %v1806_v55 = vmul.f32 %v3769_v58, %v1786_v62  ;;  %v1537_v19 = vmax.f32 %v1518_v50, 0.0  ;;  %v1821_v59 = vadd.f32 %v3775_v9, %v1801_v5  ;;  %vm1740_vm2 = vmor %vm1738_vm15, %vm1739_vm14  ;;  %v1769_v28 = vsub.f32 %v3874_v21, %v3990_v43 }
 0x290   : > { %v1383_v53 = vpop.xlane.xlu1 %1382  ;;  %v1677_v60 = vmul.f32 %v4045_v11, %v1676_v27  ;;  %v1723_v36 = vmul.f32 %v4089_v14, %v4054_v61  ;;  %v1735_v30 = vmul.f32 0.5, %v1734_v18  ;;  %v2024_v57 = vmul.f32 %v4086_v44, %v4086_v44  ;;  %1990 = vadd.xlane.f32.xlu1 %v4086_v44 }
 0x291   : > { %v4102_v0 = vmul.f32 %v3732_v49, %v1383_v53  ;;  %v1826_v42 = vadd.f32 %v3775_v9, %v1806_v55  ;;  %v4113_v4 = vadd.f32 1e-05, %v1537_v19  ;;  %vm1729_vm3 = vweird.f32 %v4089_v14 }
 0x292   : > { %v1681_v23 = vsel %vm4095_vm13, %v4045_v11, %v1677_v60  ;;  %v1724_v47 = vmul.f32 %v4089_v14, %v1723_v36  ;;  %v1736_v51 = vsub.f32 1.5, %v1735_v30  ;;  %2047 = vadd.xlane.f32.xlu2 %v2024_v57  ;;  %v1768_v38 = vsub.f32 %v3858_v6, %v3993_v26  ;;  %vm1730_vm0 = vmor %vm1728_vm4, %vm1729_vm3 }
 0x293   : > { %v1504_v35 = vmul.f32 %v4102_v0, %v4102_v0  ;;  %v1926_v10 = vpop.f32.mrf.mxu2  ;;  %v1837_v46 = vpack.c.bf16 %v1826_v42, %v1825_v16  ;;  %v1782_v8 = vmul.f32 %v1763_v25, %v1681_v23  ;;  %v2922_v17 = vpop.eup %2921  ;;  %2923 = vrsqrt.f32 %v4113_v4 }
 0x294   : > { %v1725_v11 = vmul.f32 0.5, %v1724_v47  ;;  %v1737_v12 = vmul.f32 %v4075_v22, %v1736_v51  ;;  %v1683_v37 = vmul.f32 %v2922_v17, %v4078_v40  ;;  %v1927_v45 = vadd.f32 %v1926_v10, %v3945_v7 }
 0x295   : > { %v1523_v39 = vsub.f32 %v1485_v3, %v1504_v35  ;;  %1948 = vmatmul.bf16.vlgmr.msra.gmra.mxu3 %v1837_v46  ;;  %v1802_v41 = vmul.f32 %v3769_v58, %v1782_v8  ;;  %vm1689_vm1 = vweird.f32 %v2922_v17  ;;  %vm1688_vm5 = vweird.f32 %v4078_v40 }
 0x296   : > { %v1726_v25 = vsub.f32 1.5, %v1725_v11  ;;  %v1741_v29 = vsel %vm1740_vm2, %v4075_v22, %v1737_v12  ;;  %v1684_v34 = vmul.f32 %v2922_v17, %v1683_v37  ;;  %v4132_v31 = vmax.f32 %v1927_v45, 0.0  ;;  %vm1690_vm6 = vmor %vm1688_vm5, %vm1689_vm1 }
 0x297   : > { %v1542_v20 = vmax.f32 %v1523_v39, 0.0  ;;  %v1822_v62 = vadd.f32 %v3775_v9, %v1802_v41  ;;  %v1788_v50 = vmul.f32 %v1769_v28, %v1741_v29  ;;  %v1764_v16 = vsub.f32 %v3888_v63, %v4036_v24 }
 0x298   : > { %v1727_v27 = vmul.f32 %v4089_v14, %v1726_v25  ;;  %v1685_v5 = vmul.f32 0.5, %v1684_v34  ;;  %v2025_v22 = vmul.f32 %v4132_v31, %v4132_v31  ;;  %vm1698_vm8 = vweird.f32 %v4113_v4 }
 0x299   : > { %v1561_v33 = vadd.f32 1e-05, %v1542_v20  ;;  %v2924_v21 = vpop.eup %2923  ;;  %v1835_v43 = vpack.c.bf16 %v1822_v62, %v1821_v59  ;;  %v1808_v60 = vmul.f32 %v3769_v58, %v1788_v50  ;;  %v1765_v10 = vsub.f32 %v3909_v52, %v4059_v56 }
 0x29a   : > { %v1731_v18 = vsel %vm1730_vm0, %v4089_v14, %v1727_v27  ;;  %v1686_v61 = vsub.f32 1.5, %v1685_v5  ;;  %v1693_v48 = vmul.f32 %v2924_v21, %v4113_v4  ;;  %2049 = vadd.xlane.f32.xlu0 %v2025_v22  ;;  %1992 = vadd.xlane.f32.xlu2 %v4132_v31  ;;  %vm1699_vm7 = vweird.f32 %v2924_v21 }
 0x29b   : > { %2925 = vrsqrt.f32 %v1561_v33  ;;  %v1787_v53 = vmul.f32 %v1768_v38, %v1731_v18  ;;  %1938 = vmatmul.bf16.gmra.mxu2 %v1835_v43  ;;  %v1828_v40 = vadd.f32 %v3775_v9, %v1808_v60  ;;  %vm1700_vm9 = vmor %vm1698_vm8, %vm1699_vm7  ;;  %vm1748_vm11 = vweird.f32 %v1561_v33 }
 0x29c   : > { %v1687_v6 = vmul.f32 %v2922_v17, %v1686_v61  ;;  %v1694_v26 = vmul.f32 %v2924_v21, %v1693_v48  ;;  %v1770_v52 = vsub.f32 %v3915_v15, %v4102_v0 }
 0x29d   : > { %v1807_v55 = vmul.f32 %v3769_v58, %v1787_v53 }
 0x29e   : > { %v1691_v54 = vsel %vm1690_vm6, %v2922_v17, %v1687_v6  ;;  %v1695_v14 = vmul.f32 0.5, %v1694_v26 }
 0x29f   : > { %v1827_v36 = vadd.f32 %v3775_v9, %v1807_v55  ;;  %v1783_v42 = vmul.f32 %v1764_v16, %v1691_v54 }
 0x2a0   : > { %v1696_v30 = vsub.f32 1.5, %v1695_v14 }
 0x2a1   : > { %v2926_v19 = vpop.eup %2925  ;;  %v1929_v23 = vpop.f32.mrf.mxu2  ;;  %v1838_v35 = vpack.c.bf16 %v1828_v40, %v1827_v36  ;;  %v1803_v17 = vmul.f32 %v3769_v58, %v1783_v42 }
 0x2a2   : > { %v1743_v57 = vmul.f32 %v2926_v19, %v1561_v33  ;;  %v1930_v3 = vadd.f32 %v1929_v23, %v3945_v7  ;;  %v1697_v51 = vmul.f32 %v2924_v21, %v1696_v30  ;;  %vm1749_vm10 = vweird.f32 %v2926_v19 }
 0x2a3   : > { %vm1750_vm12 = vmor %vm1748_vm11, %vm1749_vm10  ;;  %v1823_v12 = vadd.f32 %v3775_v9, %v1803_v17 }
 0x2a4   : > { %v1744_v47 = vmul.f32 %v2926_v19, %v1743_v57  ;;  %v4155_v63 = vmax.f32 %v1930_v3, 0.0  ;;  %v1701_v24 = vsel %vm1700_vm9, %v2924_v21, %v1697_v51 }
 0x2a5   : > { %1953 = vmatmul.bf16.gmra.mxu3 %v1838_v35  ;;  %v1784_v8 = vmul.f32 %v1765_v10, %v1701_v24 }
 0x2a6   : > { %v1745_v46 = vmul.f32 0.5, %v1744_v47  ;;  %1994 = vadd.xlane.f32.xlu0 %v4155_v63  ;;  %v2026_v4 = vmul.f32 %v4155_v63, %v4155_v63 }
 0x2a7   : > { %v1804_v39 = vmul.f32 %v3769_v58, %v1784_v8 }
 0x2a8   : > { %v1746_v11 = vsub.f32 1.5, %v1745_v46  ;;  %2051 = vadd.xlane.f32.xlu1 %v2026_v4 }
 0x2a9   : > { %v1931_v56 = vpop.f32.mrf.mxu2  ;;  %v1824_v37 = vadd.f32 %v3775_v9, %v1804_v39 }
 0x2aa   : > { %v1747_v59 = vmul.f32 %v2926_v19, %v1746_v11  ;;  %v1932_v25 = vadd.f32 %v1931_v56, %v3945_v7 }
 0x2ab   : > { %v1836_v41 = vpack.c.bf16 %v1824_v37, %v1823_v12 }
 0x2ac   : > { %v1751_v45 = vsel %vm1750_vm12, %v2926_v19, %v1747_v59  ;;  %v4167_v29 = vmax.f32 %v1932_v25, 0.0 }
 0x2ad   : > { %v1789_v20 = vmul.f32 %v1770_v52, %v1751_v45  ;;  %1943 = vmatmul.bf16.gmra.mxu2 %v1836_v41 }
 0x2ae   : > { %v2027_v34 = vmul.f32 %v4167_v29, %v4167_v29 }
 0x2af   : > { %v1809_v28 = vmul.f32 %v3769_v58, %v1789_v20 }
 0x2b0   : > { %2053 = vadd.xlane.f32.xlu2 %v2027_v34  ;;  %1996 = vadd.xlane.f32.xlu1 %v4167_v29 }
 0x2b1   : > { %v1829_v15 = vadd.f32 %v3775_v9, %v1809_v28 }
 0x2b3   : > { %v1839_v0 = vpack.c.bf16 %v1829_v15, %v1829_v15 }
 0x2b5   : > { %1958 = vmatmul.bf16.gmra.mxu3 %v1839_v0 }
 0x2b8   : > { %v1934_v33 = vpop.f32.mrf.mxu2 }
 0x2b9   : > { %v1935_v62 = vadd.f32 %v1934_v33, %v3945_v7 }
 0x2bb   : > { %v4175_v27 = vmax.f32 %v1935_v62, 0.0 }
 0x2bd   : > { %1998 = vadd.xlane.f32.xlu2 %v4175_v27  ;;  %v2028_v58 = vmul.f32 %v4175_v27, %v4175_v27 }
 0x2bf   : > { %2055 = vadd.xlane.f32.xlu0 %v2028_v58 }
 0x2c0   : > { %v1936_v38 = vpop.f32.mrf.mxu2 }
 0x2c1   : > { %v1937_v50 = vadd.f32 %v1936_v38, %v3945_v7 }
 0x2c3   : > { %v4181_v9 = vmax.f32 %v1937_v50, 0.0 }
 0x2c5   : > { %v2029_v5 = vmul.f32 %v4181_v9, %v4181_v9 }
 0x2c7   : > { %2057 = vadd.xlane.f32.xlu1 %v2029_v5  ;;  %2000 = vadd.xlane.f32.xlu0 %v4181_v9 }
 0x2d9   : > { %v1983_v21 = vpop.xlane.xlu0 %1982 }
 0x2da   : > { %v4187_v48 = vmul.f32 %v1983_v21, %v3732_v49 }
 0x2db   : > { %v2040_v22 = vpop.xlane.xlu1 %2039 }
 0x2dc   : > { %v2115_v26 = vmul.f32 %v4187_v48, %v4187_v48  ;;  %v2096_v55 = vmul.f32 %v2040_v22, %v3732_v49 }
 0x2de   : > { %v2134_v30 = vsub.f32 %v2096_v55, %v2115_v26 }
 0x2e0   : > { %v2153_v3 = vmax.f32 %v2134_v30, 0.0 }
 0x2e2   : > { %v4215_v39 = vadd.f32 1e-05, %v2153_v3 }
 0x2e3   : > { %v1985_v43 = vpop.xlane.xlu1 %1984  ;;  %v2042_v18 = vpop.xlane.xlu2 %2041 }
 0x2e4   : > { %v4190_v53 = vmul.f32 %v1985_v43, %v3732_v49  ;;  %v2097_v57 = vmul.f32 %v2042_v18, %v3732_v49  ;;  %2927 = vrsqrt.f32 %v4215_v39  ;;  %vm2197_vm13 = vweird.f32 %v4215_v39 }
 0x2e6   : > { %v2116_v14 = vmul.f32 %v4190_v53, %v4190_v53 }
 0x2e8   : > { %v2135_v42 = vsub.f32 %v2097_v57, %v2116_v14 }
 0x2ea   : > { %v2154_v10 = vmax.f32 %v2135_v42, 0.0  ;;  %v4241_v50 = vpop.eup %2927 }
 0x2eb   : > { %vm2198_vm14 = vweird.f32 %v4241_v50 }
 0x2ec   : > { %v4219_v52 = vadd.f32 1e-05, %v2154_v10  ;;  %vm4339_vm2 = vmor %vm2197_vm13, %vm2198_vm14 }
 0x2ee   : > { %2929 = vrsqrt.f32 %v4219_v52  ;;  %vm2207_vm3 = vweird.f32 %v4219_v52 }
 0x2f1   : > { %v1987_v36 = vpop.xlane.xlu2 %1986 }
 0x2f2   : > { %v4207_v47 = vmul.f32 %v1987_v36, %v3732_v49 }
 0x2f3   : > { %v2044_v6 = vpop.xlane.xlu0 %2043 }
 0x2f4   : > { %v2117_v17 = vmul.f32 %v4207_v47, %v4207_v47  ;;  %v2098_v11 = vmul.f32 %v2044_v6, %v3732_v49  ;;  %v4249_v18 = vpop.eup %2929 }
 0x2f5   : > { %vm2208_vm15 = vweird.f32 %v4249_v18 }
 0x2f6   : > { %v2136_v37 = vsub.f32 %v2098_v11, %v2117_v17  ;;  %vm4346_vm4 = vmor %vm2207_vm3, %vm2208_vm15 }
 0x2f8   : > { %v2155_v28 = vmax.f32 %v2136_v37, 0.0 }
 0x2fa   : > { %v4251_v6 = vadd.f32 1e-05, %v2155_v28 }
 0x2fb   : > { %v2046_v60 = vpop.xlane.xlu1 %2045  ;;  %v1989_v35 = vpop.xlane.xlu0 %1988 }
 0x2fc   : > { %v4222_v56 = vmul.f32 %v1989_v35, %v3732_v49  ;;  %v2099_v0 = vmul.f32 %v2046_v60, %v3732_v49  ;;  %v2192_v60 = vmul.f32 %v4241_v50, %v4215_v39  ;;  %2931 = vrsqrt.f32 %v4251_v6 }
 0x2fd   : > { %vm2217_vm1 = vweird.f32 %v4251_v6 }
 0x2fe   : > { %v2118_v20 = vmul.f32 %v4222_v56, %v4222_v56  ;;  %v2193_v3 = vmul.f32 %v4241_v50, %v2192_v60 }
 0x300   : > { %v2137_v5 = vsub.f32 %v2099_v0, %v2118_v20 }
 0x302   : > { %v4289_v0 = vpop.eup %2931 }
 0x303   : > { %v1991_v4 = vpop.xlane.xlu1 %1990  ;;  %vm2218_vm0 = vweird.f32 %v4289_v0 }
 0x304   : > { %v4228_v45 = vmul.f32 %v1991_v4, %v3732_v49  ;;  %vm4405_vm5 = vmor %vm2217_vm1, %vm2218_vm0 }
 0x305   : > { %v2048_v46 = vpop.xlane.xlu2 %2047 }
 0x306   : > { %v2119_v33 = vmul.f32 %v4228_v45, %v4228_v45  ;;  %v2100_v62 = vmul.f32 %v2048_v46, %v3732_v49 }
 0x308   : > { %v2138_v26 = vsub.f32 %v2100_v62, %v2119_v33  ;;  %v2194_v33 = vmul.f32 0.5, %v2193_v3 }
 0x30a   : > { %v2157_v42 = vmax.f32 %v2138_v26, 0.0 }
 0x30c   : > { %v4280_v37 = vadd.f32 1e-05, %v2157_v42 }
 0x30d   : > { %v2050_v25 = vpop.xlane.xlu0 %2049  ;;  %v1993_v58 = vpop.xlane.xlu2 %1992 }
 0x30e   : > { %v4247_v43 = vmul.f32 %v1993_v58, %v3732_v49  ;;  %v2101_v35 = vmul.f32 %v2050_v25, %v3732_v49  ;;  %vm2237_vm10 = vweird.f32 %v4280_v37 }
 0x310   : > { %v2120_v30 = vmul.f32 %v4247_v43, %v4247_v43 }
 0x318   : > { %v1949_v61 = vpop.f32.mrf.mxu3 }
 0x319   : > { %v1950_v22 = vadd.f32 %v1949_v61, %v3945_v7  ;;  %v2156_v61 = vmax.f32 %v2137_v5, 0.0 }
 0x31b   : > { %v2052_v34 = vpop.xlane.xlu1 %2051  ;;  %v4258_v14 = vmax.f32 %v1950_v22, 0.0  ;;  %v4270_v46 = vadd.f32 1e-05, %v2156_v61 }
 0x31c   : > { %v2102_v58 = vmul.f32 %v2052_v34, %v3732_v49 }
 0x31d   : > { %v2034_v11 = vmul.f32 %v4258_v14, %v4258_v14  ;;  %2933 = vrsqrt.f32 %v4270_v46  ;;  %vm2227_vm7 = vweird.f32 %v4270_v46 }
 0x31e   : > { %v1939_v54 = vpop.f32.mrf.mxu2  ;;  %2935 = vrsqrt.f32 %v4280_v37 }
 0x31f   : > { %v1940_v19 = vadd.f32 %v1939_v54, %v3945_v7  ;;  %v1995_v54 = vpop.xlane.xlu0 %1994 }
 0x320   : > { %v4198_v16 = vpop.f32.mrf.mxu3 }
 0x321   : > { %v4201_v40 = vmax.f32 %v1940_v19, 0.0  ;;  %v2202_v19 = vmul.f32 %v4249_v18, %v4219_v52  ;;  %v1952_v25 = vadd.f32 %v4198_v16, %v3945_v7  ;;  %v4362_v52 = vld [vmem:[%s4824_s2 + $0x8] sm:$0xff] }
 0x323   : > { %2002 = vadd.xlane.f32.xlu1 %v4201_v40  ;;  %v2030_v23 = vmul.f32 %v4201_v40, %v4201_v40  ;;  %v1997_v10 = vpop.xlane.xlu1 %1996  ;;  %v2203_v4 = vmul.f32 %v4249_v18, %v2202_v19  ;;  %v4297_v22 = vmax.f32 %v1952_v25, 0.0  ;;  %v4308_v42 = vpop.eup %2933 }
 0x324   : > { %v4285_v20 = vmul.f32 %v1997_v10, %v3732_v49  ;;  %v4320_v10 = vpop.eup %2935  ;;  %v2222_v25 = vmul.f32 %v4308_v42, %v4270_v46  ;;  %vm2228_vm6 = vweird.f32 %v4308_v42 }
 0x325   : > { %2059 = vadd.xlane.f32.xlu2 %v2030_v23  ;;  %vm2238_vm8 = vweird.f32 %v4320_v10  ;;  %vm4441_vm9 = vmor %vm2227_vm7, %vm2228_vm6 }
 0x326   : > { %v1941_v51 = vpop.f32.mrf.mxu2  ;;  %v2122_v26 = vmul.f32 %v4285_v20, %v4285_v20  ;;  %vm4455_vm11 = vmor %vm2237_vm10, %vm2238_vm8 }
 0x327   : > { %v1942_v24 = vadd.f32 %v1941_v51, %v3945_v7  ;;  %v2054_v51 = vpop.xlane.xlu2 %2053 }
 0x328   : > { %v4210_v8 = vpop.f32.mrf.mxu3  ;;  %v2103_v34 = vmul.f32 %v2054_v51, %v3732_v49  ;;  %v2035_v51 = vmul.f32 %v4297_v22, %v4297_v22 }
 0x329   : > { %v4217_v59 = vmax.f32 %v1942_v24, 0.0  ;;  %v4273_v24 = vmul.f32 %v1995_v54, %v3732_v49  ;;  %v2195_v54 = vsub.f32 1.5, %v2194_v33  ;;  %v1955_v3 = vadd.f32 %v4210_v8, %v3945_v7 }
 0x32b   : > { %v2031_v12 = vmul.f32 %v4217_v59, %v4217_v59  ;;  %v2121_v62 = vmul.f32 %v4273_v24, %v4273_v24 }
 0x32d   : > { %2061 = vadd.xlane.f32.xlu0 %v2031_v12  ;;  %2004 = vadd.xlane.f32.xlu2 %v4217_v59  ;;  %v2139_v12 = vsub.f32 %v2101_v35, %v2120_v30  ;;  %v2140_v61 = vsub.f32 %v2102_v58, %v2121_v62  ;;  %v4332_v62 = vmax.f32 %v1955_v3, 0.0 }
 0x32f   : > { %v2158_v5 = vmax.f32 %v2139_v12, 0.0 }
 0x330   : > { %v4234_v41 = vpop.f32.mrf.mxu3  ;;  %v1944_v15 = vpop.f32.mrf.mxu2 }
 0x331   : > { %v1945_v38 = vadd.f32 %v1944_v15, %v3945_v7  ;;  %v1999_v60 = vpop.xlane.xlu2 %1998  ;;  %v1957_v19 = vadd.f32 %v4234_v41, %v3945_v7 }
 0x332   : > { %v2056_v15 = vpop.xlane.xlu0 %2055  ;;  %v4313_v35 = vmul.f32 %v1999_v60, %v3732_v49 }
 0x333   : > { %v4244_v21 = vmax.f32 %v1945_v38, 0.0  ;;  %v2204_v38 = vmul.f32 0.5, %v2203_v4  ;;  %v2159_v4 = vmax.f32 %v2140_v61, 0.0  ;;  %v4324_v8 = vmax.f32 %v1957_v19, 0.0 }
 0x334   : > { %v2123_v58 = vmul.f32 %v4313_v35, %v4313_v35 }
 0x335   : > { %2006 = vadd.xlane.f32.xlu0 %v4244_v21  ;;  %v2032_v55 = vmul.f32 %v4244_v21, %v4244_v21  ;;  %v2205_v30 = vsub.f32 1.5, %v2204_v38  ;;  %v4350_v60 = vadd.f32 1e-05, %v2159_v4  ;;  %v2037_v39 = vmul.f32 %v4324_v8, %v4324_v8 }
 0x337   : > { %2063 = vadd.xlane.f32.xlu1 %v2032_v55  ;;  %v2212_v55 = vmul.f32 %v4289_v0, %v4251_v6  ;;  %v2206_v12 = vmul.f32 %v4249_v18, %v2205_v30 }
 0x338   : > { %v4260_v36 = vpop.f32.mrf.mxu3  ;;  %v1946_v57 = vpop.f32.mrf.mxu2 }
 0x339   : > { %v1947_v23 = vadd.f32 %v1946_v57, %v3945_v7  ;;  %v4306_v57 = vadd.f32 1e-05, %v2158_v5  ;;  %v2213_v41 = vmul.f32 %v4289_v0, %v2212_v55  ;;  %v2210_v61 = vsel %vm4346_vm4, %v4249_v18, %v2206_v12 }
 0x33a   : > { %v2382_v18 = vsub.f32 %v3963_v1, %v4190_v53  ;;  %v2058_v4 = vpop.xlane.xlu1 %2057 }
 0x33b   : > { %v4275_v17 = vmax.f32 %v1947_v23, 0.0  ;;  %v2141_v23 = vsub.f32 %v2103_v34, %v2122_v26  ;;  %2937 = vrsqrt.f32 %v4306_v57  ;;  %v2214_v5 = vmul.f32 0.5, %v2213_v41 }
 0x33c   : > { %v2232_v26 = vmul.f32 %v4320_v10, %v4280_v37  ;;  %v2223_v34 = vmul.f32 %v4308_v42, %v2222_v25  ;;  %2939 = vrsqrt.f32 %v4350_v60  ;;  %v2105_v25 = vmul.f32 %v2058_v4, %v3732_v49 }
 0x33d   : > { %2067 = vadd.xlane.f32.xlu0 %v2034_v11  ;;  %v2033_v28 = vmul.f32 %v4275_v17, %v4275_v17  ;;  %v2196_v11 = vmul.f32 %v4241_v50, %v2195_v54  ;;  %v2160_v33 = vmax.f32 %v2141_v23, 0.0  ;;  %v2381_v54 = vsub.f32 %v3950_v13, %v4187_v48 }
 0x33e   : > { %v1960_v13 = vadd.f32 %v4260_v36, %v3945_v7  ;;  %v2036_v48 = vmul.f32 %v4332_v62, %v4332_v62  ;;  %v2233_v41 = vmul.f32 %v4320_v10, %v2232_v26  ;;  %v2224_v12 = vmul.f32 0.5, %v2223_v34 }
 0x33f   : > { %2065 = vadd.xlane.f32.xlu2 %v2033_v28  ;;  %2008 = vadd.xlane.f32.xlu1 %v4275_v17  ;;  %v2001_v28 = vpop.xlane.xlu0 %2000  ;;  %v2200_v19 = vsel %vm4339_vm2, %v4241_v50, %v2196_v11  ;;  %v4371_v30 = vadd.f32 1e-05, %v2160_v33  ;;  %v4383_v50 = vperm.slane %v4362_v52, 0  ;;  %v2401_v11 = vmul.f32 %v2382_v18, %v2210_v61 }
 0x340   : > { %v1961_v16 = vpop.f32.mrf.mxu3  ;;  %v2400_v36 = vmul.f32 %v2381_v54, %v2200_v19  ;;  %v4390_v53 = vmax.f32 %v1960_v13, 0.0  ;;  %v2234_v33 = vmul.f32 0.5, %v2233_v41  ;;  %v2225_v26 = vsub.f32 1.5, %v2224_v12 }
 0x341   : > { %v2104_v16 = vmul.f32 %v2056_v15, %v3732_v49  ;;  %v4353_v15 = vmul.f32 %v2001_v28, %v3732_v49  ;;  %v4377_v3 = vpop.eup %2937  ;;  %2941 = vrsqrt.f32 %v4371_v30  ;;  %v4425_v41 = vperm.slane %v4362_v52, 3 }
 0x342   : > { %v2420_v38 = vmul.f32 %v4383_v50, %v2400_v36  ;;  %v4402_v55 = vpop.eup %2939  ;;  %v2038_v34 = vmul.f32 %v4390_v53, %v4390_v53  ;;  %v2235_v19 = vsub.f32 1.5, %v2234_v33  ;;  %v2226_v4 = vmul.f32 %v4308_v42, %v2225_v26 }
 0x343   : > { %v2142_v23 = vsub.f32 %v2104_v16, %v2123_v58  ;;  %v2124_v7 = vmul.f32 %v4353_v15, %v4353_v15  ;;  %v2242_v58 = vmul.f32 %v4377_v3, %v4306_v57  ;;  %vm2248_vm12 = vweird.f32 %v4377_v3 }
 0x344   : > { %v2236_v36 = vmul.f32 %v4320_v10, %v2235_v19  ;;  %vm2247_vm13 = vweird.f32 %v4306_v57  ;;  %vm2258_vm15 = vweird.f32 %v4402_v55  ;;  %vm2257_vm2 = vweird.f32 %v4350_v60 }
 0x345   : > { %2012 = vadd.xlane.f32.xlu0 %v4297_v22  ;;  %v2161_v1 = vmax.f32 %v2142_v23, 0.0  ;;  %v2143_v16 = vsub.f32 %v2105_v25, %v2124_v7  ;;  %v2243_v23 = vmul.f32 %v4377_v3, %v2242_v58  ;;  %v4432_v7 = vperm.slane %v4362_v52, 2  ;;  %vm4481_vm14 = vmor %vm2247_vm13, %vm2248_vm12 }
 0x346   : > { %v2384_v58 = vsub.f32 %v4040_v2, %v4222_v56  ;;  %v2240_v37 = vsel %vm4455_vm11, %v4320_v10, %v2236_v36  ;;  %v2385_v56 = vsub.f32 %v4086_v44, %v4228_v45  ;;  %vm4503_vm4 = vmor %vm2257_vm2, %vm2258_vm15  ;;  %vm2267_vm0 = vweird.f32 %v4371_v30 }
 0x347   : > { %2010 = vadd.xlane.f32.xlu2 %v4258_v14  ;;  %2069 = vadd.xlane.f32.xlu1 %v2035_v51  ;;  %v2215_v51 = vsub.f32 1.5, %v2214_v5  ;;  %v4399_v5 = vperm.slane %v4362_v52, 1  ;;  %v4409_v61 = vadd.f32 1e-05, %v2161_v1  ;;  %v4418_v13 = vpop.eup %2941  ;;  %v2162_v18 = vmax.f32 %v2143_v16, 0.0 }
 0x348   : > { %v2262_v12 = vmul.f32 %v4418_v13, %v4371_v30  ;;  %vm2268_vm3 = vweird.f32 %v4418_v13 }
 0x349   : > { %v2216_v28 = vmul.f32 %v4289_v0, %v2215_v51  ;;  %v2440_v51 = vadd.f32 %v4399_v5, %v2420_v38  ;;  %2943 = vrsqrt.f32 %v4409_v61  ;;  %v4445_v25 = vadd.f32 1e-05, %v2162_v18  ;;  %vm2269_vm1 = vmor %vm2267_vm0, %vm2268_vm3 }
 0x34a   : > { %vm2277_vm6 = vweird.f32 %v4409_v61 }
 0x34b   : > { %v2220_v6 = vsel %vm4405_vm5, %v4289_v0, %v2216_v28  ;;  %v2252_v0 = vmul.f32 %v4402_v55, %v4350_v60  ;;  %v2542_v46 = vmul.f32 %v4425_v41, %v2440_v51  ;;  %v2230_v28 = vsel %vm4441_vm9, %v4308_v42, %v2226_v4 }
 0x34c   : > { %v2462_v26 = vmul.f32 %v4432_v7, %v2440_v51  ;;  %v2263_v42 = vmul.f32 %v4418_v13, %v2262_v12  ;;  %v2403_v2 = vmul.f32 %v2384_v58, %v2230_v28  ;;  %2945 = vrsqrt.f32 %v4445_v25 }
 0x34d   : > { %2073 = vadd.xlane.f32.xlu0 %v2037_v39  ;;  %v2421_v39 = vmul.f32 %v4383_v50, %v2401_v11  ;;  %v2244_v11 = vmul.f32 0.5, %v2243_v23  ;;  %v2253_v33 = vmul.f32 %v4402_v55, %v2252_v0  ;;  %v2387_v60 = vsub.f32 %v4155_v63, %v4273_v24 }
 0x34e   : > { %v2264_v18 = vmul.f32 0.5, %v2263_v42  ;;  %v2423_v51 = vmul.f32 %v4383_v50, %v2403_v2  ;;  %vm2287_vm9 = vweird.f32 %v4445_v25 }
 0x34f   : > { %2071 = vadd.xlane.f32.xlu2 %v2036_v48  ;;  %2014 = vadd.xlane.f32.xlu1 %v4332_v62  ;;  %v2383_v48 = vsub.f32 %v3995_v32, %v4207_v47  ;;  %v2441_v32 = vadd.f32 %v4399_v5, %v2421_v39  ;;  %v2245_v54 = vsub.f32 1.5, %v2244_v11  ;;  %v2254_v19 = vmul.f32 0.5, %v2253_v33 }
 0x350   : > { %v2265_v12 = vsub.f32 1.5, %v2264_v18 }
 0x351   : > { %v2402_v47 = vmul.f32 %v2383_v48, %v2220_v6  ;;  %v2543_v38 = vmul.f32 %v4425_v41, %v2441_v32  ;;  %v2404_v6 = vmul.f32 %v2385_v56, %v2240_v37  ;;  %v2246_v48 = vmul.f32 %v4377_v3, %v2245_v54 }
 0x352   : > { %v2463_v44 = vmul.f32 %v4432_v7, %v2441_v32  ;;  %v2255_v45 = vsub.f32 1.5, %v2254_v19  ;;  %v2386_v32 = vsub.f32 %v4132_v31, %v4247_v43  ;;  %v2388_v56 = vsub.f32 %v4167_v29, %v4285_v20 }
 0x353   : > { %v2422_v39 = vmul.f32 %v4383_v50, %v2402_v47  ;;  %v2424_v11 = vmul.f32 %v4383_v50, %v2404_v6  ;;  %v2250_v57 = vsel %vm4481_vm14, %v4377_v3, %v2246_v48  ;;  %v2266_v3 = vmul.f32 %v4418_v13, %v2265_v12 }
 0x354   : > { %v2256_v28 = vmul.f32 %v4402_v55, %v2255_v45  ;;  %v2405_v16 = vmul.f32 %v2386_v32, %v2250_v57 }
 0x355   : > { %2018 = vadd.xlane.f32.xlu0 %v4390_v53  ;;  %v2442_v23 = vadd.f32 %v4399_v5, %v2422_v39  ;;  %v2444_v58 = vadd.f32 %v4399_v5, %v2424_v11  ;;  %v2270_v2 = vsel %vm2269_vm1, %v4418_v13, %v2266_v3 }
 0x356   : > { %v2260_v39 = vsel %vm4503_vm4, %v4402_v55, %v2256_v28  ;;  %v2425_v37 = vmul.f32 %v4383_v50, %v2405_v16 }
 0x357   : > { %2016 = vadd.xlane.f32.xlu2 %v4324_v8  ;;  %2075 = vadd.xlane.f32.xlu1 %v2038_v34  ;;  %v4466_v34 = vpop.eup %2943  ;;  %v2544_v47 = vmul.f32 %v4425_v41, %v2442_v23  ;;  %v2464_v36 = vmul.f32 %v4432_v7, %v2442_v23  ;;  %v2546_v54 = vmul.f32 %v4425_v41, %v2444_v58 }
 0x358   : > { %v2272_v10 = vmul.f32 %v4466_v34, %v4409_v61  ;;  %v4479_v4 = vpop.eup %2945  ;;  %v2406_v55 = vmul.f32 %v2387_v60, %v2260_v39  ;;  %v2407_v23 = vmul.f32 %v2388_v56, %v2270_v2  ;;  %v2445_v63 = vadd.f32 %v4399_v5, %v2425_v37 }
 0x359   : > { %v2282_v33 = vmul.f32 %v4479_v4, %v4445_v25  ;;  %vm2278_vm5 = vweird.f32 %v4466_v34  ;;  %v2466_v6 = vmul.f32 %v4432_v7, %v2444_v58  ;;  %vm2288_vm8 = vweird.f32 %v4479_v4 }
 0x35a   : > { %v2273_v1 = vmul.f32 %v4466_v34, %v2272_v10  ;;  %v2426_v48 = vmul.f32 %v4383_v50, %v2406_v55  ;;  %v2427_v29 = vmul.f32 %v4383_v50, %v2407_v23  ;;  %vm2279_vm7 = vmor %vm2277_vm6, %vm2278_vm5  ;;  %v2547_v20 = vmul.f32 %v4425_v41, %v2445_v63 }
 0x35b   : > { %v2467_v18 = vmul.f32 %v4432_v7, %v2445_v63  ;;  %vm2289_vm10 = vmor %vm2287_vm9, %vm2288_vm8 }
 0x35c   : > { %v2274_v31 = vmul.f32 0.5, %v2273_v1  ;;  %v2447_v45 = vadd.f32 %v4399_v5, %v2427_v29 }
 0x35d   : > { %2561 = vadd.xlane.f32.xlu0 %v2542_v46  ;;  %v2443_v46 = vadd.f32 %v4399_v5, %v2423_v51  ;;  %v2389_v51 = vsub.f32 %v4175_v27, %v4313_v35  ;;  %v2390_v27 = vsub.f32 %v4181_v9, %v4353_v15 }
 0x35e   : > { %v2275_v30 = vsub.f32 1.5, %v2274_v31  ;;  %v2549_v35 = vmul.f32 %v4425_v41, %v2447_v45  ;;  %v2469_v57 = vmul.f32 %v4432_v7, %v2447_v45 }
 0x35f   : > { %2563 = vadd.xlane.f32.xlu1 %v2543_v38  ;;  %2481 = vadd.xlane.f32.xlu2 %v2462_v26  ;;  %v2545_v38 = vmul.f32 %v4425_v41, %v2443_v46  ;;  %v2283_v26 = vmul.f32 %v4479_v4, %v2282_v33  ;;  %v2465_v42 = vmul.f32 %v4432_v7, %v2443_v46 }
 0x360   : > { %v2276_v24 = vmul.f32 %v4466_v34, %v2275_v30 }
 0x361   : > { %v2284_v19 = vmul.f32 0.5, %v2283_v26 }
 0x362   : > { %v2280_v10 = vsel %vm2279_vm7, %v4466_v34, %v2276_v24 }
 0x363   : > { %v2285_v13 = vsub.f32 1.5, %v2284_v19  ;;  %v2408_v0 = vmul.f32 %v2389_v51, %v2280_v10 }
 0x365   : > { %2483 = vadd.xlane.f32.xlu0 %v2463_v44  ;;  %v2446_v44 = vadd.f32 %v4399_v5, %v2426_v48  ;;  %v2286_v61 = vmul.f32 %v4479_v4, %v2285_v13  ;;  %v2428_v11 = vmul.f32 %v4383_v50, %v2408_v0 }
 0x367   : > { %2565 = vadd.xlane.f32.xlu2 %v2544_v47  ;;  %2485 = vadd.xlane.f32.xlu1 %v2464_v36  ;;  %v2548_v47 = vmul.f32 %v4425_v41, %v2446_v44  ;;  %v2290_v34 = vsel %vm2289_vm10, %v4479_v4, %v2286_v61  ;;  %v2468_v36 = vmul.f32 %v4432_v7, %v2446_v44 }
 0x368   : > { %v2409_v12 = vmul.f32 %v2390_v27, %v2290_v34  ;;  %v2448_v25 = vadd.f32 %v4399_v5, %v2428_v11 }
 0x36a   : > { %v2429_v1 = vmul.f32 %v4383_v50, %v2409_v12  ;;  %v2550_v4 = vmul.f32 %v4425_v41, %v2448_v25  ;;  %v2470_v9 = vmul.f32 %v4432_v7, %v2448_v25 }
 0x36c   : > { %v2449_v15 = vadd.f32 %v4399_v5, %v2429_v1 }
 0x36d   : > { %2567 = vadd.xlane.f32.xlu0 %v2545_v38 }
 0x36e   : > { %v2551_v32 = vmul.f32 %v4425_v41, %v2449_v15  ;;  %v2471_v46 = vmul.f32 %v4432_v7, %v2449_v15 }
 0x36f   : > { %2569 = vadd.xlane.f32.xlu1 %v2546_v54  ;;  %2487 = vadd.xlane.f32.xlu2 %v2465_v42 }
 0x375   : > { %2489 = vadd.xlane.f32.xlu0 %v2466_v6 }
 0x377   : > { %2571 = vadd.xlane.f32.xlu2 %v2547_v20  ;;  %2491 = vadd.xlane.f32.xlu1 %v2467_v18 }
 0x37d   : > { %2573 = vadd.xlane.f32.xlu0 %v2548_v47 }
 0x37f   : > { %2575 = vadd.xlane.f32.xlu1 %v2549_v35  ;;  %2493 = vadd.xlane.f32.xlu2 %v2468_v36 }
 0x385   : > { %2495 = vadd.xlane.f32.xlu0 %v2469_v57 }
 0x387   : > { %2577 = vadd.xlane.f32.xlu2 %v2550_v4  ;;  %2497 = vadd.xlane.f32.xlu1 %v2470_v9 }
 0x38d   : > { %2579 = vadd.xlane.f32.xlu0 %v2551_v32 }
 0x38f   : > { %2499 = vadd.xlane.f32.xlu2 %v2471_v46 }
 0x396   : > { %v2003_v28 = vpop.xlane.xlu1 %2002 }
 0x397   : > { %v2087_v33 = vmul.f32 %v2003_v28, %v3732_v49 }
 0x398   : > { %v2060_v58 = vpop.xlane.xlu2 %2059 }
 0x399   : > { %v2125_v16 = vmul.f32 %v2087_v33, %v2087_v33  ;;  %v2106_v3 = vmul.f32 %v2060_v58, %v3732_v49  ;;  %v2391_v61 = vsub.f32 %v4201_v40, %v2087_v33 }
 0x39b   : > { %v2144_v31 = vsub.f32 %v2106_v3, %v2125_v16 }
 0x39d   : > { %v2163_v43 = vmax.f32 %v2144_v31, 0.0 }
 0x39f   : > { %v2182_v38 = vadd.f32 1e-05, %v2163_v43 }
 0x3a0   : > { %v2005_v26 = vpop.xlane.xlu2 %2004  ;;  %v2062_v39 = vpop.xlane.xlu0 %2061 }
 0x3a1   : > { %2947 = vrsqrt.f32 %v2182_v38  ;;  %v4556_v60 = vmul.f32 %v2005_v26, %v3732_v49  ;;  %v2107_v42 = vmul.f32 %v2062_v39, %v3732_v49  ;;  %vm2297_vm12 = vweird.f32 %v2182_v38 }
 0x3a3   : > { %v2126_v54 = vmul.f32 %v4556_v60, %v4556_v60  ;;  %v2392_v43 = vsub.f32 %v4217_v59, %v4556_v60 }
 0x3a5   : > { %v2145_v37 = vsub.f32 %v2107_v42, %v2126_v54 }
 0x3a7   : > { %v2948_v2 = vpop.eup %2947  ;;  %v2164_v30 = vmax.f32 %v2145_v37, 0.0 }
 0x3a8   : > { %v2292_v56 = vmul.f32 %v2948_v2, %v2182_v38  ;;  %v2007_v55 = vpop.xlane.xlu0 %2006  ;;  %vm2298_vm11 = vweird.f32 %v2948_v2 }
 0x3a9   : > { %v2183_v19 = vadd.f32 1e-05, %v2164_v30  ;;  %v4562_v23 = vmul.f32 %v2007_v55, %v3732_v49  ;;  %vm2299_vm13 = vmor %vm2297_vm12, %vm2298_vm11 }
 0x3aa   : > { %v2293_v63 = vmul.f32 %v2948_v2, %v2292_v56  ;;  %v2064_v24 = vpop.xlane.xlu1 %2063 }
 0x3ab   : > { %2949 = vrsqrt.f32 %v2183_v19  ;;  %v2127_v6 = vmul.f32 %v4562_v23, %v4562_v23  ;;  %v2108_v13 = vmul.f32 %v2064_v24, %v3732_v49  ;;  %vm2307_vm15 = vweird.f32 %v2183_v19 }
 0x3ac   : > { %v2294_v48 = vmul.f32 0.5, %v2293_v63  ;;  %v2459_v63 = vlaneseq }
 0x3ad   : > { %v2146_v20 = vsub.f32 %v2108_v13, %v2127_v6 }
 0x3ae   : > { %v2295_v29 = vsub.f32 1.5, %v2294_v48 }
 0x3af   : > { %v2165_v10 = vmax.f32 %v2146_v20, 0.0 }
 0x3b0   : > { %v2296_v18 = vmul.f32 %v2948_v2, %v2295_v29  ;;  %v2068_v51 = vpop.xlane.xlu0 %2067 }
 0x3b1   : > { %v2950_v44 = vpop.eup %2949  ;;  %v4568_v0 = vadd.f32 1e-05, %v2165_v10  ;;  %v2110_v60 = vmul.f32 %v2068_v51, %v3732_v49 }
 0x3b2   : > { %v2302_v45 = vmul.f32 %v2950_v44, %v2183_v19  ;;  %v2066_v47 = vpop.xlane.xlu2 %2065  ;;  %v2009_v34 = vpop.xlane.xlu1 %2008  ;;  %v2300_v27 = vsel %vm2299_vm13, %v2948_v2, %v2296_v18  ;;  %vm2308_vm14 = vweird.f32 %v2950_v44 }
 0x3b3   : > { %v4571_v35 = vmul.f32 %v2009_v34, %v3732_v49  ;;  %v2410_v36 = vmul.f32 %v2391_v61, %v2300_v27  ;;  %2951 = vrsqrt.f32 %v4568_v0  ;;  %v2109_v12 = vmul.f32 %v2066_v47, %v3732_v49  ;;  %vm2309_vm2 = vmor %vm2307_vm15, %vm2308_vm14 }
 0x3b4   : > { %v2303_v11 = vmul.f32 %v2950_v44, %v2302_v45  ;;  %v2460_v34 = vand.u32 127, %v2459_v63  ;;  %vm2317_vm4 = vweird.f32 %v4568_v0  ;;  %vm2660_vm15 = vcmask 15360  }
 0x3b5   : > { %v2128_v25 = vmul.f32 %v4571_v35, %v4571_v35  ;;  %v2430_v40 = vmul.f32 %v4383_v50, %v2410_v36 }
 0x3b6   : > { %v2304_v1 = vmul.f32 0.5, %v2303_v11  ;;  %vm2599_vm1 = vcmp.eq.s32.totalorder %v2460_v34, 1  ;;  %vm2519_vm5 = vcmp.eq.s32.totalorder %v2460_v34, 0 }
 0x3b7   : > { %v2147_v57 = vsub.f32 %v2109_v12, %v2128_v25  ;;  %v2450_v4 = vadd.f32 %v4399_v5, %v2430_v40  ;;  %v2393_v40 = vsub.f32 %v4244_v21, %v4562_v23 }
 0x3b8   : > { %v2305_v9 = vsub.f32 1.5, %v2304_v1  ;;  %v2013_v15 = vpop.xlane.xlu0 %2012 }
 0x3b9   : > { %v2166_v32 = vmax.f32 %v2147_v57, 0.0  ;;  %v4580_v46 = vmul.f32 %v2013_v15, %v3732_v49  ;;  %v2552_v28 = vmul.f32 %v4425_v41, %v2450_v4  ;;  %v2472_v33 = vmul.f32 %v4432_v7, %v2450_v4  ;;  %v2952_v58 = vpop.eup %2951 }
 0x3ba   : > { %v2306_v16 = vmul.f32 %v2950_v44, %v2305_v9  ;;  %v2011_v3 = vpop.xlane.xlu2 %2010  ;;  %v2070_v31 = vpop.xlane.xlu1 %2069  ;;  %v2312_v38 = vmul.f32 %v2952_v58, %v4568_v0  ;;  %vm2318_vm3 = vweird.f32 %v2952_v58 }
 0x3bb   : > { %v4587_v26 = vadd.f32 1e-05, %v2166_v32  ;;  %v2130_v39 = vmul.f32 %v4580_v46, %v4580_v46  ;;  %2581 = vadd.xlane.f32.xlu1 %v2552_v28  ;;  %2501 = vadd.xlane.f32.xlu0 %v2472_v33  ;;  %v4592_v54 = vmul.f32 %v2011_v3, %v3732_v49  ;;  %v2111_v42 = vmul.f32 %v2070_v31, %v3732_v49  ;;  %vm2319_vm0 = vmor %vm2317_vm4, %vm2318_vm3 }
 0x3bc   : > { %v2310_v37 = vsel %vm2309_vm2, %v2950_v44, %v2306_v16  ;;  %v2313_v2 = vmul.f32 %v2952_v58, %v2312_v38  ;;  %v2394_v32 = vsub.f32 %v4275_v17, %v4571_v35  ;;  %v2993_v3 = vmov 0.0  }
 0x3bd   : > { %2953 = vrsqrt.f32 %v4587_v26  ;;  %v2411_v59 = vmul.f32 %v2392_v43, %v2310_v37  ;;  %v2129_v30 = vmul.f32 %v4592_v54, %v4592_v54  ;;  %v2149_v56 = vsub.f32 %v2111_v42, %v2130_v39 }
 0x3be   : > { %v2314_v55 = vmul.f32 0.5, %v2313_v2  ;;  %v4626_v31 = vsel %vm2599_vm1, 1.0, %v2993_v3  ;;  %v4628_v43 = vsel %vm2519_vm5, 1.0, %v2993_v3  ;;  %vm2327_vm7 = vweird.f32 %v4587_v26 }
 0x3bf   : > { %v2431_v19 = vmul.f32 %v4383_v50, %v2411_v59  ;;  %v2148_v24 = vsub.f32 %v2110_v60, %v2129_v30  ;;  %v2168_v6 = vmax.f32 %v2149_v56, 0.0 }
 0x3c0   : > { %v2074_v48 = vpop.xlane.xlu0 %2073  ;;  %v2315_v13 = vsub.f32 1.5, %v2314_v55  ;;  %v2395_v55 = vsub.f32 %v4258_v14, %v4592_v54 }
 0x3c1   : > { %v2451_v29 = vadd.f32 %v4399_v5, %v2431_v19  ;;  %v2167_v20 = vmax.f32 %v2148_v24, 0.0  ;;  %v4601_v18 = vadd.f32 1e-05, %v2168_v6  ;;  %v2113_v19 = vmul.f32 %v2074_v48, %v3732_v49 }
 0x3c2   : > { %v2072_v10 = vpop.xlane.xlu2 %2071  ;;  %v2015_v51 = vpop.xlane.xlu1 %2014  ;;  %v2316_v61 = vmul.f32 %v2952_v58, %v2315_v13 }
 0x3c3   : > { %v2954_v44 = vpop.eup %2953  ;;  %v4604_v45 = vmul.f32 %v2015_v51, %v3732_v49  ;;  %v2553_v47 = vmul.f32 %v4425_v41, %v2451_v29  ;;  %v4609_v36 = vadd.f32 1e-05, %v2167_v20  ;;  %2955 = vrsqrt.f32 %v4601_v18 }
 0x3c4   : > { %v2322_v27 = vmul.f32 %v2954_v44, %v4587_v26  ;;  %v2112_v11 = vmul.f32 %v2072_v10, %v3732_v49  ;;  %v2473_v25 = vmul.f32 %v4432_v7, %v2451_v29  ;;  %v2320_v0 = vsel %vm2319_vm0, %v2952_v58, %v2316_v61 }
 0x3c5   : > { %v2131_v12 = vmul.f32 %v4604_v45, %v4604_v45  ;;  %2583 = vadd.xlane.f32.xlu2 %v2553_v47  ;;  %2957 = vrsqrt.f32 %v4609_v36  ;;  %v2412_v15 = vmul.f32 %v2393_v40, %v2320_v0  ;;  %vm2328_vm6 = vweird.f32 %v2954_v44 }
 0x3c6   : > { %v2323_v1 = vmul.f32 %v2954_v44, %v2322_v27  ;;  %2503 = vadd.xlane.f32.xlu1 %v2473_v25  ;;  %vm2329_vm8 = vmor %vm2327_vm7, %vm2328_vm6  ;;  %v2396_v26 = vsub.f32 %v4297_v22, %v4580_v46  ;;  %vm2347_vm9 = vweird.f32 %v4601_v18  ;;  %v4656_v10 = vperm.slane %v4362_v52, 4 }
 0x3c7   : > { %v2150_v57 = vsub.f32 %v2112_v11, %v2131_v12  ;;  %v2432_v59 = vmul.f32 %v4383_v50, %v2412_v15  ;;  %vm2337_vm12 = vweird.f32 %v4609_v36 }
 0x3c8   : > { %v2324_v4 = vmul.f32 0.5, %v2323_v1  ;;  %v2019_v9 = vpop.xlane.xlu0 %2018 }
 0x3c9   : > { %v2169_v28 = vmax.f32 %v2150_v57, 0.0  ;;  %v4622_v33 = vmul.f32 %v2019_v9, %v3732_v49  ;;  %v4624_v16 = vpop.eup %2955  ;;  %v2452_v46 = vadd.f32 %v4399_v5, %v2432_v59 }
 0x3ca   : > { %v2325_v21 = vsub.f32 1.5, %v2324_v4  ;;  %v2017_v23 = vpop.xlane.xlu2 %2016  ;;  %v2076_v58 = vpop.xlane.xlu1 %2075  ;;  %v2342_v17 = vmul.f32 %v4624_v16, %v4601_v18  ;;  %vm2348_vm10 = vweird.f32 %v4624_v16 }
 0x3cb   : > { %v4633_v35 = vadd.f32 1e-05, %v2169_v28  ;;  %v2133_v38 = vmul.f32 %v4622_v33, %v4622_v33  ;;  %v2958_v39 = vpop.eup %2957  ;;  %v4638_v37 = vmul.f32 %v2017_v23, %v3732_v49  ;;  %v2114_v2 = vmul.f32 %v2076_v58, %v3732_v49  ;;  %vm4675_vm13 = vmor %vm2347_vm9, %vm2348_vm10 }
 0x3cc   : > { %v2326_v42 = vmul.f32 %v2954_v44, %v2325_v21  ;;  %v2332_v60 = vmul.f32 %v2958_v39, %v4609_v36  ;;  %v2343_v30 = vmul.f32 %v4624_v16, %v2342_v17  ;;  %v2474_v61 = vmul.f32 %v4432_v7, %v2452_v46 }
 0x3cd   : > { %2959 = vrsqrt.f32 %v4633_v35  ;;  %v2132_v63 = vmul.f32 %v4638_v37, %v4638_v37  ;;  %v2152_v29 = vsub.f32 %v2114_v2, %v2133_v38  ;;  %vm2338_vm11 = vweird.f32 %v2958_v39 }
 0x3ce   : > { %v2330_v56 = vsel %vm2329_vm8, %v2954_v44, %v2326_v42  ;;  %v2333_v6 = vmul.f32 %v2958_v39, %v2332_v60  ;;  %v2344_v13 = vmul.f32 0.5, %v2343_v30  ;;  %v2554_v44 = vmul.f32 %v4425_v41, %v2452_v46  ;;  %2505 = vadd.xlane.f32.xlu2 %v2474_v61  ;;  %vm2339_vm14 = vmor %vm2337_vm12, %vm2338_vm11 }
 0x3cf   : > { %v2413_v24 = vmul.f32 %v2394_v32, %v2330_v56  ;;  %v2151_v22 = vsub.f32 %v2113_v19, %v2132_v63  ;;  %v2171_v48 = vmax.f32 %v2152_v29, 0.0  ;;  %vm2357_vm3 = vweird.f32 %v4633_v35 }
 0x3d0   : > { %v2562_v20 = vpop.xlane.xlu0 %2561  ;;  %v2334_v54 = vmul.f32 0.5, %v2333_v6  ;;  %v2345_v49 = vsub.f32 1.5, %v2344_v13  ;;  %2585 = vadd.xlane.f32.xlu0 %v2554_v44  ;;  %v2397_v29 = vsub.f32 %v4332_v62, %v4604_v45 }
 0x3d1   : > { %v2433_v14 = vmul.f32 %v4383_v50, %v2413_v24  ;;  %v2170_v51 = vmax.f32 %v2151_v22, 0.0  ;;  %v4663_v12 = vadd.f32 1e-05, %v2171_v48  ;;  %v2602_v1 = vmul.f32 %v4626_v31, %v2562_v20 }
 0x3d2   : > { %v2564_v47 = vpop.xlane.xlu1 %2563  ;;  %v2482_v34 = vpop.xlane.xlu2 %2481  ;;  %v2335_v11 = vsub.f32 1.5, %v2334_v54  ;;  %v2346_v52 = vmul.f32 %v4624_v16, %v2345_v49 }
 0x3d3   : > { %v2960_v27 = vpop.eup %2959  ;;  %v4666_v40 = vadd.f32 1e-05, %v2170_v51  ;;  %v2522_v0 = vmul.f32 %v4628_v43, %v2482_v34  ;;  %2961 = vrsqrt.f32 %v4663_v12  ;;  %v2453_v9 = vadd.f32 %v4399_v5, %v2433_v14 }
 0x3d4   : > { %v2352_v25 = vmul.f32 %v2960_v27, %v4633_v35  ;;  %v2336_v57 = vmul.f32 %v2958_v39, %v2335_v11  ;;  %v2350_v21 = vsel %vm4675_vm13, %v4624_v16, %v2346_v52  ;;  %v2603_v42 = vmul.f32 %v4626_v31, %v2564_v47 }
 0x3d5   : > { %2963 = vrsqrt.f32 %v4666_v40  ;;  %v2621_v32 = vadd.f32 %v2602_v1, %v2522_v0  ;;  %v2555_v36 = vmul.f32 %v4425_v41, %v2453_v9  ;;  %v2475_v28 = vmul.f32 %v4432_v7, %v2453_v9 }
 0x3d6   : > { %v2353_v15 = vmul.f32 %v2960_v27, %v2352_v25  ;;  %v2340_v18 = vsel %vm2339_vm14, %v2958_v39, %v2336_v57  ;;  %v2415_v38 = vmul.f32 %v2396_v26, %v2350_v21  ;;  %vm2358_vm2 = vweird.f32 %v2960_v27 }
 0x3d7   : > { %v2414_v23 = vmul.f32 %v2395_v55, %v2340_v18  ;;  %v2641_v3 = vadd.f32 %v4656_v10, %v2621_v32  ;;  %2587 = vadd.xlane.f32.xlu1 %v2555_v36  ;;  %vm2359_vm4 = vmor %vm2357_vm3, %vm2358_vm2  ;;  %vm2377_vm5 = vweird.f32 %v4663_v12  ;;  %vm2367_vm6 = vweird.f32 %v4666_v40 }
 0x3d8   : > { %v2354_v58 = vmul.f32 0.5, %v2353_v15  ;;  %v2484_v17 = vpop.xlane.xlu0 %2483  ;;  %v2435_v26 = vmul.f32 %v4383_v50, %v2415_v38  ;;  %2507 = vadd.xlane.f32.xlu0 %v2475_v28  ;;  %v2399_v15 = vsub.f32 %v4390_v53, %v4622_v33  ;;  %v2398_v36 = vsub.f32 %v4324_v8, %v4638_v37 }
 0x3d9   : > { %v2523_v2 = vmul.f32 %v4628_v43, %v2484_v17  ;;  %v2434_v39 = vmul.f32 %v4383_v50, %v2414_v23  ;;  %2661 = vst.msk [vmem:[%s4686_s15] sm:$0xff] %vm2660_vm15, %v2641_v3  ;;  %v2962_v16 = vpop.eup %2961 }
 0x3da   : > { %v2355_v59 = vsub.f32 1.5, %v2354_v58  ;;  %v2566_v60 = vpop.xlane.xlu2 %2565  ;;  %v2486_v30 = vpop.xlane.xlu1 %2485  ;;  %v2372_v6 = vmul.f32 %v2962_v16, %v4663_v12  ;;  %v2455_v62 = vadd.f32 %v4399_v5, %v2435_v26  ;;  %vm2378_vm0 = vweird.f32 %v2962_v16 }
 0x3db   : > { %v2622_v56 = vadd.f32 %v2603_v42, %v2523_v2  ;;  %v2604_v55 = vmul.f32 %v4626_v31, %v2566_v60  ;;  %v2524_v19 = vmul.f32 %v4628_v43, %v2486_v30  ;;  %v2964_v63 = vpop.eup %2963  ;;  %v2454_v13 = vadd.f32 %v4399_v5, %v2434_v39  ;;  %vm2379_vm7 = vmor %vm2377_vm5, %vm2378_vm0 }
 0x3dc   : > { %v2356_v24 = vmul.f32 %v2960_v27, %v2355_v59  ;;  %v2362_v22 = vmul.f32 %v2964_v63, %v4666_v40  ;;  %v2373_v54 = vmul.f32 %v2962_v16, %v2372_v6  ;;  %v2557_v11 = vmul.f32 %v4425_v41, %v2455_v62 }
 0x3dd   : > { %v2642_v46 = vadd.f32 %v4656_v10, %v2622_v56  ;;  %v2623_v20 = vadd.f32 %v2604_v55, %v2524_v19  ;;  %v2556_v35 = vmul.f32 %v4425_v41, %v2454_v13  ;;  %v2476_v49 = vmul.f32 %v4432_v7, %v2454_v13 }
 0x3de   : > { %v2360_v14 = vsel %vm2359_vm4, %v2960_v27, %v2356_v24  ;;  %v2363_v51 = vmul.f32 %v2964_v63, %v2362_v22  ;;  %v2374_v45 = vmul.f32 0.5, %v2373_v54  ;;  %vm2368_vm1 = vweird.f32 %v2964_v63 }
 0x3df   : > { %v2416_v48 = vmul.f32 %v2397_v29, %v2360_v14  ;;  %2662 = vst.msk [vmem:[%s4686_s15 + $0x8] sm:$0xff] %vm2660_vm15, %v2642_v46  ;;  %v2643_v44 = vadd.f32 %v4656_v10, %v2623_v20  ;;  %2589 = vadd.xlane.f32.xlu2 %v2556_v35  ;;  %2509 = vadd.xlane.f32.xlu1 %v2476_v49  ;;  %vm2369_vm8 = vmor %vm2367_vm6, %vm2368_vm1 }
 0x3e0   : > { %v2568_v61 = vpop.xlane.xlu0 %2567  ;;  %v2364_v34 = vmul.f32 0.5, %v2363_v51  ;;  %v2375_v27 = vsub.f32 1.5, %v2374_v45  ;;  %2591 = vadd.xlane.f32.xlu0 %v2557_v11  ;;  %v2477_v28 = vmul.f32 %v4432_v7, %v2455_v62 }
 0x3e1   : > { %v2436_v47 = vmul.f32 %v4383_v50, %v2416_v48  ;;  %2663 = vst.msk [vmem:[%s4686_s15 + $0x10] sm:$0xff] %vm2660_vm15, %v2643_v44  ;;  %v2605_v0 = vmul.f32 %v4626_v31, %v2568_v61 }
 0x3e2   : > { %v2570_v52 = vpop.xlane.xlu1 %2569  ;;  %v2488_v25 = vpop.xlane.xlu2 %2487  ;;  %v2365_v1 = vsub.f32 1.5, %v2364_v34  ;;  %v2376_v4 = vmul.f32 %v2962_v16, %v2375_v27 }
 0x3e3   : > { %v2525_v57 = vmul.f32 %v4628_v43, %v2488_v25  ;;  %v2456_v9 = vadd.f32 %v4399_v5, %v2436_v47  ;;  %v2606_v40 = vmul.f32 %v4626_v31, %v2570_v52 }
 0x3e4   : > { %v2366_v32 = vmul.f32 %v2964_v63, %v2365_v1  ;;  %v2380_v12 = vsel %vm2379_vm7, %v2962_v16, %v2376_v4 }
 0x3e5   : > { %v2624_v18 = vadd.f32 %v2605_v0, %v2525_v57  ;;  %v2418_v58 = vmul.f32 %v2399_v15, %v2380_v12  ;;  %v2478_v53 = vmul.f32 %v4432_v7, %v2456_v9  ;;  %v2558_v29 = vmul.f32 %v4425_v41, %v2456_v9 }
 0x3e6   : > { %v2370_v21 = vsel %vm2369_vm8, %v2964_v63, %v2366_v32 }
 0x3e7   : > { %v2644_v23 = vadd.f32 %v4656_v10, %v2624_v18  ;;  %v2417_v3 = vmul.f32 %v2398_v36, %v2370_v21  ;;  %2511 = vadd.xlane.f32.xlu2 %v2477_v28  ;;  %v2438_v8 = vmul.f32 %v4383_v50, %v2418_v58 }
 0x3e8   : > { %v2490_v33 = vpop.xlane.xlu0 %2489  ;;  %2513 = vadd.xlane.f32.xlu0 %v2478_v53 }
 0x3e9   : > { %2664 = vst.msk [vmem:[%s4686_s15 + $0x18] sm:$0xff] %vm2660_vm15, %v2644_v23  ;;  %v2526_v17 = vmul.f32 %v4628_v43, %v2490_v33  ;;  %v2437_v37 = vmul.f32 %v4383_v50, %v2417_v3  ;;  %v2458_v60 = vadd.f32 %v4399_v5, %v2438_v8 }
 0x3ea   : > { %v2572_v38 = vpop.xlane.xlu2 %2571  ;;  %v2492_v42 = vpop.xlane.xlu1 %2491 }
 0x3eb   : > { %v2625_v2 = vadd.f32 %v2606_v40, %v2526_v17  ;;  %v2607_v39 = vmul.f32 %v4626_v31, %v2572_v38  ;;  %v2527_v59 = vmul.f32 %v4628_v43, %v2492_v42  ;;  %v2457_v30 = vadd.f32 %v4399_v5, %v2437_v37 }
 0x3ec   : > { %v2480_v50 = vmul.f32 %v4432_v7, %v2458_v60  ;;  %v2560_v63 = vmul.f32 %v4425_v41, %v2458_v60 }
 0x3ed   : > { %v2645_v16 = vadd.f32 %v4656_v10, %v2625_v2  ;;  %v2626_v56 = vadd.f32 %v2607_v39, %v2527_v59  ;;  %v2479_v55 = vmul.f32 %v4432_v7, %v2457_v30  ;;  %v2559_v22 = vmul.f32 %v4425_v41, %v2457_v30 }
 0x3ef   : > { %2665 = vst.msk [vmem:[%s4686_s15 + $0x20] sm:$0xff] %vm2660_vm15, %v2645_v16  ;;  %v2646_v19 = vadd.f32 %v4656_v10, %v2626_v56  ;;  %2515 = vadd.xlane.f32.xlu1 %v2479_v55  ;;  %2517 = vadd.xlane.f32.xlu2 %v2480_v50 }
 0x3f0   : > { %v2574_v26 = vpop.xlane.xlu0 %2573  ;;  %2597 = vadd.xlane.f32.xlu0 %v2560_v63 }
 0x3f1   : > { %2666 = vst.msk [vmem:[%s4686_s15 + $0x28] sm:$0xff] %vm2660_vm15, %v2646_v19  ;;  %v2608_v6 = vmul.f32 %v4626_v31, %v2574_v26 }
 0x3f2   : > { %v2576_v5 = vpop.xlane.xlu1 %2575  ;;  %v2494_v24 = vpop.xlane.xlu2 %2493 }
 0x3f3   : > { %v2528_v13 = vmul.f32 %v4628_v43, %v2494_v24  ;;  %v2609_v14 = vmul.f32 %v4626_v31, %v2576_v5 }
 0x3f5   : > { %v2627_v7 = vadd.f32 %v2608_v6, %v2528_v13 }
 0x3f7   : > { %v2647_v46 = vadd.f32 %v4656_v10, %v2627_v7  ;;  %2593 = vadd.xlane.f32.xlu1 %v2558_v29  ;;  %2595 = vadd.xlane.f32.xlu2 %v2559_v22 }
 0x3f8   : > { %v2496_v20 = vpop.xlane.xlu0 %2495 }
 0x3f9   : > { %2667 = vst.msk [vmem:[%s4686_s15 + $0x30] sm:$0xff] %vm2660_vm15, %v2647_v46  ;;  %v2529_v54 = vmul.f32 %v4628_v43, %v2496_v20 }
 0x3fa   : > { %v2578_v35 = vpop.xlane.xlu2 %2577  ;;  %v2498_v49 = vpop.xlane.xlu1 %2497 }
 0x3fb   : > { %v2628_v48 = vadd.f32 %v2609_v14, %v2529_v54  ;;  %v2610_v51 = vmul.f32 %v4626_v31, %v2578_v35  ;;  %v2530_v41 = vmul.f32 %v4628_v43, %v2498_v49 }
 0x3fd   : > { %v2648_v44 = vadd.f32 %v4656_v10, %v2628_v48  ;;  %v2629_v62 = vadd.f32 %v2610_v51, %v2530_v41 }
 0x3ff   : > { %2668 = vst.msk [vmem:[%s4686_s15 + $0x38] sm:$0xff] %vm2660_vm15, %v2648_v44  ;;  %v2649_v45 = vadd.f32 %v4656_v10, %v2629_v62 }
 0x400   : > { %v2580_v61 = vpop.xlane.xlu0 %2579 }
 0x401   : > { %2669 = vst.msk [vmem:[%s4686_s15 + $0x40] sm:$0xff] %vm2660_vm15, %v2649_v45  ;;  %v2611_v34 = vmul.f32 %v4626_v31, %v2580_v61 }
 0x402   : > { %v2500_v47 = vpop.xlane.xlu2 %2499 }
 0x403   : > { %v2531_v27 = vmul.f32 %v4628_v43, %v2500_v47 }
 0x405   : > { %v2630_v11 = vadd.f32 %v2611_v34, %v2531_v27 }
 0x407   : > { %v2650_v52 = vadd.f32 %v4656_v10, %v2630_v11 }
 0x409   : > { %2670 = vst.msk [vmem:[%s4686_s15 + $0x48] sm:$0xff] %vm2660_vm15, %v2650_v52 }
 0x42e   : > { %v2582_v25 = vpop.xlane.xlu1 %2581  ;;  %v2502_v1 = vpop.xlane.xlu0 %2501 }
 0x42f   : > { %v2612_v0 = vmul.f32 %v4626_v31, %v2582_v25  ;;  %v2532_v57 = vmul.f32 %v4628_v43, %v2502_v1 }
 0x431   : > { %v2631_v4 = vadd.f32 %v2612_v0, %v2532_v57 }
 0x433   : > { %v2651_v9 = vadd.f32 %v4656_v10, %v2631_v4 }
 0x435   : > { %2671 = vst.msk [vmem:[%s4686_s15 + $0x50] sm:$0xff] %vm2660_vm15, %v2651_v9 }
 0x438   : > { %v2584_v15 = vpop.xlane.xlu2 %2583 }
 0x439   : > { %v2613_v32 = vmul.f32 %v4626_v31, %v2584_v15  ;;  %v2504_v18 = vpop.xlane.xlu1 %2503 }
 0x43a   : > { %v2533_v36 = vmul.f32 %v4628_v43, %v2504_v18 }
 0x43c   : > { %v2632_v28 = vadd.f32 %v2613_v32, %v2533_v36 }
 0x43e   : > { %v2652_v12 = vadd.f32 %v4656_v10, %v2632_v28 }
 0x440   : > { %2672 = vst.msk [vmem:[%s4686_s15 + $0x58] sm:$0xff] %vm2660_vm15, %v2652_v12 }
 0x441   : > { %v2506_v21 = vpop.xlane.xlu2 %2505 }
 0x442   : > { %v2534_v58 = vmul.f32 %v4628_v43, %v2506_v21 }
 0x443   : > { %v2586_v23 = vpop.xlane.xlu0 %2585 }
 0x444   : > { %v2614_v3 = vmul.f32 %v4626_v31, %v2586_v23 }
 0x446   : > { %v2633_v53 = vadd.f32 %v2614_v3, %v2534_v58 }
 0x448   : > { %v2653_v33 = vadd.f32 %v4656_v10, %v2633_v53 }
 0x44a   : > { %v2588_v40 = vpop.xlane.xlu1 %2587  ;;  %2673 = vst.msk [vmem:[%s4686_s15 + $0x60] sm:$0xff] %vm2660_vm15, %v2653_v33 }
 0x44b   : > { %v2615_v17 = vmul.f32 %v4626_v31, %v2588_v40  ;;  %v2508_v8 = vpop.xlane.xlu0 %2507 }
 0x44c   : > { %v2535_v37 = vmul.f32 %v4628_v43, %v2508_v8 }
 0x44e   : > { %v2634_v38 = vadd.f32 %v2615_v17, %v2535_v37 }
 0x450   : > { %v2654_v2 = vadd.f32 %v4656_v10, %v2634_v38 }
 0x452   : > { %v2590_v42 = vpop.xlane.xlu2 %2589  ;;  %v2510_v59 = vpop.xlane.xlu1 %2509  ;;  %2674 = vst.msk [vmem:[%s4686_s15 + $0x68] sm:$0xff] %vm2660_vm15, %v2654_v2 }
 0x453   : > { %v2616_v39 = vmul.f32 %v4626_v31, %v2590_v42  ;;  %v2536_v60 = vmul.f32 %v4628_v43, %v2510_v59  ;;  %v2592_v16 = vpop.xlane.xlu0 %2591 }
 0x454   : > { %v2617_v50 = vmul.f32 %v4626_v31, %v2592_v16 }
 0x455   : > { %v2635_v30 = vadd.f32 %v2616_v39, %v2536_v60 }
 0x457   : > { %v2655_v56 = vadd.f32 %v4656_v10, %v2635_v30 }
 0x459   : > { %2675 = vst.msk [vmem:[%s4686_s15 + $0x70] sm:$0xff] %vm2660_vm15, %v2655_v56 }
 0x45a   : > { %v2512_v55 = vpop.xlane.xlu2 %2511 }
 0x45b   : > { %v2537_v19 = vmul.f32 %v4628_v43, %v2512_v55  ;;  %v2514_v63 = vpop.xlane.xlu0 %2513 }
 0x45c   : > { %v2538_v46 = vmul.f32 %v4628_v43, %v2514_v63 }
 0x45d   : > { %v2636_v26 = vadd.f32 %v2617_v50, %v2537_v19 }
 0x45f   : > { %v2656_v5 = vadd.f32 %v4656_v10, %v2636_v26 }
 0x461   : > { %2676 = vst.msk [vmem:[%s4686_s15 + $0x78] sm:$0xff] %vm2660_vm15, %v2656_v5 }
 0x462   : > { %v2516_v24 = vpop.xlane.xlu1 %2515  ;;  %v2518_v6 = vpop.xlane.xlu2 %2517 }
 0x463   : > { %v2540_v13 = vmul.f32 %v4628_v43, %v2518_v6  ;;  %v2598_v7 = vpop.xlane.xlu0 %2597  ;;  %v2539_v54 = vmul.f32 %v4628_v43, %v2516_v24 }
 0x464   : > { %v2620_v29 = vmul.f32 %v4626_v31, %v2598_v7 }
 0x466   : > { %v2639_v22 = vadd.f32 %v2620_v29, %v2540_v13 }
 0x468   : > { %v2659_v35 = vadd.f32 %v4656_v10, %v2639_v22 }
 0x46a   : > { %v2594_v20 = vpop.xlane.xlu1 %2593  ;;  %v2596_v14 = vpop.xlane.xlu2 %2595  ;;  %2679 = vst.msk [vmem:[%s4686_s15 + $0x90] sm:$0xff] %vm2660_vm15, %v2659_v35 }
 0x46b   : > { %v2618_v49 = vmul.f32 %v4626_v31, %v2594_v20  ;;  %v2619_v48 = vmul.f32 %v4626_v31, %v2596_v14 }
 0x46d   : > { %v2637_v51 = vadd.f32 %v2618_v49, %v2538_v46  ;;  %v2638_v41 = vadd.f32 %v2619_v48, %v2539_v54 }
 0x46f   : > { %v2657_v44 = vadd.f32 %v4656_v10, %v2637_v51  ;;  %v2658_v62 = vadd.f32 %v4656_v10, %v2638_v41 }
 0x471   : > { %2677 = vst.msk [vmem:[%s4686_s15 + $0x80] sm:$0xff] %vm2660_vm15, %v2657_v44 }
 0x472   : > { %2678 = vst.msk [vmem:[%s4686_s15 + $0x88] sm:$0xff] %vm2660_vm15, %v2658_v62 }
 0x473 PF: > { %s16_s21 = sadd.s32 1, %s2989_s21  }
 0x474   : > { %p13_p4 = scmp.ge.s32.totalorder %s16_s21, 4  }
 0x476   :  { %15 = sbr.rel (!%p13_p4) target bundleno = 1 (0x1), region = 77 }

</bundles_post_ra>
